<compile_context>
chip_gen: v7x
topology: tpu7x:2x2x1
jax: 0.10.0
libtpu: 0.0.40
codegen_flags: <defaults>
</compile_context>

<pallas_src>
import jax
import jax.numpy as jnp
from jax.experimental import pallas as pl
from jax.experimental.pallas import tpu as pltpu

NUM_CLASSES = 2        # mlp_y / mlp_z out_features in the PyTorch module
LANE_PAD = 128         # lane-dense padding of the class dim for the output store
BN_EPS = 1e-5          # torch.nn.BatchNorm1d default eps


# ------------------------------------------------------------------ shared math
def _mxu(lhs, rhs):
    """MXU matmul: bf16 inputs, f32 accumulation (elementwise stays f32)."""
    return jnp.dot(lhs.astype(jnp.bfloat16), rhs.astype(jnp.bfloat16),
                   preferred_element_type=jnp.float32)


def _conv1d(x, w_taps, b):
    """Conv1d over the sequence (sublane) dim.  x: [L, Cin], w_taps: [k, Cin, Cout]."""
    k = w_taps.shape[0]
    l_out = x.shape[0] - k + 1
    acc = _mxu(x[0:l_out, :], w_taps[0])
    for dk in range(1, k):
        acc = acc + _mxu(x[dk:dk + l_out, :], w_taps[dk])
    return acc + b


def _maxpool1d(x, k, stride):
    """MaxPool1d(k, stride): windowed max (shifted slices) + 0/1 selection matmul."""
    length = x.shape[0]
    lw = length - k + 1
    w = x[0:lw, :]
    for dk in range(1, k):
        w = jnp.maximum(w, x[dk:dk + lw, :])
    l_out = (length - k) // stride + 1
    rows = jax.lax.broadcasted_iota(jnp.int32, (l_out, lw), 0)
    cols = jax.lax.broadcasted_iota(jnp.int32, (l_out, lw), 1)
    sel = (cols == stride * rows).astype(jnp.float32)      # exact 0/1 selection
    return jnp.dot(sel, w, preferred_element_type=jnp.float32)


def _devign_math(a, x0, xr, wg, wi, wh, bi, bh,
                 wy1, by1, wy2, by2, sy, ty,
                 wz1h, wz1x, bz1, wz2, bz2, sz, tz,
                 wmy, bmy, wmz, bmz):
    """Full DevignModel_mod forward on arrays (shared by kernel and reference)."""
    num_steps = wg.shape[0]

    # ---- GatedGraphConv: h_{t+1} = GRUCell(A @ (h_t @ W_t), h_t), sum aggregation
    h = x0
    for t in range(num_steps):
        m = _mxu(a, _mxu(h, wg[t]))
        r = jax.nn.sigmoid(_mxu(m, wi[0]) + bi[0] + _mxu(h, wh[0]) + bh[0])
        z = jax.nn.sigmoid(_mxu(m, wi[1]) + bi[1] + _mxu(h, wh[1]) + bh[1])
        g = jnp.tanh(_mxu(m, wi[2]) + bi[2] + r * (_mxu(h, wh[2]) + bh[2]))
        h = (1.0 - z) * g + z * h

    # ---- Y branch: conv(4) -> BN -> ReLU -> pool(4,2) -> conv(2) -> BN -> ReLU -> pool(3,2)
    y = _conv1d(h, wy1, by1)
    y = jnp.maximum(y * sy + ty, 0.0)
    y = _maxpool1d(y, 4, 2)
    y = _conv1d(y, wy2, by2)
    y = jnp.maximum(y * sy + ty, 0.0)
    y = _maxpool1d(y, 3, 2)

    # ---- Z branch on cat([h, x]) — first conv split by channel group so the
    #      concat is never materialized in-kernel.
    kz = wz1h.shape[0]
    l_out = h.shape[0] - kz + 1
    zc = _mxu(h[0:l_out, :], wz1h[0]) + _mxu(xr[0:l_out, :], wz1x[0])
    for dk in range(1, kz):
        zc = zc + _mxu(h[dk:dk + l_out, :], wz1h[dk]) + _mxu(xr[dk:dk + l_out, :], wz1x[dk])
    zc = zc + bz1
    zc = jnp.maximum(zc * sz + tz, 0.0)
    zc = _maxpool1d(zc, 4, 2)
    zc = _conv1d(zc, wz2, bz2)
    zc = jnp.maximum(zc * sz + tz, 0.0)
    zc = _maxpool1d(zc, 3, 2)

    # ---- heads: mlp_y(Y_2) * mlp_z(Z_2) -> mean over positions -> softmax.
    # Padded class lanes carry (-1e9) * (1.0) so the softmax ignores them.
    yy = jnp.dot(y, wmy, preferred_element_type=jnp.float32) + bmy
    zz = jnp.dot(zc, wmz, preferred_element_type=jnp.float32) + bmz
    avg = jnp.mean(yy * zz, axis=0, keepdims=True)                 # [1, LANE_PAD]
    mx = jnp.max(avg, axis=-1, keepdims=True)
    e = jnp.exp(avg - mx)
    return e / jnp.sum(e, axis=-1, keepdims=True)                  # [1, LANE_PAD]


# ------------------------------------------------------------------ Pallas kernel
def devign_kernel(*refs):
    in_refs, o_ref = refs[:-1], refs[-1]
    o_ref[...] = _devign_math(*(r[...] for r in in_refs))


# ------------------------------------------------------------------ glue / wrapper
def _prepare_operands(x, edge_index, params):
    n, f = x.shape
    h_dim = params["wg"].shape[-1]
    c_dim = params["wz1"].shape[-1]
    bf16 = jnp.bfloat16

    # Dense adjacency via one-hot contraction (no serialized scatter).  Messages
    # flow src -> dst with sum aggregation: adj[i, j] = #edges j -> i.
    src, dst = edge_index[0], edge_index[1]
    node_ids = jnp.arange(n, dtype=src.dtype)
    oh_src = (src[:, None] == node_ids[None, :]).astype(jnp.float32)   # [E, N]
    oh_dst = (dst[:, None] == node_ids[None, :]).astype(jnp.float32)   # [E, N]
    adj = jnp.dot(oh_dst.T, oh_src, preferred_element_type=jnp.float32)
    adj = adj.astype(bf16)   # small integer counts -> exact in bf16, halves footprint

    # GatedGraphConv zero-pads input features up to out_channels.
    x0 = jnp.pad(x, ((0, 0), (0, h_dim - f)))

    # Fold eval-mode BatchNorm1d into per-channel scale/shift (hoisted out of kernel).
    def bn_fold(gamma, beta, mean, var):
        scale = gamma / jnp.sqrt(var + BN_EPS)
        return scale.reshape(1, -1), (beta - mean * scale).reshape(1, -1)

    sy, ty = bn_fold(params["bn_y_gamma"], params["bn_y_beta"],
                     params["bn_y_mean"], params["bn_y_var"])
    sz, tz = bn_fold(params["bn_z_gamma"], params["bn_z_beta"],
                     params["bn_z_mean"], params["bn_z_var"])

    # Split the concat-path first conv by channel group ([h | x]).
    wz1h = params["wz1"][:, :h_dim, :].astype(bf16)
    wz1x = params["wz1"][:, h_dim:h_dim + f, :].astype(bf16)

    # Pad the 2-class head to a full 128-lane width (lane-dense output store).
    wmy = jnp.zeros((h_dim, LANE_PAD), jnp.float32).at[:, :NUM_CLASSES].set(params["wmy"])
    bmy = jnp.full((1, LANE_PAD), -1e9, jnp.float32).at[:, :NUM_CLASSES].set(params["bmy"])
    wmz = jnp.zeros((c_dim, LANE_PAD), jnp.float32).at[:, :NUM_CLASSES].set(params["wmz"])
    bmz = jnp.ones((1, LANE_PAD), jnp.float32).at[:, :NUM_CLASSES].set(params["bmz"])

    return (adj, x0, x,
            params["wg"].astype(bf16), params["wi"].astype(bf16), params["wh"].astype(bf16),
            params["bi"], params["bh"],
            params["wy1"].astype(bf16), params["by1"],
            params["wy2"].astype(bf16), params["by2"], sy, ty,
            wz1h, wz1x, params["bz1"],
            params["wz2"].astype(bf16), params["bz2"], sz, tz,
            wmy, bmy, wmz, bmz)


def devign_forward(x, edge_index, params):
    ops = _prepare_operands(x, edge_index, params)
    n = x.shape[0]
    h_dim = params["wg"].shape[-1]
    c_dim = params["wz1"].shape[-1]
    t = params["wg"].shape[0]

    # Advisory cost estimate so XLA schedules around the fused kernel sensibly.
    l1 = n - 3
    l3 = (l1 - 4) // 2 + 1 - 1
    flops = int(t * (14 * n * h_dim * h_dim + 2 * n * n * h_dim)
                + 8 * l1 * (h_dim * h_dim + c_dim * c_dim)
                + 4 * l3 * (h_dim * h_dim + c_dim * c_dim))
    transcendentals = int(t * 3 * n * h_dim + 2 * LANE_PAD)
    bytes_accessed = int(sum(o.size * o.dtype.itemsize for o in ops) + LANE_PAD * 4)

    vmem = pl.BlockSpec(memory_space=pltpu.MemorySpace.VMEM)
    out_pad = pl.pallas_call(
        devign_kernel,
        out_shape=jax.ShapeDtypeStruct((1, LANE_PAD), jnp.float32),
        in_specs=[vmem] * len(ops),
        out_specs=vmem,
        compiler_params=pltpu.CompilerParams(vmem_limit_bytes=32 * 1024 * 1024),
        cost_estimate=pl.CostEstimate(flops=flops, transcendentals=transcendentals,
                                      bytes_accessed=bytes_accessed),
    )(*ops)
    return out_pad[:, :NUM_CLASSES]


# ------------------------------------------------------------------ reference (same math, plain JAX)
def reference_forward(x, edge_index, params):
    ops = _prepare_operands(x, edge_index, params)
    return _devign_math(*ops)[:, :NUM_CLASSES]


# ------------------------------------------------------------------ param init
def init_params(key, input_dim, output_dim, num_steps):
    concat_dim = input_dim + output_dim
    ks = iter(jax.random.split(key, 26))

    def glorot(k, shape):
        fan_in, fan_out = shape[-2], shape[-1]
        lim = jnp.sqrt(6.0 / (fan_in + fan_out))
        return jax.random.uniform(k, shape, jnp.float32, -lim, lim)

    def small(k, shape):
        return 0.01 * jax.random.normal(k, shape, jnp.float32)

    p = {}
    # GatedGraphConv: per-step propagation weights + GRUCell (r, z, n order).
    p["wg"] = glorot(next(ks), (num_steps, output_dim, output_dim))
    p["wi"] = glorot(next(ks), (3, output_dim, output_dim))
    p["wh"] = glorot(next(ks), (3, output_dim, output_dim))
    p["bi"] = small(next(ks), (3, 1, output_dim))
    p["bh"] = small(next(ks), (3, 1, output_dim))
    # Y branch convs + shared BatchNorm1d(output_dim).
    p["wy1"] = glorot(next(ks), (4, output_dim, output_dim))
    p["by1"] = small(next(ks), (1, output_dim))
    p["wy2"] = glorot(next(ks), (2, output_dim, output_dim))
    p["by2"] = small(next(ks), (1, output_dim))
    p["bn_y_gamma"] = 1.0 + 0.1 * jax.random.normal(next(ks), (output_dim,), jnp.float32)
    p["bn_y_beta"] = 0.1 * jax.random.normal(next(ks), (output_dim,), jnp.float32)
    p["bn_y_mean"] = 0.1 * jax.random.normal(next(ks), (output_dim,), jnp.float32)
    p["bn_y_var"] = 1.0 + 0.1 * jnp.abs(jax.random.normal(next(ks), (output_dim,), jnp.float32))
    # Z (concat) branch convs + shared BatchNorm1d(concat_dim).
    p["wz1"] = glorot(next(ks), (4, concat_dim, concat_dim))
    p["bz1"] = small(next(ks), (1, concat_dim))
    p["wz2"] = glorot(next(ks), (2, concat_dim, concat_dim))
    p["bz2"] = small(next(ks), (1, concat_dim))
    p["bn_z_gamma"] = 1.0 + 0.1 * jax.random.normal(next(ks), (concat_dim,), jnp.float32)
    p["bn_z_beta"] = 0.1 * jax.random.normal(next(ks), (concat_dim,), jnp.float32)
    p["bn_z_mean"] = 0.1 * jax.random.normal(next(ks), (concat_dim,), jnp.float32)
    p["bn_z_var"] = 1.0 + 0.1 * jnp.abs(jax.random.normal(next(ks), (concat_dim,), jnp.float32))
    # Heads.
    p["wmy"] = glorot(next(ks), (output_dim, NUM_CLASSES))
    p["bmy"] = small(next(ks), (1, NUM_CLASSES))
    p["wmz"] = glorot(next(ks), (concat_dim, NUM_CLASSES))
    p["bmz"] = small(next(ks), (1, NUM_CLASSES))
    return p


# ------------------------------------------------------------------ main
if __name__ == "__main__":
    # Small version of DevignModel_mod(input_dim=100, output_dim=200, num_steps=8):
    # input_dim=16, output_dim=32, num_steps=8, N=32 nodes, E=64 edges, batch of 1 graph.
    N, INPUT_DIM, OUTPUT_DIM, NUM_STEPS, NUM_EDGES = 32, 16, 32, 8, 64

    key = jax.random.PRNGKey(0)
    k_x, k_e1, k_e2, k_p = jax.random.split(key, 4)

    x = jax.random.normal(k_x, (N, INPUT_DIM), jnp.float32)
    src = jax.random.randint(k_e1, (NUM_EDGES,), 0, N, jnp.int32)
    dst = jax.random.randint(k_e2, (NUM_EDGES,), 0, N, jnp.int32)
    edge_index = jnp.stack([src, dst])                       # [2, E]

    params = init_params(k_p, INPUT_DIM, OUTPUT_DIM, NUM_STEPS)

    out = devign_forward(x, edge_index, params)
    out = jax.block_until_ready(out)
    ref = reference_forward(x, edge_index, params)

    assert out.shape == (1, NUM_CLASSES), out.shape
    assert bool(jnp.all(jnp.isfinite(out)))
    assert jnp.allclose(jnp.sum(out, axis=-1), 1.0, atol=1e-3)          # softmax rows
    assert jnp.allclose(out, ref, atol=1e-2, rtol=1e-2), (out, ref)

    print("KERNEL_OK")
</pallas_src>

<mosaic_0001>
module attributes {stable_mosaic.version = 11 : i64} {
  func.func @devign_kernel(%arg0: memref<32x32xbf16, #tpu.memory_space<vmem>>, %arg1: memref<32x32xf32, #tpu.memory_space<vmem>>, %arg2: memref<32x16xf32, #tpu.memory_space<vmem>>, %arg3: memref<8x32x32xbf16, #tpu.memory_space<vmem>>, %arg4: memref<3x32x32xbf16, #tpu.memory_space<vmem>>, %arg5: memref<3x32x32xbf16, #tpu.memory_space<vmem>>, %arg6: memref<3x1x32xf32, #tpu.memory_space<vmem>>, %arg7: memref<3x1x32xf32, #tpu.memory_space<vmem>>, %arg8: memref<4x32x32xbf16, #tpu.memory_space<vmem>>, %arg9: memref<1x32xf32, #tpu.memory_space<vmem>>, %arg10: memref<2x32x32xbf16, #tpu.memory_space<vmem>>, %arg11: memref<1x32xf32, #tpu.memory_space<vmem>>, %arg12: memref<1x32xf32, #tpu.memory_space<vmem>>, %arg13: memref<1x32xf32, #tpu.memory_space<vmem>>, %arg14: memref<4x32x48xbf16, #tpu.memory_space<vmem>>, %arg15: memref<4x16x48xbf16, #tpu.memory_space<vmem>>, %arg16: memref<1x48xf32, #tpu.memory_space<vmem>>, %arg17: memref<2x48x48xbf16, #tpu.memory_space<vmem>>, %arg18: memref<1x48xf32, #tpu.memory_space<vmem>>, %arg19: memref<1x48xf32, #tpu.memory_space<vmem>>, %arg20: memref<1x48xf32, #tpu.memory_space<vmem>>, %arg21: memref<32x128xf32, #tpu.memory_space<vmem>>, %arg22: memref<1x128xf32, #tpu.memory_space<vmem>>, %arg23: memref<48x128xf32, #tpu.memory_space<vmem>>, %arg24: memref<1x128xf32, #tpu.memory_space<vmem>>, %arg25: memref<1x128xf32, #tpu.memory_space<vmem>>) attributes {dimension_semantics = [], scalar_prefetch = 0 : i64, scratch_operands = 0 : i64, tpu.core_type = #tpu.core_type<tc>} {
    %c0 = arith.constant 0 : index
    %c0_0 = arith.constant 0 : index
    %0 = vector.load %arg0[%c0, %c0_0] : memref<32x32xbf16, #tpu.memory_space<vmem>>, vector<32x32xbf16>
    %c0_1 = arith.constant 0 : index
    %c0_2 = arith.constant 0 : index
    %1 = vector.load %arg1[%c0_1, %c0_2] : memref<32x32xf32, #tpu.memory_space<vmem>>, vector<32x32xf32>
    %c0_3 = arith.constant 0 : index
    %c0_4 = arith.constant 0 : index
    %2 = vector.load %arg2[%c0_3, %c0_4] : memref<32x16xf32, #tpu.memory_space<vmem>>, vector<32x16xf32>
    %c0_5 = arith.constant 0 : index
    %c0_6 = arith.constant 0 : index
    %c0_7 = arith.constant 0 : index
    %3 = vector.load %arg3[%c0_5, %c0_6, %c0_7] : memref<8x32x32xbf16, #tpu.memory_space<vmem>>, vector<8x32x32xbf16>
    %c0_8 = arith.constant 0 : index
    %c0_9 = arith.constant 0 : index
    %c0_10 = arith.constant 0 : index
    %4 = vector.load %arg4[%c0_8, %c0_9, %c0_10] : memref<3x32x32xbf16, #tpu.memory_space<vmem>>, vector<3x32x32xbf16>
    %c0_11 = arith.constant 0 : index
    %c0_12 = arith.constant 0 : index
    %c0_13 = arith.constant 0 : index
    %5 = vector.load %arg5[%c0_11, %c0_12, %c0_13] : memref<3x32x32xbf16, #tpu.memory_space<vmem>>, vector<3x32x32xbf16>
    %c0_14 = arith.constant 0 : index
    %c0_15 = arith.constant 0 : index
    %c0_16 = arith.constant 0 : index
    %6 = vector.load %arg6[%c0_14, %c0_15, %c0_16] : memref<3x1x32xf32, #tpu.memory_space<vmem>>, vector<3x1x32xf32>
    %c0_17 = arith.constant 0 : index
    %c0_18 = arith.constant 0 : index
    %c0_19 = arith.constant 0 : index
    %7 = vector.load %arg7[%c0_17, %c0_18, %c0_19] : memref<3x1x32xf32, #tpu.memory_space<vmem>>, vector<3x1x32xf32>
    %c0_20 = arith.constant 0 : index
    %c0_21 = arith.constant 0 : index
    %c0_22 = arith.constant 0 : index
    %8 = vector.load %arg8[%c0_20, %c0_21, %c0_22] : memref<4x32x32xbf16, #tpu.memory_space<vmem>>, vector<4x32x32xbf16>
    %c0_23 = arith.constant 0 : index
    %c0_24 = arith.constant 0 : index
    %9 = vector.load %arg9[%c0_23, %c0_24] : memref<1x32xf32, #tpu.memory_space<vmem>>, vector<1x32xf32>
    %c0_25 = arith.constant 0 : index
    %c0_26 = arith.constant 0 : index
    %c0_27 = arith.constant 0 : index
    %10 = vector.load %arg10[%c0_25, %c0_26, %c0_27] : memref<2x32x32xbf16, #tpu.memory_space<vmem>>, vector<2x32x32xbf16>
    %c0_28 = arith.constant 0 : index
    %c0_29 = arith.constant 0 : index
    %11 = vector.load %arg11[%c0_28, %c0_29] : memref<1x32xf32, #tpu.memory_space<vmem>>, vector<1x32xf32>
    %c0_30 = arith.constant 0 : index
    %c0_31 = arith.constant 0 : index
    %12 = vector.load %arg12[%c0_30, %c0_31] : memref<1x32xf32, #tpu.memory_space<vmem>>, vector<1x32xf32>
    %c0_32 = arith.constant 0 : index
    %c0_33 = arith.constant 0 : index
    %13 = vector.load %arg13[%c0_32, %c0_33] : memref<1x32xf32, #tpu.memory_space<vmem>>, vector<1x32xf32>
    %c0_34 = arith.constant 0 : index
    %c0_35 = arith.constant 0 : index
    %c0_36 = arith.constant 0 : index
    %14 = vector.load %arg14[%c0_34, %c0_35, %c0_36] : memref<4x32x48xbf16, #tpu.memory_space<vmem>>, vector<4x32x48xbf16>
    %c0_37 = arith.constant 0 : index
    %c0_38 = arith.constant 0 : index
    %c0_39 = arith.constant 0 : index
    %15 = vector.load %arg15[%c0_37, %c0_38, %c0_39] : memref<4x16x48xbf16, #tpu.memory_space<vmem>>, vector<4x16x48xbf16>
    %c0_40 = arith.constant 0 : index
    %c0_41 = arith.constant 0 : index
    %16 = vector.load %arg16[%c0_40, %c0_41] : memref<1x48xf32, #tpu.memory_space<vmem>>, vector<1x48xf32>
    %c0_42 = arith.constant 0 : index
    %c0_43 = arith.constant 0 : index
    %c0_44 = arith.constant 0 : index
    %17 = vector.load %arg17[%c0_42, %c0_43, %c0_44] : memref<2x48x48xbf16, #tpu.memory_space<vmem>>, vector<2x48x48xbf16>
    %c0_45 = arith.constant 0 : index
    %c0_46 = arith.constant 0 : index
    %18 = vector.load %arg18[%c0_45, %c0_46] : memref<1x48xf32, #tpu.memory_space<vmem>>, vector<1x48xf32>
    %c0_47 = arith.constant 0 : index
    %c0_48 = arith.constant 0 : index
    %19 = vector.load %arg19[%c0_47, %c0_48] : memref<1x48xf32, #tpu.memory_space<vmem>>, vector<1x48xf32>
    %c0_49 = arith.constant 0 : index
    %c0_50 = arith.constant 0 : index
    %20 = vector.load %arg20[%c0_49, %c0_50] : memref<1x48xf32, #tpu.memory_space<vmem>>, vector<1x48xf32>
    %c0_51 = arith.constant 0 : index
    %c0_52 = arith.constant 0 : index
    %21 = vector.load %arg21[%c0_51, %c0_52] : memref<32x128xf32, #tpu.memory_space<vmem>>, vector<32x128xf32>
    %c0_53 = arith.constant 0 : index
    %c0_54 = arith.constant 0 : index
    %22 = vector.load %arg22[%c0_53, %c0_54] : memref<1x128xf32, #tpu.memory_space<vmem>>, vector<1x128xf32>
    %c0_55 = arith.constant 0 : index
    %c0_56 = arith.constant 0 : index
    %23 = vector.load %arg23[%c0_55, %c0_56] : memref<48x128xf32, #tpu.memory_space<vmem>>, vector<48x128xf32>
    %c0_57 = arith.constant 0 : index
    %c0_58 = arith.constant 0 : index
    %24 = vector.load %arg24[%c0_57, %c0_58] : memref<1x128xf32, #tpu.memory_space<vmem>>, vector<1x128xf32>
    %25 = vector.extract_strided_slice %3 {offsets = [0, 0, 0], sizes = [1, 32, 32], strides = [1, 1, 1]} : vector<8x32x32xbf16> to vector<1x32x32xbf16>
    %26 = vector.shape_cast %25 : vector<1x32x32xbf16> to vector<32x32xbf16>
    %27 = arith.truncf %1 : vector<32x32xf32> to vector<32x32xbf16>
    %cst = arith.constant dense<0.000000e+00> : vector<32x32xf32>
    %28 = tpu.matmul %27, %26, %cst {dimension_numbers = #tpu.dot_dimension_numbers<[1], [0], [0], [1], [0, 0, 1, 1], [], []>} : vector<32x32xbf16>, vector<32x32xbf16>, vector<32x32xf32> -> vector<32x32xf32>
    %29 = arith.truncf %28 : vector<32x32xf32> to vector<32x32xbf16>
    %cst_59 = arith.constant dense<0.000000e+00> : vector<32x32xf32>
    %30 = tpu.matmul %0, %29, %cst_59 {dimension_numbers = #tpu.dot_dimension_numbers<[1], [0], [0], [1], [0, 0, 1, 1], [], []>} : vector<32x32xbf16>, vector<32x32xbf16>, vector<32x32xf32> -> vector<32x32xf32>
    %31 = vector.extract_strided_slice %4 {offsets = [0, 0, 0], sizes = [1, 32, 32], strides = [1, 1, 1]} : vector<3x32x32xbf16> to vector<1x32x32xbf16>
    %32 = vector.shape_cast %31 : vector<1x32x32xbf16> to vector<32x32xbf16>
    %33 = arith.truncf %30 : vector<32x32xf32> to vector<32x32xbf16>
    %cst_60 = arith.constant dense<0.000000e+00> : vector<32x32xf32>
    %34 = tpu.matmul %33, %32, %cst_60 {dimension_numbers = #tpu.dot_dimension_numbers<[1], [0], [0], [1], [0, 0, 1, 1], [], []>} : vector<32x32xbf16>, vector<32x32xbf16>, vector<32x32xf32> -> vector<32x32xf32>
    %35 = vector.extract_strided_slice %6 {offsets = [0, 0, 0], sizes = [1, 1, 32], strides = [1, 1, 1]} : vector<3x1x32xf32> to vector<1x1x32xf32>
    %36 = vector.shape_cast %35 : vector<1x1x32xf32> to vector<1x32xf32>
    %37 = vector.broadcast %36 : vector<1x32xf32> to vector<32x32xf32>
    %38 = arith.addf %34, %37 : vector<32x32xf32>
    %39 = vector.extract_strided_slice %5 {offsets = [0, 0, 0], sizes = [1, 32, 32], strides = [1, 1, 1]} : vector<3x32x32xbf16> to vector<1x32x32xbf16>
    %40 = vector.shape_cast %39 : vector<1x32x32xbf16> to vector<32x32xbf16>
    %41 = arith.truncf %1 : vector<32x32xf32> to vector<32x32xbf16>
    %cst_61 = arith.constant dense<0.000000e+00> : vector<32x32xf32>
    %42 = tpu.matmul %41, %40, %cst_61 {dimension_numbers = #tpu.dot_dimension_numbers<[1], [0], [0], [1], [0, 0, 1, 1], [], []>} : vector<32x32xbf16>, vector<32x32xbf16>, vector<32x32xf32> -> vector<32x32xf32>
    %43 = arith.addf %38, %42 : vector<32x32xf32>
    %44 = vector.extract_strided_slice %7 {offsets = [0, 0, 0], sizes = [1, 1, 32], strides = [1, 1, 1]} : vector<3x1x32xf32> to vector<1x1x32xf32>
    %45 = vector.shape_cast %44 : vector<1x1x32xf32> to vector<1x32xf32>
    %46 = vector.broadcast %45 : vector<1x32xf32> to vector<32x32xf32>
    %47 = arith.addf %43, %46 : vector<32x32xf32>
    %48 = arith.negf %47 : vector<32x32xf32>
    %49 = math.exp %48 : vector<32x32xf32>
    %cst_62 = arith.constant 1.000000e+00 : f32
    %50 = vector.broadcast %cst_62 : f32 to vector<32x32xf32>
    %51 = arith.addf %50, %49 : vector<32x32xf32>
    %52 = arith.divf %50, %51 : vector<32x32xf32>
    %53 = vector.extract_strided_slice %4 {offsets = [1, 0, 0], sizes = [1, 32, 32], strides = [1, 1, 1]} : vector<3x32x32xbf16> to vector<1x32x32xbf16>
    %54 = vector.shape_cast %53 : vector<1x32x32xbf16> to vector<32x32xbf16>
    %55 = arith.truncf %30 : vector<32x32xf32> to vector<32x32xbf16>
    %cst_63 = arith.constant dense<0.000000e+00> : vector<32x32xf32>
    %56 = tpu.matmul %55, %54, %cst_63 {dimension_numbers = #tpu.dot_dimension_numbers<[1], [0], [0], [1], [0, 0, 1, 1], [], []>} : vector<32x32xbf16>, vector<32x32xbf16>, vector<32x32xf32> -> vector<32x32xf32>
    %57 = vector.extract_strided_slice %6 {offsets = [1, 0, 0], sizes = [1, 1, 32], strides = [1, 1, 1]} : vector<3x1x32xf32> to vector<1x1x32xf32>
    %58 = vector.shape_cast %57 : vector<1x1x32xf32> to vector<1x32xf32>
    %59 = vector.broadcast %58 : vector<1x32xf32> to vector<32x32xf32>
    %60 = arith.addf %56, %59 : vector<32x32xf32>
    %61 = vector.extract_strided_slice %5 {offsets = [1, 0, 0], sizes = [1, 32, 32], strides = [1, 1, 1]} : vector<3x32x32xbf16> to vector<1x32x32xbf16>
    %62 = vector.shape_cast %61 : vector<1x32x32xbf16> to vector<32x32xbf16>
    %63 = arith.truncf %1 : vector<32x32xf32> to vector<32x32xbf16>
    %cst_64 = arith.constant dense<0.000000e+00> : vector<32x32xf32>
    %64 = tpu.matmul %63, %62, %cst_64 {dimension_numbers = #tpu.dot_dimension_numbers<[1], [0], [0], [1], [0, 0, 1, 1], [], []>} : vector<32x32xbf16>, vector<32x32xbf16>, vector<32x32xf32> -> vector<32x32xf32>
    %65 = arith.addf %60, %64 : vector<32x32xf32>
    %66 = vector.extract_strided_slice %7 {offsets = [1, 0, 0], sizes = [1, 1, 32], strides = [1, 1, 1]} : vector<3x1x32xf32> to vector<1x1x32xf32>
    %67 = vector.shape_cast %66 : vector<1x1x32xf32> to vector<1x32xf32>
    %68 = vector.broadcast %67 : vector<1x32xf32> to vector<32x32xf32>
    %69 = arith.addf %65, %68 : vector<32x32xf32>
    %70 = arith.negf %69 : vector<32x32xf32>
    %71 = math.exp %70 : vector<32x32xf32>
    %cst_65 = arith.constant 1.000000e+00 : f32
    %72 = vector.broadcast %cst_65 : f32 to vector<32x32xf32>
    %73 = arith.addf %72, %71 : vector<32x32xf32>
    %74 = arith.divf %72, %73 : vector<32x32xf32>
    %75 = vector.extract_strided_slice %4 {offsets = [2, 0, 0], sizes = [1, 32, 32], strides = [1, 1, 1]} : vector<3x32x32xbf16> to vector<1x32x32xbf16>
    %76 = vector.shape_cast %75 : vector<1x32x32xbf16> to vector<32x32xbf16>
    %77 = arith.truncf %30 : vector<32x32xf32> to vector<32x32xbf16>
    %cst_66 = arith.constant dense<0.000000e+00> : vector<32x32xf32>
    %78 = tpu.matmul %77, %76, %cst_66 {dimension_numbers = #tpu.dot_dimension_numbers<[1], [0], [0], [1], [0, 0, 1, 1], [], []>} : vector<32x32xbf16>, vector<32x32xbf16>, vector<32x32xf32> -> vector<32x32xf32>
    %79 = vector.extract_strided_slice %6 {offsets = [2, 0, 0], sizes = [1, 1, 32], strides = [1, 1, 1]} : vector<3x1x32xf32> to vector<1x1x32xf32>
    %80 = vector.shape_cast %79 : vector<1x1x32xf32> to vector<1x32xf32>
    %81 = vector.broadcast %80 : vector<1x32xf32> to vector<32x32xf32>
    %82 = arith.addf %78, %81 : vector<32x32xf32>
    %83 = vector.extract_strided_slice %5 {offsets = [2, 0, 0], sizes = [1, 32, 32], strides = [1, 1, 1]} : vector<3x32x32xbf16> to vector<1x32x32xbf16>
    %84 = vector.shape_cast %83 : vector<1x32x32xbf16> to vector<32x32xbf16>
    %85 = arith.truncf %1 : vector<32x32xf32> to vector<32x32xbf16>
    %cst_67 = arith.constant dense<0.000000e+00> : vector<32x32xf32>
    %86 = tpu.matmul %85, %84, %cst_67 {dimension_numbers = #tpu.dot_dimension_numbers<[1], [0], [0], [1], [0, 0, 1, 1], [], []>} : vector<32x32xbf16>, vector<32x32xbf16>, vector<32x32xf32> -> vector<32x32xf32>
    %87 = vector.extract_strided_slice %7 {offsets = [2, 0, 0], sizes = [1, 1, 32], strides = [1, 1, 1]} : vector<3x1x32xf32> to vector<1x1x32xf32>
    %88 = vector.shape_cast %87 : vector<1x1x32xf32> to vector<1x32xf32>
    %89 = vector.broadcast %88 : vector<1x32xf32> to vector<32x32xf32>
    %90 = arith.addf %86, %89 : vector<32x32xf32>
    %91 = arith.mulf %52, %90 : vector<32x32xf32>
    %92 = arith.addf %82, %91 : vector<32x32xf32>
    %93 = math.tanh %92 : vector<32x32xf32>
    %cst_68 = arith.constant 1.000000e+00 : f32
    %94 = vector.broadcast %cst_68 : f32 to vector<32x32xf32>
    %95 = arith.subf %94, %74 : vector<32x32xf32>
    %96 = arith.mulf %95, %93 : vector<32x32xf32>
    %97 = arith.mulf %74, %1 : vector<32x32xf32>
    %98 = arith.addf %96, %97 : vector<32x32xf32>
    %99 = vector.extract_strided_slice %3 {offsets = [1, 0, 0], sizes = [1, 32, 32], strides = [1, 1, 1]} : vector<8x32x32xbf16> to vector<1x32x32xbf16>
    %100 = vector.shape_cast %99 : vector<1x32x32xbf16> to vector<32x32xbf16>
    %101 = arith.truncf %98 : vector<32x32xf32> to vector<32x32xbf16>
    %cst_69 = arith.constant dense<0.000000e+00> : vector<32x32xf32>
    %102 = tpu.matmul %101, %100, %cst_69 {dimension_numbers = #tpu.dot_dimension_numbers<[1], [0], [0], [1], [0, 0, 1, 1], [], []>} : vector<32x32xbf16>, vector<32x32xbf16>, vector<32x32xf32> -> vector<32x32xf32>
    %103 = arith.truncf %102 : vector<32x32xf32> to vector<32x32xbf16>
    %cst_70 = arith.constant dense<0.000000e+00> : vector<32x32xf32>
    %104 = tpu.matmul %0, %103, %cst_70 {dimension_numbers = #tpu.dot_dimension_numbers<[1], [0], [0], [1], [0, 0, 1, 1], [], []>} : vector<32x32xbf16>, vector<32x32xbf16>, vector<32x32xf32> -> vector<32x32xf32>
    %105 = vector.extract_strided_slice %4 {offsets = [0, 0, 0], sizes = [1, 32, 32], strides = [1, 1, 1]} : vector<3x32x32xbf16> to vector<1x32x32xbf16>
    %106 = vector.shape_cast %105 : vector<1x32x32xbf16> to vector<32x32xbf16>
    %107 = arith.truncf %104 : vector<32x32xf32> to vector<32x32xbf16>
    %cst_71 = arith.constant dense<0.000000e+00> : vector<32x32xf32>
    %108 = tpu.matmul %107, %106, %cst_71 {dimension_numbers = #tpu.dot_dimension_numbers<[1], [0], [0], [1], [0, 0, 1, 1], [], []>} : vector<32x32xbf16>, vector<32x32xbf16>, vector<32x32xf32> -> vector<32x32xf32>
    %109 = vector.extract_strided_slice %6 {offsets = [0, 0, 0], sizes = [1, 1, 32], strides = [1, 1, 1]} : vector<3x1x32xf32> to vector<1x1x32xf32>
    %110 = vector.shape_cast %109 : vector<1x1x32xf32> to vector<1x32xf32>
    %111 = vector.broadcast %110 : vector<1x32xf32> to vector<32x32xf32>
    %112 = arith.addf %108, %111 : vector<32x32xf32>
    %113 = vector.extract_strided_slice %5 {offsets = [0, 0, 0], sizes = [1, 32, 32], strides = [1, 1, 1]} : vector<3x32x32xbf16> to vector<1x32x32xbf16>
    %114 = vector.shape_cast %113 : vector<1x32x32xbf16> to vector<32x32xbf16>
    %115 = arith.truncf %98 : vector<32x32xf32> to vector<32x32xbf16>
    %cst_72 = arith.constant dense<0.000000e+00> : vector<32x32xf32>
    %116 = tpu.matmul %115, %114, %cst_72 {dimension_numbers = #tpu.dot_dimension_numbers<[1], [0], [0], [1], [0, 0, 1, 1], [], []>} : vector<32x32xbf16>, vector<32x32xbf16>, vector<32x32xf32> -> vector<32x32xf32>
    %117 = arith.addf %112, %116 : vector<32x32xf32>
    %118 = vector.extract_strided_slice %7 {offsets = [0, 0, 0], sizes = [1, 1, 32], strides = [1, 1, 1]} : vector<3x1x32xf32> to vector<1x1x32xf32>
    %119 = vector.shape_cast %118 : vector<1x1x32xf32> to vector<1x32xf32>
    %120 = vector.broadcast %119 : vector<1x32xf32> to vector<32x32xf32>
    %121 = arith.addf %117, %120 : vector<32x32xf32>
    %122 = arith.negf %121 : vector<32x32xf32>
    %123 = math.exp %122 : vector<32x32xf32>
    %cst_73 = arith.constant 1.000000e+00 : f32
    %124 = vector.broadcast %cst_73 : f32 to vector<32x32xf32>
    %125 = arith.addf %124, %123 : vector<32x32xf32>
    %126 = arith.divf %124, %125 : vector<32x32xf32>
    %127 = vector.extract_strided_slice %4 {offsets = [1, 0, 0], sizes = [1, 32, 32], strides = [1, 1, 1]} : vector<3x32x32xbf16> to vector<1x32x32xbf16>
    %128 = vector.shape_cast %127 : vector<1x32x32xbf16> to vector<32x32xbf16>
    %129 = arith.truncf %104 : vector<32x32xf32> to vector<32x32xbf16>
    %cst_74 = arith.constant dense<0.000000e+00> : vector<32x32xf32>
    %130 = tpu.matmul %129, %128, %cst_74 {dimension_numbers = #tpu.dot_dimension_numbers<[1], [0], [0], [1], [0, 0, 1, 1], [], []>} : vector<32x32xbf16>, vector<32x32xbf16>, vector<32x32xf32> -> vector<32x32xf32>
    %131 = vector.extract_strided_slice %6 {offsets = [1, 0, 0], sizes = [1, 1, 32], strides = [1, 1, 1]} : vector<3x1x32xf32> to vector<1x1x32xf32>
    %132 = vector.shape_cast %131 : vector<1x1x32xf32> to vector<1x32xf32>
    %133 = vector.broadcast %132 : vector<1x32xf32> to vector<32x32xf32>
    %134 = arith.addf %130, %133 : vector<32x32xf32>
    %135 = vector.extract_strided_slice %5 {offsets = [1, 0, 0], sizes = [1, 32, 32], strides = [1, 1, 1]} : vector<3x32x32xbf16> to vector<1x32x32xbf16>
    %136 = vector.shape_cast %135 : vector<1x32x32xbf16> to vector<32x32xbf16>
    %137 = arith.truncf %98 : vector<32x32xf32> to vector<32x32xbf16>
    %cst_75 = arith.constant dense<0.000000e+00> : vector<32x32xf32>
    %138 = tpu.matmul %137, %136, %cst_75 {dimension_numbers = #tpu.dot_dimension_numbers<[1], [0], [0], [1], [0, 0, 1, 1], [], []>} : vector<32x32xbf16>, vector<32x32xbf16>, vector<32x32xf32> -> vector<32x32xf32>
    %139 = arith.addf %134, %138 : vector<32x32xf32>
    %140 = vector.extract_strided_slice %7 {offsets = [1, 0, 0], sizes = [1, 1, 32], strides = [1, 1, 1]} : vector<3x1x32xf32> to vector<1x1x32xf32>
    %141 = vector.shape_cast %140 : vector<1x1x32xf32> to vector<1x32xf32>
    %142 = vector.broadcast %141 : vector<1x32xf32> to vector<32x32xf32>
    %143 = arith.addf %139, %142 : vector<32x32xf32>
    %144 = arith.negf %143 : vector<32x32xf32>
    %145 = math.exp %144 : vector<32x32xf32>
    %cst_76 = arith.constant 1.000000e+00 : f32
    %146 = vector.broadcast %cst_76 : f32 to vector<32x32xf32>
    %147 = arith.addf %146, %145 : vector<32x32xf32>
    %148 = arith.divf %146, %147 : vector<32x32xf32>
    %149 = vector.extract_strided_slice %4 {offsets = [2, 0, 0], sizes = [1, 32, 32], strides = [1, 1, 1]} : vector<3x32x32xbf16> to vector<1x32x32xbf16>
    %150 = vector.shape_cast %149 : vector<1x32x32xbf16> to vector<32x32xbf16>
    %151 = arith.truncf %104 : vector<32x32xf32> to vector<32x32xbf16>
    %cst_77 = arith.constant dense<0.000000e+00> : vector<32x32xf32>
    %152 = tpu.matmul %151, %150, %cst_77 {dimension_numbers = #tpu.dot_dimension_numbers<[1], [0], [0], [1], [0, 0, 1, 1], [], []>} : vector<32x32xbf16>, vector<32x32xbf16>, vector<32x32xf32> -> vector<32x32xf32>
    %153 = vector.extract_strided_slice %6 {offsets = [2, 0, 0], sizes = [1, 1, 32], strides = [1, 1, 1]} : vector<3x1x32xf32> to vector<1x1x32xf32>
    %154 = vector.shape_cast %153 : vector<1x1x32xf32> to vector<1x32xf32>
    %155 = vector.broadcast %154 : vector<1x32xf32> to vector<32x32xf32>
    %156 = arith.addf %152, %155 : vector<32x32xf32>
    %157 = vector.extract_strided_slice %5 {offsets = [2, 0, 0], sizes = [1, 32, 32], strides = [1, 1, 1]} : vector<3x32x32xbf16> to vector<1x32x32xbf16>
    %158 = vector.shape_cast %157 : vector<1x32x32xbf16> to vector<32x32xbf16>
    %159 = arith.truncf %98 : vector<32x32xf32> to vector<32x32xbf16>
    %cst_78 = arith.constant dense<0.000000e+00> : vector<32x32xf32>
    %160 = tpu.matmul %159, %158, %cst_78 {dimension_numbers = #tpu.dot_dimension_numbers<[1], [0], [0], [1], [0, 0, 1, 1], [], []>} : vector<32x32xbf16>, vector<32x32xbf16>, vector<32x32xf32> -> vector<32x32xf32>
    %161 = vector.extract_strided_slice %7 {offsets = [2, 0, 0], sizes = [1, 1, 32], strides = [1, 1, 1]} : vector<3x1x32xf32> to vector<1x1x32xf32>
    %162 = vector.shape_cast %161 : vector<1x1x32xf32> to vector<1x32xf32>
    %163 = vector.broadcast %162 : vector<1x32xf32> to vector<32x32xf32>
    %164 = arith.addf %160, %163 : vector<32x32xf32>
    %165 = arith.mulf %126, %164 : vector<32x32xf32>
    %166 = arith.addf %156, %165 : vector<32x32xf32>
    %167 = math.tanh %166 : vector<32x32xf32>
    %cst_79 = arith.constant 1.000000e+00 : f32
    %168 = vector.broadcast %cst_79 : f32 to vector<32x32xf32>
    %169 = arith.subf %168, %148 : vector<32x32xf32>
    %170 = arith.mulf %169, %167 : vector<32x32xf32>
    %171 = arith.mulf %148, %98 : vector<32x32xf32>
    %172 = arith.addf %170, %171 : vector<32x32xf32>
    %173 = vector.extract_strided_slice %3 {offsets = [2, 0, 0], sizes = [1, 32, 32], strides = [1, 1, 1]} : vector<8x32x32xbf16> to vector<1x32x32xbf16>
    %174 = vector.shape_cast %173 : vector<1x32x32xbf16> to vector<32x32xbf16>
    %175 = arith.truncf %172 : vector<32x32xf32> to vector<32x32xbf16>
    %cst_80 = arith.constant dense<0.000000e+00> : vector<32x32xf32>
    %176 = tpu.matmul %175, %174, %cst_80 {dimension_numbers = #tpu.dot_dimension_numbers<[1], [0], [0], [1], [0, 0, 1, 1], [], []>} : vector<32x32xbf16>, vector<32x32xbf16>, vector<32x32xf32> -> vector<32x32xf32>
    %177 = arith.truncf %176 : vector<32x32xf32> to vector<32x32xbf16>
    %cst_81 = arith.constant dense<0.000000e+00> : vector<32x32xf32>
    %178 = tpu.matmul %0, %177, %cst_81 {dimension_numbers = #tpu.dot_dimension_numbers<[1], [0], [0], [1], [0, 0, 1, 1], [], []>} : vector<32x32xbf16>, vector<32x32xbf16>, vector<32x32xf32> -> vector<32x32xf32>
    %179 = vector.extract_strided_slice %4 {offsets = [0, 0, 0], sizes = [1, 32, 32], strides = [1, 1, 1]} : vector<3x32x32xbf16> to vector<1x32x32xbf16>
    %180 = vector.shape_cast %179 : vector<1x32x32xbf16> to vector<32x32xbf16>
    %181 = arith.truncf %178 : vector<32x32xf32> to vector<32x32xbf16>
    %cst_82 = arith.constant dense<0.000000e+00> : vector<32x32xf32>
    %182 = tpu.matmul %181, %180, %cst_82 {dimension_numbers = #tpu.dot_dimension_numbers<[1], [0], [0], [1], [0, 0, 1, 1], [], []>} : vector<32x32xbf16>, vector<32x32xbf16>, vector<32x32xf32> -> vector<32x32xf32>
    %183 = vector.extract_strided_slice %6 {offsets = [0, 0, 0], sizes = [1, 1, 32], strides = [1, 1, 1]} : vector<3x1x32xf32> to vector<1x1x32xf32>
    %184 = vector.shape_cast %183 : vector<1x1x32xf32> to vector<1x32xf32>
    %185 = vector.broadcast %184 : vector<1x32xf32> to vector<32x32xf32>
    %186 = arith.addf %182, %185 : vector<32x32xf32>
    %187 = vector.extract_strided_slice %5 {offsets = [0, 0, 0], sizes = [1, 32, 32], strides = [1, 1, 1]} : vector<3x32x32xbf16> to vector<1x32x32xbf16>
    %188 = vector.shape_cast %187 : vector<1x32x32xbf16> to vector<32x32xbf16>
    %189 = arith.truncf %172 : vector<32x32xf32> to vector<32x32xbf16>
    %cst_83 = arith.constant dense<0.000000e+00> : vector<32x32xf32>
    %190 = tpu.matmul %189, %188, %cst_83 {dimension_numbers = #tpu.dot_dimension_numbers<[1], [0], [0], [1], [0, 0, 1, 1], [], []>} : vector<32x32xbf16>, vector<32x32xbf16>, vector<32x32xf32> -> vector<32x32xf32>
    %191 = arith.addf %186, %190 : vector<32x32xf32>
    %192 = vector.extract_strided_slice %7 {offsets = [0, 0, 0], sizes = [1, 1, 32], strides = [1, 1, 1]} : vector<3x1x32xf32> to vector<1x1x32xf32>
    %193 = vector.shape_cast %192 : vector<1x1x32xf32> to vector<1x32xf32>
    %194 = vector.broadcast %193 : vector<1x32xf32> to vector<32x32xf32>
    %195 = arith.addf %191, %194 : vector<32x32xf32>
    %196 = arith.negf %195 : vector<32x32xf32>
    %197 = math.exp %196 : vector<32x32xf32>
    %cst_84 = arith.constant 1.000000e+00 : f32
    %198 = vector.broadcast %cst_84 : f32 to vector<32x32xf32>
    %199 = arith.addf %198, %197 : vector<32x32xf32>
    %200 = arith.divf %198, %199 : vector<32x32xf32>
    %201 = vector.extract_strided_slice %4 {offsets = [1, 0, 0], sizes = [1, 32, 32], strides = [1, 1, 1]} : vector<3x32x32xbf16> to vector<1x32x32xbf16>
    %202 = vector.shape_cast %201 : vector<1x32x32xbf16> to vector<32x32xbf16>
    %203 = arith.truncf %178 : vector<32x32xf32> to vector<32x32xbf16>
    %cst_85 = arith.constant dense<0.000000e+00> : vector<32x32xf32>
    %204 = tpu.matmul %203, %202, %cst_85 {dimension_numbers = #tpu.dot_dimension_numbers<[1], [0], [0], [1], [0, 0, 1, 1], [], []>} : vector<32x32xbf16>, vector<32x32xbf16>, vector<32x32xf32> -> vector<32x32xf32>
    %205 = vector.extract_strided_slice %6 {offsets = [1, 0, 0], sizes = [1, 1, 32], strides = [1, 1, 1]} : vector<3x1x32xf32> to vector<1x1x32xf32>
    %206 = vector.shape_cast %205 : vector<1x1x32xf32> to vector<1x32xf32>
    %207 = vector.broadcast %206 : vector<1x32xf32> to vector<32x32xf32>
    %208 = arith.addf %204, %207 : vector<32x32xf32>
    %209 = vector.extract_strided_slice %5 {offsets = [1, 0, 0], sizes = [1, 32, 32], strides = [1, 1, 1]} : vector<3x32x32xbf16> to vector<1x32x32xbf16>
    %210 = vector.shape_cast %209 : vector<1x32x32xbf16> to vector<32x32xbf16>
    %211 = arith.truncf %172 : vector<32x32xf32> to vector<32x32xbf16>
    %cst_86 = arith.constant dense<0.000000e+00> : vector<32x32xf32>
    %212 = tpu.matmul %211, %210, %cst_86 {dimension_numbers = #tpu.dot_dimension_numbers<[1], [0], [0], [1], [0, 0, 1, 1], [], []>} : vector<32x32xbf16>, vector<32x32xbf16>, vector<32x32xf32> -> vector<32x32xf32>
    %213 = arith.addf %208, %212 : vector<32x32xf32>
    %214 = vector.extract_strided_slice %7 {offsets = [1, 0, 0], sizes = [1, 1, 32], strides = [1, 1, 1]} : vector<3x1x32xf32> to vector<1x1x32xf32>
    %215 = vector.shape_cast %214 : vector<1x1x32xf32> to vector<1x32xf32>
    %216 = vector.broadcast %215 : vector<1x32xf32> to vector<32x32xf32>
    %217 = arith.addf %213, %216 : vector<32x32xf32>
    %218 = arith.negf %217 : vector<32x32xf32>
    %219 = math.exp %218 : vector<32x32xf32>
    %cst_87 = arith.constant 1.000000e+00 : f32
    %220 = vector.broadcast %cst_87 : f32 to vector<32x32xf32>
    %221 = arith.addf %220, %219 : vector<32x32xf32>
    %222 = arith.divf %220, %221 : vector<32x32xf32>
    %223 = vector.extract_strided_slice %4 {offsets = [2, 0, 0], sizes = [1, 32, 32], strides = [1, 1, 1]} : vector<3x32x32xbf16> to vector<1x32x32xbf16>
    %224 = vector.shape_cast %223 : vector<1x32x32xbf16> to vector<32x32xbf16>
    %225 = arith.truncf %178 : vector<32x32xf32> to vector<32x32xbf16>
    %cst_88 = arith.constant dense<0.000000e+00> : vector<32x32xf32>
    %226 = tpu.matmul %225, %224, %cst_88 {dimension_numbers = #tpu.dot_dimension_numbers<[1], [0], [0], [1], [0, 0, 1, 1], [], []>} : vector<32x32xbf16>, vector<32x32xbf16>, vector<32x32xf32> -> vector<32x32xf32>
    %227 = vector.extract_strided_slice %6 {offsets = [2, 0, 0], sizes = [1, 1, 32], strides = [1, 1, 1]} : vector<3x1x32xf32> to vector<1x1x32xf32>
    %228 = vector.shape_cast %227 : vector<1x1x32xf32> to vector<1x32xf32>
    %229 = vector.broadcast %228 : vector<1x32xf32> to vector<32x32xf32>
    %230 = arith.addf %226, %229 : vector<32x32xf32>
    %231 = vector.extract_strided_slice %5 {offsets = [2, 0, 0], sizes = [1, 32, 32], strides = [1, 1, 1]} : vector<3x32x32xbf16> to vector<1x32x32xbf16>
    %232 = vector.shape_cast %231 : vector<1x32x32xbf16> to vector<32x32xbf16>
    %233 = arith.truncf %172 : vector<32x32xf32> to vector<32x32xbf16>
    %cst_89 = arith.constant dense<0.000000e+00> : vector<32x32xf32>
    %234 = tpu.matmul %233, %232, %cst_89 {dimension_numbers = #tpu.dot_dimension_numbers<[1], [0], [0], [1], [0, 0, 1, 1], [], []>} : vector<32x32xbf16>, vector<32x32xbf16>, vector<32x32xf32> -> vector<32x32xf32>
    %235 = vector.extract_strided_slice %7 {offsets = [2, 0, 0], sizes = [1, 1, 32], strides = [1, 1, 1]} : vector<3x1x32xf32> to vector<1x1x32xf32>
    %236 = vector.shape_cast %235 : vector<1x1x32xf32> to vector<1x32xf32>
    %237 = vector.broadcast %236 : vector<1x32xf32> to vector<32x32xf32>
    %238 = arith.addf %234, %237 : vector<32x32xf32>
    %239 = arith.mulf %200, %238 : vector<32x32xf32>
    %240 = arith.addf %230, %239 : vector<32x32xf32>
    %241 = math.tanh %240 : vector<32x32xf32>
    %cst_90 = arith.constant 1.000000e+00 : f32
    %242 = vector.broadcast %cst_90 : f32 to vector<32x32xf32>
    %243 = arith.subf %242, %222 : vector<32x32xf32>
    %244 = arith.mulf %243, %241 : vector<32x32xf32>
    %245 = arith.mulf %222, %172 : vector<32x32xf32>
    %246 = arith.addf %244, %245 : vector<32x32xf32>
    %247 = vector.extract_strided_slice %3 {offsets = [3, 0, 0], sizes = [1, 32, 32], strides = [1, 1, 1]} : vector<8x32x32xbf16> to vector<1x32x32xbf16>
    %248 = vector.shape_cast %247 : vector<1x32x32xbf16> to vector<32x32xbf16>
    %249 = arith.truncf %246 : vector<32x32xf32> to vector<32x32xbf16>
    %cst_91 = arith.constant dense<0.000000e+00> : vector<32x32xf32>
    %250 = tpu.matmul %249, %248, %cst_91 {dimension_numbers = #tpu.dot_dimension_numbers<[1], [0], [0], [1], [0, 0, 1, 1], [], []>} : vector<32x32xbf16>, vector<32x32xbf16>, vector<32x32xf32> -> vector<32x32xf32>
    %251 = arith.truncf %250 : vector<32x32xf32> to vector<32x32xbf16>
    %cst_92 = arith.constant dense<0.000000e+00> : vector<32x32xf32>
    %252 = tpu.matmul %0, %251, %cst_92 {dimension_numbers = #tpu.dot_dimension_numbers<[1], [0], [0], [1], [0, 0, 1, 1], [], []>} : vector<32x32xbf16>, vector<32x32xbf16>, vector<32x32xf32> -> vector<32x32xf32>
    %253 = vector.extract_strided_slice %4 {offsets = [0, 0, 0], sizes = [1, 32, 32], strides = [1, 1, 1]} : vector<3x32x32xbf16> to vector<1x32x32xbf16>
    %254 = vector.shape_cast %253 : vector<1x32x32xbf16> to vector<32x32xbf16>
    %255 = arith.truncf %252 : vector<32x32xf32> to vector<32x32xbf16>
    %cst_93 = arith.constant dense<0.000000e+00> : vector<32x32xf32>
    %256 = tpu.matmul %255, %254, %cst_93 {dimension_numbers = #tpu.dot_dimension_numbers<[1], [0], [0], [1], [0, 0, 1, 1], [], []>} : vector<32x32xbf16>, vector<32x32xbf16>, vector<32x32xf32> -> vector<32x32xf32>
    %257 = vector.extract_strided_slice %6 {offsets = [0, 0, 0], sizes = [1, 1, 32], strides = [1, 1, 1]} : vector<3x1x32xf32> to vector<1x1x32xf32>
    %258 = vector.shape_cast %257 : vector<1x1x32xf32> to vector<1x32xf32>
    %259 = vector.broadcast %258 : vector<1x32xf32> to vector<32x32xf32>
    %260 = arith.addf %256, %259 : vector<32x32xf32>
    %261 = vector.extract_strided_slice %5 {offsets = [0, 0, 0], sizes = [1, 32, 32], strides = [1, 1, 1]} : vector<3x32x32xbf16> to vector<1x32x32xbf16>
    %262 = vector.shape_cast %261 : vector<1x32x32xbf16> to vector<32x32xbf16>
    %263 = arith.truncf %246 : vector<32x32xf32> to vector<32x32xbf16>
    %cst_94 = arith.constant dense<0.000000e+00> : vector<32x32xf32>
    %264 = tpu.matmul %263, %262, %cst_94 {dimension_numbers = #tpu.dot_dimension_numbers<[1], [0], [0], [1], [0, 0, 1, 1], [], []>} : vector<32x32xbf16>, vector<32x32xbf16>, vector<32x32xf32> -> vector<32x32xf32>
    %265 = arith.addf %260, %264 : vector<32x32xf32>
    %266 = vector.extract_strided_slice %7 {offsets = [0, 0, 0], sizes = [1, 1, 32], strides = [1, 1, 1]} : vector<3x1x32xf32> to vector<1x1x32xf32>
    %267 = vector.shape_cast %266 : vector<1x1x32xf32> to vector<1x32xf32>
    %268 = vector.broadcast %267 : vector<1x32xf32> to vector<32x32xf32>
    %269 = arith.addf %265, %268 : vector<32x32xf32>
    %270 = arith.negf %269 : vector<32x32xf32>
    %271 = math.exp %270 : vector<32x32xf32>
    %cst_95 = arith.constant 1.000000e+00 : f32
    %272 = vector.broadcast %cst_95 : f32 to vector<32x32xf32>
    %273 = arith.addf %272, %271 : vector<32x32xf32>
    %274 = arith.divf %272, %273 : vector<32x32xf32>
    %275 = vector.extract_strided_slice %4 {offsets = [1, 0, 0], sizes = [1, 32, 32], strides = [1, 1, 1]} : vector<3x32x32xbf16> to vector<1x32x32xbf16>
    %276 = vector.shape_cast %275 : vector<1x32x32xbf16> to vector<32x32xbf16>
    %277 = arith.truncf %252 : vector<32x32xf32> to vector<32x32xbf16>
    %cst_96 = arith.constant dense<0.000000e+00> : vector<32x32xf32>
    %278 = tpu.matmul %277, %276, %cst_96 {dimension_numbers = #tpu.dot_dimension_numbers<[1], [0], [0], [1], [0, 0, 1, 1], [], []>} : vector<32x32xbf16>, vector<32x32xbf16>, vector<32x32xf32> -> vector<32x32xf32>
    %279 = vector.extract_strided_slice %6 {offsets = [1, 0, 0], sizes = [1, 1, 32], strides = [1, 1, 1]} : vector<3x1x32xf32> to vector<1x1x32xf32>
    %280 = vector.shape_cast %279 : vector<1x1x32xf32> to vector<1x32xf32>
    %281 = vector.broadcast %280 : vector<1x32xf32> to vector<32x32xf32>
    %282 = arith.addf %278, %281 : vector<32x32xf32>
    %283 = vector.extract_strided_slice %5 {offsets = [1, 0, 0], sizes = [1, 32, 32], strides = [1, 1, 1]} : vector<3x32x32xbf16> to vector<1x32x32xbf16>
    %284 = vector.shape_cast %283 : vector<1x32x32xbf16> to vector<32x32xbf16>
    %285 = arith.truncf %246 : vector<32x32xf32> to vector<32x32xbf16>
    %cst_97 = arith.constant dense<0.000000e+00> : vector<32x32xf32>
    %286 = tpu.matmul %285, %284, %cst_97 {dimension_numbers = #tpu.dot_dimension_numbers<[1], [0], [0], [1], [0, 0, 1, 1], [], []>} : vector<32x32xbf16>, vector<32x32xbf16>, vector<32x32xf32> -> vector<32x32xf32>
    %287 = arith.addf %282, %286 : vector<32x32xf32>
    %288 = vector.extract_strided_slice %7 {offsets = [1, 0, 0], sizes = [1, 1, 32], strides = [1, 1, 1]} : vector<3x1x32xf32> to vector<1x1x32xf32>
    %289 = vector.shape_cast %288 : vector<1x1x32xf32> to vector<1x32xf32>
    %290 = vector.broadcast %289 : vector<1x32xf32> to vector<32x32xf32>
    %291 = arith.addf %287, %290 : vector<32x32xf32>
    %292 = arith.negf %291 : vector<32x32xf32>
    %293 = math.exp %292 : vector<32x32xf32>
    %cst_98 = arith.constant 1.000000e+00 : f32
    %294 = vector.broadcast %cst_98 : f32 to vector<32x32xf32>
    %295 = arith.addf %294, %293 : vector<32x32xf32>
    %296 = arith.divf %294, %295 : vector<32x32xf32>
    %297 = vector.extract_strided_slice %4 {offsets = [2, 0, 0], sizes = [1, 32, 32], strides = [1, 1, 1]} : vector<3x32x32xbf16> to vector<1x32x32xbf16>
    %298 = vector.shape_cast %297 : vector<1x32x32xbf16> to vector<32x32xbf16>
    %299 = arith.truncf %252 : vector<32x32xf32> to vector<32x32xbf16>
    %cst_99 = arith.constant dense<0.000000e+00> : vector<32x32xf32>
    %300 = tpu.matmul %299, %298, %cst_99 {dimension_numbers = #tpu.dot_dimension_numbers<[1], [0], [0], [1], [0, 0, 1, 1], [], []>} : vector<32x32xbf16>, vector<32x32xbf16>, vector<32x32xf32> -> vector<32x32xf32>
    %301 = vector.extract_strided_slice %6 {offsets = [2, 0, 0], sizes = [1, 1, 32], strides = [1, 1, 1]} : vector<3x1x32xf32> to vector<1x1x32xf32>
    %302 = vector.shape_cast %301 : vector<1x1x32xf32> to vector<1x32xf32>
    %303 = vector.broadcast %302 : vector<1x32xf32> to vector<32x32xf32>
    %304 = arith.addf %300, %303 : vector<32x32xf32>
    %305 = vector.extract_strided_slice %5 {offsets = [2, 0, 0], sizes = [1, 32, 32], strides = [1, 1, 1]} : vector<3x32x32xbf16> to vector<1x32x32xbf16>
    %306 = vector.shape_cast %305 : vector<1x32x32xbf16> to vector<32x32xbf16>
    %307 = arith.truncf %246 : vector<32x32xf32> to vector<32x32xbf16>
    %cst_100 = arith.constant dense<0.000000e+00> : vector<32x32xf32>
    %308 = tpu.matmul %307, %306, %cst_100 {dimension_numbers = #tpu.dot_dimension_numbers<[1], [0], [0], [1], [0, 0, 1, 1], [], []>} : vector<32x32xbf16>, vector<32x32xbf16>, vector<32x32xf32> -> vector<32x32xf32>
    %309 = vector.extract_strided_slice %7 {offsets = [2, 0, 0], sizes = [1, 1, 32], strides = [1, 1, 1]} : vector<3x1x32xf32> to vector<1x1x32xf32>
    %310 = vector.shape_cast %309 : vector<1x1x32xf32> to vector<1x32xf32>
    %311 = vector.broadcast %310 : vector<1x32xf32> to vector<32x32xf32>
    %312 = arith.addf %308, %311 : vector<32x32xf32>
    %313 = arith.mulf %274, %312 : vector<32x32xf32>
    %314 = arith.addf %304, %313 : vector<32x32xf32>
    %315 = math.tanh %314 : vector<32x32xf32>
    %cst_101 = arith.constant 1.000000e+00 : f32
    %316 = vector.broadcast %cst_101 : f32 to vector<32x32xf32>
    %317 = arith.subf %316, %296 : vector<32x32xf32>
    %318 = arith.mulf %317, %315 : vector<32x32xf32>
    %319 = arith.mulf %296, %246 : vector<32x32xf32>
    %320 = arith.addf %318, %319 : vector<32x32xf32>
    %321 = vector.extract_strided_slice %3 {offsets = [4, 0, 0], sizes = [1, 32, 32], strides = [1, 1, 1]} : vector<8x32x32xbf16> to vector<1x32x32xbf16>
    %322 = vector.shape_cast %321 : vector<1x32x32xbf16> to vector<32x32xbf16>
    %323 = arith.truncf %320 : vector<32x32xf32> to vector<32x32xbf16>
    %cst_102 = arith.constant dense<0.000000e+00> : vector<32x32xf32>
    %324 = tpu.matmul %323, %322, %cst_102 {dimension_numbers = #tpu.dot_dimension_numbers<[1], [0], [0], [1], [0, 0, 1, 1], [], []>} : vector<32x32xbf16>, vector<32x32xbf16>, vector<32x32xf32> -> vector<32x32xf32>
    %325 = arith.truncf %324 : vector<32x32xf32> to vector<32x32xbf16>
    %cst_103 = arith.constant dense<0.000000e+00> : vector<32x32xf32>
    %326 = tpu.matmul %0, %325, %cst_103 {dimension_numbers = #tpu.dot_dimension_numbers<[1], [0], [0], [1], [0, 0, 1, 1], [], []>} : vector<32x32xbf16>, vector<32x32xbf16>, vector<32x32xf32> -> vector<32x32xf32>
    %327 = vector.extract_strided_slice %4 {offsets = [0, 0, 0], sizes = [1, 32, 32], strides = [1, 1, 1]} : vector<3x32x32xbf16> to vector<1x32x32xbf16>
    %328 = vector.shape_cast %327 : vector<1x32x32xbf16> to vector<32x32xbf16>
    %329 = arith.truncf %326 : vector<32x32xf32> to vector<32x32xbf16>
    %cst_104 = arith.constant dense<0.000000e+00> : vector<32x32xf32>
    %330 = tpu.matmul %329, %328, %cst_104 {dimension_numbers = #tpu.dot_dimension_numbers<[1], [0], [0], [1], [0, 0, 1, 1], [], []>} : vector<32x32xbf16>, vector<32x32xbf16>, vector<32x32xf32> -> vector<32x32xf32>
    %331 = vector.extract_strided_slice %6 {offsets = [0, 0, 0], sizes = [1, 1, 32], strides = [1, 1, 1]} : vector<3x1x32xf32> to vector<1x1x32xf32>
    %332 = vector.shape_cast %331 : vector<1x1x32xf32> to vector<1x32xf32>
    %333 = vector.broadcast %332 : vector<1x32xf32> to vector<32x32xf32>
    %334 = arith.addf %330, %333 : vector<32x32xf32>
    %335 = vector.extract_strided_slice %5 {offsets = [0, 0, 0], sizes = [1, 32, 32], strides = [1, 1, 1]} : vector<3x32x32xbf16> to vector<1x32x32xbf16>
    %336 = vector.shape_cast %335 : vector<1x32x32xbf16> to vector<32x32xbf16>
    %337 = arith.truncf %320 : vector<32x32xf32> to vector<32x32xbf16>
    %cst_105 = arith.constant dense<0.000000e+00> : vector<32x32xf32>
    %338 = tpu.matmul %337, %336, %cst_105 {dimension_numbers = #tpu.dot_dimension_numbers<[1], [0], [0], [1], [0, 0, 1, 1], [], []>} : vector<32x32xbf16>, vector<32x32xbf16>, vector<32x32xf32> -> vector<32x32xf32>
    %339 = arith.addf %334, %338 : vector<32x32xf32>
    %340 = vector.extract_strided_slice %7 {offsets = [0, 0, 0], sizes = [1, 1, 32], strides = [1, 1, 1]} : vector<3x1x32xf32> to vector<1x1x32xf32>
    %341 = vector.shape_cast %340 : vector<1x1x32xf32> to vector<1x32xf32>
    %342 = vector.broadcast %341 : vector<1x32xf32> to vector<32x32xf32>
    %343 = arith.addf %339, %342 : vector<32x32xf32>
    %344 = arith.negf %343 : vector<32x32xf32>
    %345 = math.exp %344 : vector<32x32xf32>
    %cst_106 = arith.constant 1.000000e+00 : f32
    %346 = vector.broadcast %cst_106 : f32 to vector<32x32xf32>
    %347 = arith.addf %346, %345 : vector<32x32xf32>
    %348 = arith.divf %346, %347 : vector<32x32xf32>
    %349 = vector.extract_strided_slice %4 {offsets = [1, 0, 0], sizes = [1, 32, 32], strides = [1, 1, 1]} : vector<3x32x32xbf16> to vector<1x32x32xbf16>
    %350 = vector.shape_cast %349 : vector<1x32x32xbf16> to vector<32x32xbf16>
    %351 = arith.truncf %326 : vector<32x32xf32> to vector<32x32xbf16>
    %cst_107 = arith.constant dense<0.000000e+00> : vector<32x32xf32>
    %352 = tpu.matmul %351, %350, %cst_107 {dimension_numbers = #tpu.dot_dimension_numbers<[1], [0], [0], [1], [0, 0, 1, 1], [], []>} : vector<32x32xbf16>, vector<32x32xbf16>, vector<32x32xf32> -> vector<32x32xf32>
    %353 = vector.extract_strided_slice %6 {offsets = [1, 0, 0], sizes = [1, 1, 32], strides = [1, 1, 1]} : vector<3x1x32xf32> to vector<1x1x32xf32>
    %354 = vector.shape_cast %353 : vector<1x1x32xf32> to vector<1x32xf32>
    %355 = vector.broadcast %354 : vector<1x32xf32> to vector<32x32xf32>
    %356 = arith.addf %352, %355 : vector<32x32xf32>
    %357 = vector.extract_strided_slice %5 {offsets = [1, 0, 0], sizes = [1, 32, 32], strides = [1, 1, 1]} : vector<3x32x32xbf16> to vector<1x32x32xbf16>
    %358 = vector.shape_cast %357 : vector<1x32x32xbf16> to vector<32x32xbf16>
    %359 = arith.truncf %320 : vector<32x32xf32> to vector<32x32xbf16>
    %cst_108 = arith.constant dense<0.000000e+00> : vector<32x32xf32>
    %360 = tpu.matmul %359, %358, %cst_108 {dimension_numbers = #tpu.dot_dimension_numbers<[1], [0], [0], [1], [0, 0, 1, 1], [], []>} : vector<32x32xbf16>, vector<32x32xbf16>, vector<32x32xf32> -> vector<32x32xf32>
    %361 = arith.addf %356, %360 : vector<32x32xf32>
    %362 = vector.extract_strided_slice %7 {offsets = [1, 0, 0], sizes = [1, 1, 32], strides = [1, 1, 1]} : vector<3x1x32xf32> to vector<1x1x32xf32>
    %363 = vector.shape_cast %362 : vector<1x1x32xf32> to vector<1x32xf32>
    %364 = vector.broadcast %363 : vector<1x32xf32> to vector<32x32xf32>
    %365 = arith.addf %361, %364 : vector<32x32xf32>
    %366 = arith.negf %365 : vector<32x32xf32>
    %367 = math.exp %366 : vector<32x32xf32>
    %cst_109 = arith.constant 1.000000e+00 : f32
    %368 = vector.broadcast %cst_109 : f32 to vector<32x32xf32>
    %369 = arith.addf %368, %367 : vector<32x32xf32>
    %370 = arith.divf %368, %369 : vector<32x32xf32>
    %371 = vector.extract_strided_slice %4 {offsets = [2, 0, 0], sizes = [1, 32, 32], strides = [1, 1, 1]} : vector<3x32x32xbf16> to vector<1x32x32xbf16>
    %372 = vector.shape_cast %371 : vector<1x32x32xbf16> to vector<32x32xbf16>
    %373 = arith.truncf %326 : vector<32x32xf32> to vector<32x32xbf16>
    %cst_110 = arith.constant dense<0.000000e+00> : vector<32x32xf32>
    %374 = tpu.matmul %373, %372, %cst_110 {dimension_numbers = #tpu.dot_dimension_numbers<[1], [0], [0], [1], [0, 0, 1, 1], [], []>} : vector<32x32xbf16>, vector<32x32xbf16>, vector<32x32xf32> -> vector<32x32xf32>
    %375 = vector.extract_strided_slice %6 {offsets = [2, 0, 0], sizes = [1, 1, 32], strides = [1, 1, 1]} : vector<3x1x32xf32> to vector<1x1x32xf32>
    %376 = vector.shape_cast %375 : vector<1x1x32xf32> to vector<1x32xf32>
    %377 = vector.broadcast %376 : vector<1x32xf32> to vector<32x32xf32>
    %378 = arith.addf %374, %377 : vector<32x32xf32>
    %379 = vector.extract_strided_slice %5 {offsets = [2, 0, 0], sizes = [1, 32, 32], strides = [1, 1, 1]} : vector<3x32x32xbf16> to vector<1x32x32xbf16>
    %380 = vector.shape_cast %379 : vector<1x32x32xbf16> to vector<32x32xbf16>
    %381 = arith.truncf %320 : vector<32x32xf32> to vector<32x32xbf16>
    %cst_111 = arith.constant dense<0.000000e+00> : vector<32x32xf32>
    %382 = tpu.matmul %381, %380, %cst_111 {dimension_numbers = #tpu.dot_dimension_numbers<[1], [0], [0], [1], [0, 0, 1, 1], [], []>} : vector<32x32xbf16>, vector<32x32xbf16>, vector<32x32xf32> -> vector<32x32xf32>
    %383 = vector.extract_strided_slice %7 {offsets = [2, 0, 0], sizes = [1, 1, 32], strides = [1, 1, 1]} : vector<3x1x32xf32> to vector<1x1x32xf32>
    %384 = vector.shape_cast %383 : vector<1x1x32xf32> to vector<1x32xf32>
    %385 = vector.broadcast %384 : vector<1x32xf32> to vector<32x32xf32>
    %386 = arith.addf %382, %385 : vector<32x32xf32>
    %387 = arith.mulf %348, %386 : vector<32x32xf32>
    %388 = arith.addf %378, %387 : vector<32x32xf32>
    %389 = math.tanh %388 : vector<32x32xf32>
    %cst_112 = arith.constant 1.000000e+00 : f32
    %390 = vector.broadcast %cst_112 : f32 to vector<32x32xf32>
    %391 = arith.subf %390, %370 : vector<32x32xf32>
    %392 = arith.mulf %391, %389 : vector<32x32xf32>
    %393 = arith.mulf %370, %320 : vector<32x32xf32>
    %394 = arith.addf %392, %393 : vector<32x32xf32>
    %395 = vector.extract_strided_slice %3 {offsets = [5, 0, 0], sizes = [1, 32, 32], strides = [1, 1, 1]} : vector<8x32x32xbf16> to vector<1x32x32xbf16>
    %396 = vector.shape_cast %395 : vector<1x32x32xbf16> to vector<32x32xbf16>
    %397 = arith.truncf %394 : vector<32x32xf32> to vector<32x32xbf16>
    %cst_113 = arith.constant dense<0.000000e+00> : vector<32x32xf32>
    %398 = tpu.matmul %397, %396, %cst_113 {dimension_numbers = #tpu.dot_dimension_numbers<[1], [0], [0], [1], [0, 0, 1, 1], [], []>} : vector<32x32xbf16>, vector<32x32xbf16>, vector<32x32xf32> -> vector<32x32xf32>
    %399 = arith.truncf %398 : vector<32x32xf32> to vector<32x32xbf16>
    %cst_114 = arith.constant dense<0.000000e+00> : vector<32x32xf32>
    %400 = tpu.matmul %0, %399, %cst_114 {dimension_numbers = #tpu.dot_dimension_numbers<[1], [0], [0], [1], [0, 0, 1, 1], [], []>} : vector<32x32xbf16>, vector<32x32xbf16>, vector<32x32xf32> -> vector<32x32xf32>
    %401 = vector.extract_strided_slice %4 {offsets = [0, 0, 0], sizes = [1, 32, 32], strides = [1, 1, 1]} : vector<3x32x32xbf16> to vector<1x32x32xbf16>
    %402 = vector.shape_cast %401 : vector<1x32x32xbf16> to vector<32x32xbf16>
    %403 = arith.truncf %400 : vector<32x32xf32> to vector<32x32xbf16>
    %cst_115 = arith.constant dense<0.000000e+00> : vector<32x32xf32>
    %404 = tpu.matmul %403, %402, %cst_115 {dimension_numbers = #tpu.dot_dimension_numbers<[1], [0], [0], [1], [0, 0, 1, 1], [], []>} : vector<32x32xbf16>, vector<32x32xbf16>, vector<32x32xf32> -> vector<32x32xf32>
    %405 = vector.extract_strided_slice %6 {offsets = [0, 0, 0], sizes = [1, 1, 32], strides = [1, 1, 1]} : vector<3x1x32xf32> to vector<1x1x32xf32>
    %406 = vector.shape_cast %405 : vector<1x1x32xf32> to vector<1x32xf32>
    %407 = vector.broadcast %406 : vector<1x32xf32> to vector<32x32xf32>
    %408 = arith.addf %404, %407 : vector<32x32xf32>
    %409 = vector.extract_strided_slice %5 {offsets = [0, 0, 0], sizes = [1, 32, 32], strides = [1, 1, 1]} : vector<3x32x32xbf16> to vector<1x32x32xbf16>
    %410 = vector.shape_cast %409 : vector<1x32x32xbf16> to vector<32x32xbf16>
    %411 = arith.truncf %394 : vector<32x32xf32> to vector<32x32xbf16>
    %cst_116 = arith.constant dense<0.000000e+00> : vector<32x32xf32>
    %412 = tpu.matmul %411, %410, %cst_116 {dimension_numbers = #tpu.dot_dimension_numbers<[1], [0], [0], [1], [0, 0, 1, 1], [], []>} : vector<32x32xbf16>, vector<32x32xbf16>, vector<32x32xf32> -> vector<32x32xf32>
    %413 = arith.addf %408, %412 : vector<32x32xf32>
    %414 = vector.extract_strided_slice %7 {offsets = [0, 0, 0], sizes = [1, 1, 32], strides = [1, 1, 1]} : vector<3x1x32xf32> to vector<1x1x32xf32>
    %415 = vector.shape_cast %414 : vector<1x1x32xf32> to vector<1x32xf32>
    %416 = vector.broadcast %415 : vector<1x32xf32> to vector<32x32xf32>
    %417 = arith.addf %413, %416 : vector<32x32xf32>
    %418 = arith.negf %417 : vector<32x32xf32>
    %419 = math.exp %418 : vector<32x32xf32>
    %cst_117 = arith.constant 1.000000e+00 : f32
    %420 = vector.broadcast %cst_117 : f32 to vector<32x32xf32>
    %421 = arith.addf %420, %419 : vector<32x32xf32>
    %422 = arith.divf %420, %421 : vector<32x32xf32>
    %423 = vector.extract_strided_slice %4 {offsets = [1, 0, 0], sizes = [1, 32, 32], strides = [1, 1, 1]} : vector<3x32x32xbf16> to vector<1x32x32xbf16>
    %424 = vector.shape_cast %423 : vector<1x32x32xbf16> to vector<32x32xbf16>
    %425 = arith.truncf %400 : vector<32x32xf32> to vector<32x32xbf16>
    %cst_118 = arith.constant dense<0.000000e+00> : vector<32x32xf32>
    %426 = tpu.matmul %425, %424, %cst_118 {dimension_numbers = #tpu.dot_dimension_numbers<[1], [0], [0], [1], [0, 0, 1, 1], [], []>} : vector<32x32xbf16>, vector<32x32xbf16>, vector<32x32xf32> -> vector<32x32xf32>
    %427 = vector.extract_strided_slice %6 {offsets = [1, 0, 0], sizes = [1, 1, 32], strides = [1, 1, 1]} : vector<3x1x32xf32> to vector<1x1x32xf32>
    %428 = vector.shape_cast %427 : vector<1x1x32xf32> to vector<1x32xf32>
    %429 = vector.broadcast %428 : vector<1x32xf32> to vector<32x32xf32>
    %430 = arith.addf %426, %429 : vector<32x32xf32>
    %431 = vector.extract_strided_slice %5 {offsets = [1, 0, 0], sizes = [1, 32, 32], strides = [1, 1, 1]} : vector<3x32x32xbf16> to vector<1x32x32xbf16>
    %432 = vector.shape_cast %431 : vector<1x32x32xbf16> to vector<32x32xbf16>
    %433 = arith.truncf %394 : vector<32x32xf32> to vector<32x32xbf16>
    %cst_119 = arith.constant dense<0.000000e+00> : vector<32x32xf32>
    %434 = tpu.matmul %433, %432, %cst_119 {dimension_numbers = #tpu.dot_dimension_numbers<[1], [0], [0], [1], [0, 0, 1, 1], [], []>} : vector<32x32xbf16>, vector<32x32xbf16>, vector<32x32xf32> -> vector<32x32xf32>
    %435 = arith.addf %430, %434 : vector<32x32xf32>
    %436 = vector.extract_strided_slice %7 {offsets = [1, 0, 0], sizes = [1, 1, 32], strides = [1, 1, 1]} : vector<3x1x32xf32> to vector<1x1x32xf32>
    %437 = vector.shape_cast %436 : vector<1x1x32xf32> to vector<1x32xf32>
    %438 = vector.broadcast %437 : vector<1x32xf32> to vector<32x32xf32>
    %439 = arith.addf %435, %438 : vector<32x32xf32>
    %440 = arith.negf %439 : vector<32x32xf32>
    %441 = math.exp %440 : vector<32x32xf32>
    %cst_120 = arith.constant 1.000000e+00 : f32
    %442 = vector.broadcast %cst_120 : f32 to vector<32x32xf32>
    %443 = arith.addf %442, %441 : vector<32x32xf32>
    %444 = arith.divf %442, %443 : vector<32x32xf32>
    %445 = vector.extract_strided_slice %4 {offsets = [2, 0, 0], sizes = [1, 32, 32], strides = [1, 1, 1]} : vector<3x32x32xbf16> to vector<1x32x32xbf16>
    %446 = vector.shape_cast %445 : vector<1x32x32xbf16> to vector<32x32xbf16>
    %447 = arith.truncf %400 : vector<32x32xf32> to vector<32x32xbf16>
    %cst_121 = arith.constant dense<0.000000e+00> : vector<32x32xf32>
    %448 = tpu.matmul %447, %446, %cst_121 {dimension_numbers = #tpu.dot_dimension_numbers<[1], [0], [0], [1], [0, 0, 1, 1], [], []>} : vector<32x32xbf16>, vector<32x32xbf16>, vector<32x32xf32> -> vector<32x32xf32>
    %449 = vector.extract_strided_slice %6 {offsets = [2, 0, 0], sizes = [1, 1, 32], strides = [1, 1, 1]} : vector<3x1x32xf32> to vector<1x1x32xf32>
    %450 = vector.shape_cast %449 : vector<1x1x32xf32> to vector<1x32xf32>
    %451 = vector.broadcast %450 : vector<1x32xf32> to vector<32x32xf32>
    %452 = arith.addf %448, %451 : vector<32x32xf32>
    %453 = vector.extract_strided_slice %5 {offsets = [2, 0, 0], sizes = [1, 32, 32], strides = [1, 1, 1]} : vector<3x32x32xbf16> to vector<1x32x32xbf16>
    %454 = vector.shape_cast %453 : vector<1x32x32xbf16> to vector<32x32xbf16>
    %455 = arith.truncf %394 : vector<32x32xf32> to vector<32x32xbf16>
    %cst_122 = arith.constant dense<0.000000e+00> : vector<32x32xf32>
    %456 = tpu.matmul %455, %454, %cst_122 {dimension_numbers = #tpu.dot_dimension_numbers<[1], [0], [0], [1], [0, 0, 1, 1], [], []>} : vector<32x32xbf16>, vector<32x32xbf16>, vector<32x32xf32> -> vector<32x32xf32>
    %457 = vector.extract_strided_slice %7 {offsets = [2, 0, 0], sizes = [1, 1, 32], strides = [1, 1, 1]} : vector<3x1x32xf32> to vector<1x1x32xf32>
    %458 = vector.shape_cast %457 : vector<1x1x32xf32> to vector<1x32xf32>
    %459 = vector.broadcast %458 : vector<1x32xf32> to vector<32x32xf32>
    %460 = arith.addf %456, %459 : vector<32x32xf32>
    %461 = arith.mulf %422, %460 : vector<32x32xf32>
    %462 = arith.addf %452, %461 : vector<32x32xf32>
    %463 = math.tanh %462 : vector<32x32xf32>
    %cst_123 = arith.constant 1.000000e+00 : f32
    %464 = vector.broadcast %cst_123 : f32 to vector<32x32xf32>
    %465 = arith.subf %464, %444 : vector<32x32xf32>
    %466 = arith.mulf %465, %463 : vector<32x32xf32>
    %467 = arith.mulf %444, %394 : vector<32x32xf32>
    %468 = arith.addf %466, %467 : vector<32x32xf32>
    %469 = vector.extract_strided_slice %3 {offsets = [6, 0, 0], sizes = [1, 32, 32], strides = [1, 1, 1]} : vector<8x32x32xbf16> to vector<1x32x32xbf16>
    %470 = vector.shape_cast %469 : vector<1x32x32xbf16> to vector<32x32xbf16>
    %471 = arith.truncf %468 : vector<32x32xf32> to vector<32x32xbf16>
    %cst_124 = arith.constant dense<0.000000e+00> : vector<32x32xf32>
    %472 = tpu.matmul %471, %470, %cst_124 {dimension_numbers = #tpu.dot_dimension_numbers<[1], [0], [0], [1], [0, 0, 1, 1], [], []>} : vector<32x32xbf16>, vector<32x32xbf16>, vector<32x32xf32> -> vector<32x32xf32>
    %473 = arith.truncf %472 : vector<32x32xf32> to vector<32x32xbf16>
    %cst_125 = arith.constant dense<0.000000e+00> : vector<32x32xf32>
    %474 = tpu.matmul %0, %473, %cst_125 {dimension_numbers = #tpu.dot_dimension_numbers<[1], [0], [0], [1], [0, 0, 1, 1], [], []>} : vector<32x32xbf16>, vector<32x32xbf16>, vector<32x32xf32> -> vector<32x32xf32>
    %475 = vector.extract_strided_slice %4 {offsets = [0, 0, 0], sizes = [1, 32, 32], strides = [1, 1, 1]} : vector<3x32x32xbf16> to vector<1x32x32xbf16>
    %476 = vector.shape_cast %475 : vector<1x32x32xbf16> to vector<32x32xbf16>
    %477 = arith.truncf %474 : vector<32x32xf32> to vector<32x32xbf16>
    %cst_126 = arith.constant dense<0.000000e+00> : vector<32x32xf32>
    %478 = tpu.matmul %477, %476, %cst_126 {dimension_numbers = #tpu.dot_dimension_numbers<[1], [0], [0], [1], [0, 0, 1, 1], [], []>} : vector<32x32xbf16>, vector<32x32xbf16>, vector<32x32xf32> -> vector<32x32xf32>
    %479 = vector.extract_strided_slice %6 {offsets = [0, 0, 0], sizes = [1, 1, 32], strides = [1, 1, 1]} : vector<3x1x32xf32> to vector<1x1x32xf32>
    %480 = vector.shape_cast %479 : vector<1x1x32xf32> to vector<1x32xf32>
    %481 = vector.broadcast %480 : vector<1x32xf32> to vector<32x32xf32>
    %482 = arith.addf %478, %481 : vector<32x32xf32>
    %483 = vector.extract_strided_slice %5 {offsets = [0, 0, 0], sizes = [1, 32, 32], strides = [1, 1, 1]} : vector<3x32x32xbf16> to vector<1x32x32xbf16>
    %484 = vector.shape_cast %483 : vector<1x32x32xbf16> to vector<32x32xbf16>
    %485 = arith.truncf %468 : vector<32x32xf32> to vector<32x32xbf16>
    %cst_127 = arith.constant dense<0.000000e+00> : vector<32x32xf32>
    %486 = tpu.matmul %485, %484, %cst_127 {dimension_numbers = #tpu.dot_dimension_numbers<[1], [0], [0], [1], [0, 0, 1, 1], [], []>} : vector<32x32xbf16>, vector<32x32xbf16>, vector<32x32xf32> -> vector<32x32xf32>
    %487 = arith.addf %482, %486 : vector<32x32xf32>
    %488 = vector.extract_strided_slice %7 {offsets = [0, 0, 0], sizes = [1, 1, 32], strides = [1, 1, 1]} : vector<3x1x32xf32> to vector<1x1x32xf32>
    %489 = vector.shape_cast %488 : vector<1x1x32xf32> to vector<1x32xf32>
    %490 = vector.broadcast %489 : vector<1x32xf32> to vector<32x32xf32>
    %491 = arith.addf %487, %490 : vector<32x32xf32>
    %492 = arith.negf %491 : vector<32x32xf32>
    %493 = math.exp %492 : vector<32x32xf32>
    %cst_128 = arith.constant 1.000000e+00 : f32
    %494 = vector.broadcast %cst_128 : f32 to vector<32x32xf32>
    %495 = arith.addf %494, %493 : vector<32x32xf32>
    %496 = arith.divf %494, %495 : vector<32x32xf32>
    %497 = vector.extract_strided_slice %4 {offsets = [1, 0, 0], sizes = [1, 32, 32], strides = [1, 1, 1]} : vector<3x32x32xbf16> to vector<1x32x32xbf16>
    %498 = vector.shape_cast %497 : vector<1x32x32xbf16> to vector<32x32xbf16>
    %499 = arith.truncf %474 : vector<32x32xf32> to vector<32x32xbf16>
    %cst_129 = arith.constant dense<0.000000e+00> : vector<32x32xf32>
    %500 = tpu.matmul %499, %498, %cst_129 {dimension_numbers = #tpu.dot_dimension_numbers<[1], [0], [0], [1], [0, 0, 1, 1], [], []>} : vector<32x32xbf16>, vector<32x32xbf16>, vector<32x32xf32> -> vector<32x32xf32>
    %501 = vector.extract_strided_slice %6 {offsets = [1, 0, 0], sizes = [1, 1, 32], strides = [1, 1, 1]} : vector<3x1x32xf32> to vector<1x1x32xf32>
    %502 = vector.shape_cast %501 : vector<1x1x32xf32> to vector<1x32xf32>
    %503 = vector.broadcast %502 : vector<1x32xf32> to vector<32x32xf32>
    %504 = arith.addf %500, %503 : vector<32x32xf32>
    %505 = vector.extract_strided_slice %5 {offsets = [1, 0, 0], sizes = [1, 32, 32], strides = [1, 1, 1]} : vector<3x32x32xbf16> to vector<1x32x32xbf16>
    %506 = vector.shape_cast %505 : vector<1x32x32xbf16> to vector<32x32xbf16>
    %507 = arith.truncf %468 : vector<32x32xf32> to vector<32x32xbf16>
    %cst_130 = arith.constant dense<0.000000e+00> : vector<32x32xf32>
    %508 = tpu.matmul %507, %506, %cst_130 {dimension_numbers = #tpu.dot_dimension_numbers<[1], [0], [0], [1], [0, 0, 1, 1], [], []>} : vector<32x32xbf16>, vector<32x32xbf16>, vector<32x32xf32> -> vector<32x32xf32>
    %509 = arith.addf %504, %508 : vector<32x32xf32>
    %510 = vector.extract_strided_slice %7 {offsets = [1, 0, 0], sizes = [1, 1, 32], strides = [1, 1, 1]} : vector<3x1x32xf32> to vector<1x1x32xf32>
    %511 = vector.shape_cast %510 : vector<1x1x32xf32> to vector<1x32xf32>
    %512 = vector.broadcast %511 : vector<1x32xf32> to vector<32x32xf32>
    %513 = arith.addf %509, %512 : vector<32x32xf32>
    %514 = arith.negf %513 : vector<32x32xf32>
    %515 = math.exp %514 : vector<32x32xf32>
    %cst_131 = arith.constant 1.000000e+00 : f32
    %516 = vector.broadcast %cst_131 : f32 to vector<32x32xf32>
    %517 = arith.addf %516, %515 : vector<32x32xf32>
    %518 = arith.divf %516, %517 : vector<32x32xf32>
    %519 = vector.extract_strided_slice %4 {offsets = [2, 0, 0], sizes = [1, 32, 32], strides = [1, 1, 1]} : vector<3x32x32xbf16> to vector<1x32x32xbf16>
    %520 = vector.shape_cast %519 : vector<1x32x32xbf16> to vector<32x32xbf16>
    %521 = arith.truncf %474 : vector<32x32xf32> to vector<32x32xbf16>
    %cst_132 = arith.constant dense<0.000000e+00> : vector<32x32xf32>
    %522 = tpu.matmul %521, %520, %cst_132 {dimension_numbers = #tpu.dot_dimension_numbers<[1], [0], [0], [1], [0, 0, 1, 1], [], []>} : vector<32x32xbf16>, vector<32x32xbf16>, vector<32x32xf32> -> vector<32x32xf32>
    %523 = vector.extract_strided_slice %6 {offsets = [2, 0, 0], sizes = [1, 1, 32], strides = [1, 1, 1]} : vector<3x1x32xf32> to vector<1x1x32xf32>
    %524 = vector.shape_cast %523 : vector<1x1x32xf32> to vector<1x32xf32>
    %525 = vector.broadcast %524 : vector<1x32xf32> to vector<32x32xf32>
    %526 = arith.addf %522, %525 : vector<32x32xf32>
    %527 = vector.extract_strided_slice %5 {offsets = [2, 0, 0], sizes = [1, 32, 32], strides = [1, 1, 1]} : vector<3x32x32xbf16> to vector<1x32x32xbf16>
    %528 = vector.shape_cast %527 : vector<1x32x32xbf16> to vector<32x32xbf16>
    %529 = arith.truncf %468 : vector<32x32xf32> to vector<32x32xbf16>
    %cst_133 = arith.constant dense<0.000000e+00> : vector<32x32xf32>
    %530 = tpu.matmul %529, %528, %cst_133 {dimension_numbers = #tpu.dot_dimension_numbers<[1], [0], [0], [1], [0, 0, 1, 1], [], []>} : vector<32x32xbf16>, vector<32x32xbf16>, vector<32x32xf32> -> vector<32x32xf32>
    %531 = vector.extract_strided_slice %7 {offsets = [2, 0, 0], sizes = [1, 1, 32], strides = [1, 1, 1]} : vector<3x1x32xf32> to vector<1x1x32xf32>
    %532 = vector.shape_cast %531 : vector<1x1x32xf32> to vector<1x32xf32>
    %533 = vector.broadcast %532 : vector<1x32xf32> to vector<32x32xf32>
    %534 = arith.addf %530, %533 : vector<32x32xf32>
    %535 = arith.mulf %496, %534 : vector<32x32xf32>
    %536 = arith.addf %526, %535 : vector<32x32xf32>
    %537 = math.tanh %536 : vector<32x32xf32>
    %cst_134 = arith.constant 1.000000e+00 : f32
    %538 = vector.broadcast %cst_134 : f32 to vector<32x32xf32>
    %539 = arith.subf %538, %518 : vector<32x32xf32>
    %540 = arith.mulf %539, %537 : vector<32x32xf32>
    %541 = arith.mulf %518, %468 : vector<32x32xf32>
    %542 = arith.addf %540, %541 : vector<32x32xf32>
    %543 = vector.extract_strided_slice %3 {offsets = [7, 0, 0], sizes = [1, 32, 32], strides = [1, 1, 1]} : vector<8x32x32xbf16> to vector<1x32x32xbf16>
    %544 = vector.shape_cast %543 : vector<1x32x32xbf16> to vector<32x32xbf16>
    %545 = arith.truncf %542 : vector<32x32xf32> to vector<32x32xbf16>
    %cst_135 = arith.constant dense<0.000000e+00> : vector<32x32xf32>
    %546 = tpu.matmul %545, %544, %cst_135 {dimension_numbers = #tpu.dot_dimension_numbers<[1], [0], [0], [1], [0, 0, 1, 1], [], []>} : vector<32x32xbf16>, vector<32x32xbf16>, vector<32x32xf32> -> vector<32x32xf32>
    %547 = arith.truncf %546 : vector<32x32xf32> to vector<32x32xbf16>
    %cst_136 = arith.constant dense<0.000000e+00> : vector<32x32xf32>
    %548 = tpu.matmul %0, %547, %cst_136 {dimension_numbers = #tpu.dot_dimension_numbers<[1], [0], [0], [1], [0, 0, 1, 1], [], []>} : vector<32x32xbf16>, vector<32x32xbf16>, vector<32x32xf32> -> vector<32x32xf32>
    %549 = vector.extract_strided_slice %4 {offsets = [0, 0, 0], sizes = [1, 32, 32], strides = [1, 1, 1]} : vector<3x32x32xbf16> to vector<1x32x32xbf16>
    %550 = vector.shape_cast %549 : vector<1x32x32xbf16> to vector<32x32xbf16>
    %551 = arith.truncf %548 : vector<32x32xf32> to vector<32x32xbf16>
    %cst_137 = arith.constant dense<0.000000e+00> : vector<32x32xf32>
    %552 = tpu.matmul %551, %550, %cst_137 {dimension_numbers = #tpu.dot_dimension_numbers<[1], [0], [0], [1], [0, 0, 1, 1], [], []>} : vector<32x32xbf16>, vector<32x32xbf16>, vector<32x32xf32> -> vector<32x32xf32>
    %553 = vector.extract_strided_slice %6 {offsets = [0, 0, 0], sizes = [1, 1, 32], strides = [1, 1, 1]} : vector<3x1x32xf32> to vector<1x1x32xf32>
    %554 = vector.shape_cast %553 : vector<1x1x32xf32> to vector<1x32xf32>
    %555 = vector.broadcast %554 : vector<1x32xf32> to vector<32x32xf32>
    %556 = arith.addf %552, %555 : vector<32x32xf32>
    %557 = vector.extract_strided_slice %5 {offsets = [0, 0, 0], sizes = [1, 32, 32], strides = [1, 1, 1]} : vector<3x32x32xbf16> to vector<1x32x32xbf16>
    %558 = vector.shape_cast %557 : vector<1x32x32xbf16> to vector<32x32xbf16>
    %559 = arith.truncf %542 : vector<32x32xf32> to vector<32x32xbf16>
    %cst_138 = arith.constant dense<0.000000e+00> : vector<32x32xf32>
    %560 = tpu.matmul %559, %558, %cst_138 {dimension_numbers = #tpu.dot_dimension_numbers<[1], [0], [0], [1], [0, 0, 1, 1], [], []>} : vector<32x32xbf16>, vector<32x32xbf16>, vector<32x32xf32> -> vector<32x32xf32>
    %561 = arith.addf %556, %560 : vector<32x32xf32>
    %562 = vector.extract_strided_slice %7 {offsets = [0, 0, 0], sizes = [1, 1, 32], strides = [1, 1, 1]} : vector<3x1x32xf32> to vector<1x1x32xf32>
    %563 = vector.shape_cast %562 : vector<1x1x32xf32> to vector<1x32xf32>
    %564 = vector.broadcast %563 : vector<1x32xf32> to vector<32x32xf32>
    %565 = arith.addf %561, %564 : vector<32x32xf32>
    %566 = arith.negf %565 : vector<32x32xf32>
    %567 = math.exp %566 : vector<32x32xf32>
    %cst_139 = arith.constant 1.000000e+00 : f32
    %568 = vector.broadcast %cst_139 : f32 to vector<32x32xf32>
    %569 = arith.addf %568, %567 : vector<32x32xf32>
    %570 = arith.divf %568, %569 : vector<32x32xf32>
    %571 = vector.extract_strided_slice %4 {offsets = [1, 0, 0], sizes = [1, 32, 32], strides = [1, 1, 1]} : vector<3x32x32xbf16> to vector<1x32x32xbf16>
    %572 = vector.shape_cast %571 : vector<1x32x32xbf16> to vector<32x32xbf16>
    %573 = arith.truncf %548 : vector<32x32xf32> to vector<32x32xbf16>
    %cst_140 = arith.constant dense<0.000000e+00> : vector<32x32xf32>
    %574 = tpu.matmul %573, %572, %cst_140 {dimension_numbers = #tpu.dot_dimension_numbers<[1], [0], [0], [1], [0, 0, 1, 1], [], []>} : vector<32x32xbf16>, vector<32x32xbf16>, vector<32x32xf32> -> vector<32x32xf32>
    %575 = vector.extract_strided_slice %6 {offsets = [1, 0, 0], sizes = [1, 1, 32], strides = [1, 1, 1]} : vector<3x1x32xf32> to vector<1x1x32xf32>
    %576 = vector.shape_cast %575 : vector<1x1x32xf32> to vector<1x32xf32>
    %577 = vector.broadcast %576 : vector<1x32xf32> to vector<32x32xf32>
    %578 = arith.addf %574, %577 : vector<32x32xf32>
    %579 = vector.extract_strided_slice %5 {offsets = [1, 0, 0], sizes = [1, 32, 32], strides = [1, 1, 1]} : vector<3x32x32xbf16> to vector<1x32x32xbf16>
    %580 = vector.shape_cast %579 : vector<1x32x32xbf16> to vector<32x32xbf16>
    %581 = arith.truncf %542 : vector<32x32xf32> to vector<32x32xbf16>
    %cst_141 = arith.constant dense<0.000000e+00> : vector<32x32xf32>
    %582 = tpu.matmul %581, %580, %cst_141 {dimension_numbers = #tpu.dot_dimension_numbers<[1], [0], [0], [1], [0, 0, 1, 1], [], []>} : vector<32x32xbf16>, vector<32x32xbf16>, vector<32x32xf32> -> vector<32x32xf32>
    %583 = arith.addf %578, %582 : vector<32x32xf32>
    %584 = vector.extract_strided_slice %7 {offsets = [1, 0, 0], sizes = [1, 1, 32], strides = [1, 1, 1]} : vector<3x1x32xf32> to vector<1x1x32xf32>
    %585 = vector.shape_cast %584 : vector<1x1x32xf32> to vector<1x32xf32>
    %586 = vector.broadcast %585 : vector<1x32xf32> to vector<32x32xf32>
    %587 = arith.addf %583, %586 : vector<32x32xf32>
    %588 = arith.negf %587 : vector<32x32xf32>
    %589 = math.exp %588 : vector<32x32xf32>
    %cst_142 = arith.constant 1.000000e+00 : f32
    %590 = vector.broadcast %cst_142 : f32 to vector<32x32xf32>
    %591 = arith.addf %590, %589 : vector<32x32xf32>
    %592 = arith.divf %590, %591 : vector<32x32xf32>
    %593 = vector.extract_strided_slice %4 {offsets = [2, 0, 0], sizes = [1, 32, 32], strides = [1, 1, 1]} : vector<3x32x32xbf16> to vector<1x32x32xbf16>
    %594 = vector.shape_cast %593 : vector<1x32x32xbf16> to vector<32x32xbf16>
    %595 = arith.truncf %548 : vector<32x32xf32> to vector<32x32xbf16>
    %cst_143 = arith.constant dense<0.000000e+00> : vector<32x32xf32>
    %596 = tpu.matmul %595, %594, %cst_143 {dimension_numbers = #tpu.dot_dimension_numbers<[1], [0], [0], [1], [0, 0, 1, 1], [], []>} : vector<32x32xbf16>, vector<32x32xbf16>, vector<32x32xf32> -> vector<32x32xf32>
    %597 = vector.extract_strided_slice %6 {offsets = [2, 0, 0], sizes = [1, 1, 32], strides = [1, 1, 1]} : vector<3x1x32xf32> to vector<1x1x32xf32>
    %598 = vector.shape_cast %597 : vector<1x1x32xf32> to vector<1x32xf32>
    %599 = vector.broadcast %598 : vector<1x32xf32> to vector<32x32xf32>
    %600 = arith.addf %596, %599 : vector<32x32xf32>
    %601 = vector.extract_strided_slice %5 {offsets = [2, 0, 0], sizes = [1, 32, 32], strides = [1, 1, 1]} : vector<3x32x32xbf16> to vector<1x32x32xbf16>
    %602 = vector.shape_cast %601 : vector<1x32x32xbf16> to vector<32x32xbf16>
    %603 = arith.truncf %542 : vector<32x32xf32> to vector<32x32xbf16>
    %cst_144 = arith.constant dense<0.000000e+00> : vector<32x32xf32>
    %604 = tpu.matmul %603, %602, %cst_144 {dimension_numbers = #tpu.dot_dimension_numbers<[1], [0], [0], [1], [0, 0, 1, 1], [], []>} : vector<32x32xbf16>, vector<32x32xbf16>, vector<32x32xf32> -> vector<32x32xf32>
    %605 = vector.extract_strided_slice %7 {offsets = [2, 0, 0], sizes = [1, 1, 32], strides = [1, 1, 1]} : vector<3x1x32xf32> to vector<1x1x32xf32>
    %606 = vector.shape_cast %605 : vector<1x1x32xf32> to vector<1x32xf32>
    %607 = vector.broadcast %606 : vector<1x32xf32> to vector<32x32xf32>
    %608 = arith.addf %604, %607 : vector<32x32xf32>
    %609 = arith.mulf %570, %608 : vector<32x32xf32>
    %610 = arith.addf %600, %609 : vector<32x32xf32>
    %611 = math.tanh %610 : vector<32x32xf32>
    %cst_145 = arith.constant 1.000000e+00 : f32
    %612 = vector.broadcast %cst_145 : f32 to vector<32x32xf32>
    %613 = arith.subf %612, %592 : vector<32x32xf32>
    %614 = arith.mulf %613, %611 : vector<32x32xf32>
    %615 = arith.mulf %592, %542 : vector<32x32xf32>
    %616 = arith.addf %614, %615 : vector<32x32xf32>
    %617 = vector.extract_strided_slice %616 {offsets = [0, 0], sizes = [29, 32], strides = [1, 1]} : vector<32x32xf32> to vector<29x32xf32>
    %618 = vector.extract_strided_slice %8 {offsets = [0, 0, 0], sizes = [1, 32, 32], strides = [1, 1, 1]} : vector<4x32x32xbf16> to vector<1x32x32xbf16>
    %619 = vector.shape_cast %618 : vector<1x32x32xbf16> to vector<32x32xbf16>
    %620 = arith.truncf %617 : vector<29x32xf32> to vector<29x32xbf16>
    %cst_146 = arith.constant dense<0.000000e+00> : vector<29x32xf32>
    %621 = tpu.matmul %620, %619, %cst_146 {dimension_numbers = #tpu.dot_dimension_numbers<[1], [0], [0], [1], [0, 0, 1, 1], [], []>} : vector<29x32xbf16>, vector<32x32xbf16>, vector<29x32xf32> -> vector<29x32xf32>
    %622 = vector.extract_strided_slice %616 {offsets = [1, 0], sizes = [29, 32], strides = [1, 1]} : vector<32x32xf32> to vector<29x32xf32>
    %623 = vector.extract_strided_slice %8 {offsets = [1, 0, 0], sizes = [1, 32, 32], strides = [1, 1, 1]} : vector<4x32x32xbf16> to vector<1x32x32xbf16>
    %624 = vector.shape_cast %623 : vector<1x32x32xbf16> to vector<32x32xbf16>
    %625 = arith.truncf %622 : vector<29x32xf32> to vector<29x32xbf16>
    %cst_147 = arith.constant dense<0.000000e+00> : vector<29x32xf32>
    %626 = tpu.matmul %625, %624, %cst_147 {dimension_numbers = #tpu.dot_dimension_numbers<[1], [0], [0], [1], [0, 0, 1, 1], [], []>} : vector<29x32xbf16>, vector<32x32xbf16>, vector<29x32xf32> -> vector<29x32xf32>
    %627 = arith.addf %621, %626 : vector<29x32xf32>
    %628 = vector.extract_strided_slice %616 {offsets = [2, 0], sizes = [29, 32], strides = [1, 1]} : vector<32x32xf32> to vector<29x32xf32>
    %629 = vector.extract_strided_slice %8 {offsets = [2, 0, 0], sizes = [1, 32, 32], strides = [1, 1, 1]} : vector<4x32x32xbf16> to vector<1x32x32xbf16>
    %630 = vector.shape_cast %629 : vector<1x32x32xbf16> to vector<32x32xbf16>
    %631 = arith.truncf %628 : vector<29x32xf32> to vector<29x32xbf16>
    %cst_148 = arith.constant dense<0.000000e+00> : vector<29x32xf32>
    %632 = tpu.matmul %631, %630, %cst_148 {dimension_numbers = #tpu.dot_dimension_numbers<[1], [0], [0], [1], [0, 0, 1, 1], [], []>} : vector<29x32xbf16>, vector<32x32xbf16>, vector<29x32xf32> -> vector<29x32xf32>
    %633 = arith.addf %627, %632 : vector<29x32xf32>
    %634 = vector.extract_strided_slice %616 {offsets = [3, 0], sizes = [29, 32], strides = [1, 1]} : vector<32x32xf32> to vector<29x32xf32>
    %635 = vector.extract_strided_slice %8 {offsets = [3, 0, 0], sizes = [1, 32, 32], strides = [1, 1, 1]} : vector<4x32x32xbf16> to vector<1x32x32xbf16>
    %636 = vector.shape_cast %635 : vector<1x32x32xbf16> to vector<32x32xbf16>
    %637 = arith.truncf %634 : vector<29x32xf32> to vector<29x32xbf16>
    %cst_149 = arith.constant dense<0.000000e+00> : vector<29x32xf32>
    %638 = tpu.matmul %637, %636, %cst_149 {dimension_numbers = #tpu.dot_dimension_numbers<[1], [0], [0], [1], [0, 0, 1, 1], [], []>} : vector<29x32xbf16>, vector<32x32xbf16>, vector<29x32xf32> -> vector<29x32xf32>
    %639 = arith.addf %633, %638 : vector<29x32xf32>
    %640 = vector.broadcast %9 : vector<1x32xf32> to vector<29x32xf32>
    %641 = arith.addf %639, %640 : vector<29x32xf32>
    %642 = vector.broadcast %12 : vector<1x32xf32> to vector<29x32xf32>
    %643 = arith.mulf %641, %642 : vector<29x32xf32>
    %644 = vector.broadcast %13 : vector<1x32xf32> to vector<29x32xf32>
    %645 = arith.addf %643, %644 : vector<29x32xf32>
    %cst_150 = arith.constant 0.000000e+00 : f32
    %646 = vector.broadcast %cst_150 : f32 to vector<29x32xf32>
    %647 = arith.maximumf %645, %646 : vector<29x32xf32>
    %648 = vector.extract_strided_slice %647 {offsets = [0, 0], sizes = [26, 32], strides = [1, 1]} : vector<29x32xf32> to vector<26x32xf32>
    %649 = vector.extract_strided_slice %647 {offsets = [1, 0], sizes = [26, 32], strides = [1, 1]} : vector<29x32xf32> to vector<26x32xf32>
    %650 = arith.maximumf %648, %649 : vector<26x32xf32>
    %651 = vector.extract_strided_slice %647 {offsets = [2, 0], sizes = [26, 32], strides = [1, 1]} : vector<29x32xf32> to vector<26x32xf32>
    %652 = arith.maximumf %650, %651 : vector<26x32xf32>
    %653 = vector.extract_strided_slice %647 {offsets = [3, 0], sizes = [26, 32], strides = [1, 1]} : vector<29x32xf32> to vector<26x32xf32>
    %654 = arith.maximumf %652, %653 : vector<26x32xf32>
    %655 = tpu.iota {dimensions = array<i32: 0>} : vector<13x26xi32>
    %656 = tpu.iota {dimensions = array<i32: 1>} : vector<13x26xi32>
    %c2_i32 = arith.constant 2 : i32
    %657 = vector.broadcast %c2_i32 : i32 to vector<13x26xi32>
    %658 = arith.muli %657, %655 : vector<13x26xi32>
    %659 = arith.cmpi eq, %656, %658 : vector<13x26xi32>
    %660 = arith.extui %659 : vector<13x26xi1> to vector<13x26xi32>
    %661 = arith.sitofp %660 : vector<13x26xi32> to vector<13x26xf32>
    %cst_151 = arith.constant dense<0.000000e+00> : vector<13x32xf32>
    %662 = tpu.matmul %661, %654, %cst_151 {dimension_numbers = #tpu.dot_dimension_numbers<[1], [0], [0], [1], [0, 0, 1, 1], [], []>} : vector<13x26xf32>, vector<26x32xf32>, vector<13x32xf32> -> vector<13x32xf32>
    %663 = vector.extract_strided_slice %662 {offsets = [0, 0], sizes = [12, 32], strides = [1, 1]} : vector<13x32xf32> to vector<12x32xf32>
    %664 = vector.extract_strided_slice %10 {offsets = [0, 0, 0], sizes = [1, 32, 32], strides = [1, 1, 1]} : vector<2x32x32xbf16> to vector<1x32x32xbf16>
    %665 = vector.shape_cast %664 : vector<1x32x32xbf16> to vector<32x32xbf16>
    %666 = arith.truncf %663 : vector<12x32xf32> to vector<12x32xbf16>
    %cst_152 = arith.constant dense<0.000000e+00> : vector<12x32xf32>
    %667 = tpu.matmul %666, %665, %cst_152 {dimension_numbers = #tpu.dot_dimension_numbers<[1], [0], [0], [1], [0, 0, 1, 1], [], []>} : vector<12x32xbf16>, vector<32x32xbf16>, vector<12x32xf32> -> vector<12x32xf32>
    %668 = vector.extract_strided_slice %662 {offsets = [1, 0], sizes = [12, 32], strides = [1, 1]} : vector<13x32xf32> to vector<12x32xf32>
    %669 = vector.extract_strided_slice %10 {offsets = [1, 0, 0], sizes = [1, 32, 32], strides = [1, 1, 1]} : vector<2x32x32xbf16> to vector<1x32x32xbf16>
    %670 = vector.shape_cast %669 : vector<1x32x32xbf16> to vector<32x32xbf16>
    %671 = arith.truncf %668 : vector<12x32xf32> to vector<12x32xbf16>
    %cst_153 = arith.constant dense<0.000000e+00> : vector<12x32xf32>
    %672 = tpu.matmul %671, %670, %cst_153 {dimension_numbers = #tpu.dot_dimension_numbers<[1], [0], [0], [1], [0, 0, 1, 1], [], []>} : vector<12x32xbf16>, vector<32x32xbf16>, vector<12x32xf32> -> vector<12x32xf32>
    %673 = arith.addf %667, %672 : vector<12x32xf32>
    %674 = vector.broadcast %11 : vector<1x32xf32> to vector<12x32xf32>
    %675 = arith.addf %673, %674 : vector<12x32xf32>
    %676 = vector.broadcast %12 : vector<1x32xf32> to vector<12x32xf32>
    %677 = arith.mulf %675, %676 : vector<12x32xf32>
    %678 = vector.broadcast %13 : vector<1x32xf32> to vector<12x32xf32>
    %679 = arith.addf %677, %678 : vector<12x32xf32>
    %cst_154 = arith.constant 0.000000e+00 : f32
    %680 = vector.broadcast %cst_154 : f32 to vector<12x32xf32>
    %681 = arith.maximumf %679, %680 : vector<12x32xf32>
    %682 = vector.extract_strided_slice %681 {offsets = [0, 0], sizes = [10, 32], strides = [1, 1]} : vector<12x32xf32> to vector<10x32xf32>
    %683 = vector.extract_strided_slice %681 {offsets = [1, 0], sizes = [10, 32], strides = [1, 1]} : vector<12x32xf32> to vector<10x32xf32>
    %684 = arith.maximumf %682, %683 : vector<10x32xf32>
    %685 = vector.extract_strided_slice %681 {offsets = [2, 0], sizes = [10, 32], strides = [1, 1]} : vector<12x32xf32> to vector<10x32xf32>
    %686 = arith.maximumf %684, %685 : vector<10x32xf32>
    %687 = tpu.iota {dimensions = array<i32: 0>} : vector<5x10xi32>
    %688 = tpu.iota {dimensions = array<i32: 1>} : vector<5x10xi32>
    %c2_i32_155 = arith.constant 2 : i32
    %689 = vector.broadcast %c2_i32_155 : i32 to vector<5x10xi32>
    %690 = arith.muli %689, %687 : vector<5x10xi32>
    %691 = arith.cmpi eq, %688, %690 : vector<5x10xi32>
    %692 = arith.extui %691 : vector<5x10xi1> to vector<5x10xi32>
    %693 = arith.sitofp %692 : vector<5x10xi32> to vector<5x10xf32>
    %cst_156 = arith.constant dense<0.000000e+00> : vector<5x32xf32>
    %694 = tpu.matmul %693, %686, %cst_156 {dimension_numbers = #tpu.dot_dimension_numbers<[1], [0], [0], [1], [0, 0, 1, 1], [], []>} : vector<5x10xf32>, vector<10x32xf32>, vector<5x32xf32> -> vector<5x32xf32>
    %695 = vector.extract_strided_slice %616 {offsets = [0, 0], sizes = [29, 32], strides = [1, 1]} : vector<32x32xf32> to vector<29x32xf32>
    %696 = vector.extract_strided_slice %14 {offsets = [0, 0, 0], sizes = [1, 32, 48], strides = [1, 1, 1]} : vector<4x32x48xbf16> to vector<1x32x48xbf16>
    %697 = vector.shape_cast %696 : vector<1x32x48xbf16> to vector<32x48xbf16>
    %698 = arith.truncf %695 : vector<29x32xf32> to vector<29x32xbf16>
    %cst_157 = arith.constant dense<0.000000e+00> : vector<29x48xf32>
    %699 = tpu.matmul %698, %697, %cst_157 {dimension_numbers = #tpu.dot_dimension_numbers<[1], [0], [0], [1], [0, 0, 1, 1], [], []>} : vector<29x32xbf16>, vector<32x48xbf16>, vector<29x48xf32> -> vector<29x48xf32>
    %700 = vector.extract_strided_slice %2 {offsets = [0, 0], sizes = [29, 16], strides = [1, 1]} : vector<32x16xf32> to vector<29x16xf32>
    %701 = vector.extract_strided_slice %15 {offsets = [0, 0, 0], sizes = [1, 16, 48], strides = [1, 1, 1]} : vector<4x16x48xbf16> to vector<1x16x48xbf16>
    %702 = vector.shape_cast %701 : vector<1x16x48xbf16> to vector<16x48xbf16>
    %703 = arith.truncf %700 : vector<29x16xf32> to vector<29x16xbf16>
    %cst_158 = arith.constant dense<0.000000e+00> : vector<29x48xf32>
    %704 = tpu.matmul %703, %702, %cst_158 {dimension_numbers = #tpu.dot_dimension_numbers<[1], [0], [0], [1], [0, 0, 1, 1], [], []>} : vector<29x16xbf16>, vector<16x48xbf16>, vector<29x48xf32> -> vector<29x48xf32>
    %705 = arith.addf %699, %704 : vector<29x48xf32>
    %706 = vector.extract_strided_slice %616 {offsets = [1, 0], sizes = [29, 32], strides = [1, 1]} : vector<32x32xf32> to vector<29x32xf32>
    %707 = vector.extract_strided_slice %14 {offsets = [1, 0, 0], sizes = [1, 32, 48], strides = [1, 1, 1]} : vector<4x32x48xbf16> to vector<1x32x48xbf16>
    %708 = vector.shape_cast %707 : vector<1x32x48xbf16> to vector<32x48xbf16>
    %709 = arith.truncf %706 : vector<29x32xf32> to vector<29x32xbf16>
    %cst_159 = arith.constant dense<0.000000e+00> : vector<29x48xf32>
    %710 = tpu.matmul %709, %708, %cst_159 {dimension_numbers = #tpu.dot_dimension_numbers<[1], [0], [0], [1], [0, 0, 1, 1], [], []>} : vector<29x32xbf16>, vector<32x48xbf16>, vector<29x48xf32> -> vector<29x48xf32>
    %711 = arith.addf %705, %710 : vector<29x48xf32>
    %712 = vector.extract_strided_slice %2 {offsets = [1, 0], sizes = [29, 16], strides = [1, 1]} : vector<32x16xf32> to vector<29x16xf32>
    %713 = vector.extract_strided_slice %15 {offsets = [1, 0, 0], sizes = [1, 16, 48], strides = [1, 1, 1]} : vector<4x16x48xbf16> to vector<1x16x48xbf16>
    %714 = vector.shape_cast %713 : vector<1x16x48xbf16> to vector<16x48xbf16>
    %715 = arith.truncf %712 : vector<29x16xf32> to vector<29x16xbf16>
    %cst_160 = arith.constant dense<0.000000e+00> : vector<29x48xf32>
    %716 = tpu.matmul %715, %714, %cst_160 {dimension_numbers = #tpu.dot_dimension_numbers<[1], [0], [0], [1], [0, 0, 1, 1], [], []>} : vector<29x16xbf16>, vector<16x48xbf16>, vector<29x48xf32> -> vector<29x48xf32>
    %717 = arith.addf %711, %716 : vector<29x48xf32>
    %718 = vector.extract_strided_slice %616 {offsets = [2, 0], sizes = [29, 32], strides = [1, 1]} : vector<32x32xf32> to vector<29x32xf32>
    %719 = vector.extract_strided_slice %14 {offsets = [2, 0, 0], sizes = [1, 32, 48], strides = [1, 1, 1]} : vector<4x32x48xbf16> to vector<1x32x48xbf16>
    %720 = vector.shape_cast %719 : vector<1x32x48xbf16> to vector<32x48xbf16>
    %721 = arith.truncf %718 : vector<29x32xf32> to vector<29x32xbf16>
    %cst_161 = arith.constant dense<0.000000e+00> : vector<29x48xf32>
    %722 = tpu.matmul %721, %720, %cst_161 {dimension_numbers = #tpu.dot_dimension_numbers<[1], [0], [0], [1], [0, 0, 1, 1], [], []>} : vector<29x32xbf16>, vector<32x48xbf16>, vector<29x48xf32> -> vector<29x48xf32>
    %723 = arith.addf %717, %722 : vector<29x48xf32>
    %724 = vector.extract_strided_slice %2 {offsets = [2, 0], sizes = [29, 16], strides = [1, 1]} : vector<32x16xf32> to vector<29x16xf32>
    %725 = vector.extract_strided_slice %15 {offsets = [2, 0, 0], sizes = [1, 16, 48], strides = [1, 1, 1]} : vector<4x16x48xbf16> to vector<1x16x48xbf16>
    %726 = vector.shape_cast %725 : vector<1x16x48xbf16> to vector<16x48xbf16>
    %727 = arith.truncf %724 : vector<29x16xf32> to vector<29x16xbf16>
    %cst_162 = arith.constant dense<0.000000e+00> : vector<29x48xf32>
    %728 = tpu.matmul %727, %726, %cst_162 {dimension_numbers = #tpu.dot_dimension_numbers<[1], [0], [0], [1], [0, 0, 1, 1], [], []>} : vector<29x16xbf16>, vector<16x48xbf16>, vector<29x48xf32> -> vector<29x48xf32>
    %729 = arith.addf %723, %728 : vector<29x48xf32>
    %730 = vector.extract_strided_slice %616 {offsets = [3, 0], sizes = [29, 32], strides = [1, 1]} : vector<32x32xf32> to vector<29x32xf32>
    %731 = vector.extract_strided_slice %14 {offsets = [3, 0, 0], sizes = [1, 32, 48], strides = [1, 1, 1]} : vector<4x32x48xbf16> to vector<1x32x48xbf16>
    %732 = vector.shape_cast %731 : vector<1x32x48xbf16> to vector<32x48xbf16>
    %733 = arith.truncf %730 : vector<29x32xf32> to vector<29x32xbf16>
    %cst_163 = arith.constant dense<0.000000e+00> : vector<29x48xf32>
    %734 = tpu.matmul %733, %732, %cst_163 {dimension_numbers = #tpu.dot_dimension_numbers<[1], [0], [0], [1], [0, 0, 1, 1], [], []>} : vector<29x32xbf16>, vector<32x48xbf16>, vector<29x48xf32> -> vector<29x48xf32>
    %735 = arith.addf %729, %734 : vector<29x48xf32>
    %736 = vector.extract_strided_slice %2 {offsets = [3, 0], sizes = [29, 16], strides = [1, 1]} : vector<32x16xf32> to vector<29x16xf32>
    %737 = vector.extract_strided_slice %15 {offsets = [3, 0, 0], sizes = [1, 16, 48], strides = [1, 1, 1]} : vector<4x16x48xbf16> to vector<1x16x48xbf16>
    %738 = vector.shape_cast %737 : vector<1x16x48xbf16> to vector<16x48xbf16>
    %739 = arith.truncf %736 : vector<29x16xf32> to vector<29x16xbf16>
    %cst_164 = arith.constant dense<0.000000e+00> : vector<29x48xf32>
    %740 = tpu.matmul %739, %738, %cst_164 {dimension_numbers = #tpu.dot_dimension_numbers<[1], [0], [0], [1], [0, 0, 1, 1], [], []>} : vector<29x16xbf16>, vector<16x48xbf16>, vector<29x48xf32> -> vector<29x48xf32>
    %741 = arith.addf %735, %740 : vector<29x48xf32>
    %742 = vector.broadcast %16 : vector<1x48xf32> to vector<29x48xf32>
    %743 = arith.addf %741, %742 : vector<29x48xf32>
    %744 = vector.broadcast %19 : vector<1x48xf32> to vector<29x48xf32>
    %745 = arith.mulf %743, %744 : vector<29x48xf32>
    %746 = vector.broadcast %20 : vector<1x48xf32> to vector<29x48xf32>
    %747 = arith.addf %745, %746 : vector<29x48xf32>
    %cst_165 = arith.constant 0.000000e+00 : f32
    %748 = vector.broadcast %cst_165 : f32 to vector<29x48xf32>
    %749 = arith.maximumf %747, %748 : vector<29x48xf32>
    %750 = vector.extract_strided_slice %749 {offsets = [0, 0], sizes = [26, 48], strides = [1, 1]} : vector<29x48xf32> to vector<26x48xf32>
    %751 = vector.extract_strided_slice %749 {offsets = [1, 0], sizes = [26, 48], strides = [1, 1]} : vector<29x48xf32> to vector<26x48xf32>
    %752 = arith.maximumf %750, %751 : vector<26x48xf32>
    %753 = vector.extract_strided_slice %749 {offsets = [2, 0], sizes = [26, 48], strides = [1, 1]} : vector<29x48xf32> to vector<26x48xf32>
    %754 = arith.maximumf %752, %753 : vector<26x48xf32>
    %755 = vector.extract_strided_slice %749 {offsets = [3, 0], sizes = [26, 48], strides = [1, 1]} : vector<29x48xf32> to vector<26x48xf32>
    %756 = arith.maximumf %754, %755 : vector<26x48xf32>
    %757 = tpu.iota {dimensions = array<i32: 0>} : vector<13x26xi32>
    %758 = tpu.iota {dimensions = array<i32: 1>} : vector<13x26xi32>
    %c2_i32_166 = arith.constant 2 : i32
    %759 = vector.broadcast %c2_i32_166 : i32 to vector<13x26xi32>
    %760 = arith.muli %759, %757 : vector<13x26xi32>
    %761 = arith.cmpi eq, %758, %760 : vector<13x26xi32>
    %762 = arith.extui %761 : vector<13x26xi1> to vector<13x26xi32>
    %763 = arith.sitofp %762 : vector<13x26xi32> to vector<13x26xf32>
    %cst_167 = arith.constant dense<0.000000e+00> : vector<13x48xf32>
    %764 = tpu.matmul %763, %756, %cst_167 {dimension_numbers = #tpu.dot_dimension_numbers<[1], [0], [0], [1], [0, 0, 1, 1], [], []>} : vector<13x26xf32>, vector<26x48xf32>, vector<13x48xf32> -> vector<13x48xf32>
    %765 = vector.extract_strided_slice %764 {offsets = [0, 0], sizes = [12, 48], strides = [1, 1]} : vector<13x48xf32> to vector<12x48xf32>
    %766 = vector.extract_strided_slice %17 {offsets = [0, 0, 0], sizes = [1, 48, 48], strides = [1, 1, 1]} : vector<2x48x48xbf16> to vector<1x48x48xbf16>
    %767 = vector.shape_cast %766 : vector<1x48x48xbf16> to vector<48x48xbf16>
    %768 = arith.truncf %765 : vector<12x48xf32> to vector<12x48xbf16>
    %cst_168 = arith.constant dense<0.000000e+00> : vector<12x48xf32>
    %769 = tpu.matmul %768, %767, %cst_168 {dimension_numbers = #tpu.dot_dimension_numbers<[1], [0], [0], [1], [0, 0, 1, 1], [], []>} : vector<12x48xbf16>, vector<48x48xbf16>, vector<12x48xf32> -> vector<12x48xf32>
    %770 = vector.extract_strided_slice %764 {offsets = [1, 0], sizes = [12, 48], strides = [1, 1]} : vector<13x48xf32> to vector<12x48xf32>
    %771 = vector.extract_strided_slice %17 {offsets = [1, 0, 0], sizes = [1, 48, 48], strides = [1, 1, 1]} : vector<2x48x48xbf16> to vector<1x48x48xbf16>
    %772 = vector.shape_cast %771 : vector<1x48x48xbf16> to vector<48x48xbf16>
    %773 = arith.truncf %770 : vector<12x48xf32> to vector<12x48xbf16>
    %cst_169 = arith.constant dense<0.000000e+00> : vector<12x48xf32>
    %774 = tpu.matmul %773, %772, %cst_169 {dimension_numbers = #tpu.dot_dimension_numbers<[1], [0], [0], [1], [0, 0, 1, 1], [], []>} : vector<12x48xbf16>, vector<48x48xbf16>, vector<12x48xf32> -> vector<12x48xf32>
    %775 = arith.addf %769, %774 : vector<12x48xf32>
    %776 = vector.broadcast %18 : vector<1x48xf32> to vector<12x48xf32>
    %777 = arith.addf %775, %776 : vector<12x48xf32>
    %778 = vector.broadcast %19 : vector<1x48xf32> to vector<12x48xf32>
    %779 = arith.mulf %777, %778 : vector<12x48xf32>
    %780 = vector.broadcast %20 : vector<1x48xf32> to vector<12x48xf32>
    %781 = arith.addf %779, %780 : vector<12x48xf32>
    %cst_170 = arith.constant 0.000000e+00 : f32
    %782 = vector.broadcast %cst_170 : f32 to vector<12x48xf32>
    %783 = arith.maximumf %781, %782 : vector<12x48xf32>
    %784 = vector.extract_strided_slice %783 {offsets = [0, 0], sizes = [10, 48], strides = [1, 1]} : vector<12x48xf32> to vector<10x48xf32>
    %785 = vector.extract_strided_slice %783 {offsets = [1, 0], sizes = [10, 48], strides = [1, 1]} : vector<12x48xf32> to vector<10x48xf32>
    %786 = arith.maximumf %784, %785 : vector<10x48xf32>
    %787 = vector.extract_strided_slice %783 {offsets = [2, 0], sizes = [10, 48], strides = [1, 1]} : vector<12x48xf32> to vector<10x48xf32>
    %788 = arith.maximumf %786, %787 : vector<10x48xf32>
    %789 = tpu.iota {dimensions = array<i32: 0>} : vector<5x10xi32>
    %790 = tpu.iota {dimensions = array<i32: 1>} : vector<5x10xi32>
    %c2_i32_171 = arith.constant 2 : i32
    %791 = vector.broadcast %c2_i32_171 : i32 to vector<5x10xi32>
    %792 = arith.muli %791, %789 : vector<5x10xi32>
    %793 = arith.cmpi eq, %790, %792 : vector<5x10xi32>
    %794 = arith.extui %793 : vector<5x10xi1> to vector<5x10xi32>
    %795 = arith.sitofp %794 : vector<5x10xi32> to vector<5x10xf32>
    %cst_172 = arith.constant dense<0.000000e+00> : vector<5x48xf32>
    %796 = tpu.matmul %795, %788, %cst_172 {dimension_numbers = #tpu.dot_dimension_numbers<[1], [0], [0], [1], [0, 0, 1, 1], [], []>} : vector<5x10xf32>, vector<10x48xf32>, vector<5x48xf32> -> vector<5x48xf32>
    %cst_173 = arith.constant dense<0.000000e+00> : vector<5x128xf32>
    %797 = tpu.matmul %694, %21, %cst_173 {dimension_numbers = #tpu.dot_dimension_numbers<[1], [0], [0], [1], [0, 0, 1, 1], [], []>} : vector<5x32xf32>, vector<32x128xf32>, vector<5x128xf32> -> vector<5x128xf32>
    %798 = vector.broadcast %22 : vector<1x128xf32> to vector<5x128xf32>
    %799 = arith.addf %797, %798 : vector<5x128xf32>
    %cst_174 = arith.constant dense<0.000000e+00> : vector<5x128xf32>
    %800 = tpu.matmul %796, %23, %cst_174 {dimension_numbers = #tpu.dot_dimension_numbers<[1], [0], [0], [1], [0, 0, 1, 1], [], []>} : vector<5x48xf32>, vector<48x128xf32>, vector<5x128xf32> -> vector<5x128xf32>
    %801 = vector.broadcast %24 : vector<1x128xf32> to vector<5x128xf32>
    %802 = arith.addf %800, %801 : vector<5x128xf32>
    %803 = arith.mulf %799, %802 : vector<5x128xf32>
    %cst_175 = arith.constant dense<0.000000e+00> : vector<128xf32>
    %804 = vector.multi_reduction <add>, %803, %cst_175 [0] : vector<5x128xf32> to vector<128xf32>
    %805 = vector.shape_cast %804 : vector<128xf32> to vector<1x128xf32>
    %cst_176 = arith.constant 5.000000e+00 : f32
    %806 = vector.broadcast %cst_176 : f32 to vector<1x128xf32>
    %807 = arith.divf %805, %806 : vector<1x128xf32>
    %cst_177 = arith.constant dense<0xFF800000> : vector<1xf32>
    %808 = vector.multi_reduction <maximumf>, %807, %cst_177 [1] : vector<1x128xf32> to vector<1xf32>
    %809 = vector.shape_cast %808 : vector<1xf32> to vector<1x1xf32>
    %810 = vector.broadcast %809 : vector<1x1xf32> to vector<1x128xf32>
    %811 = arith.subf %807, %810 : vector<1x128xf32>
    %812 = math.exp %811 : vector<1x128xf32>
    %cst_178 = arith.constant dense<0.000000e+00> : vector<1xf32>
    %813 = vector.multi_reduction <add>, %812, %cst_178 [1] : vector<1x128xf32> to vector<1xf32>
    %814 = vector.shape_cast %813 : vector<1xf32> to vector<1x1xf32>
    %815 = vector.broadcast %814 : vector<1x1xf32> to vector<1x128xf32>
    %816 = arith.divf %812, %815 : vector<1x128xf32>
    %c0_179 = arith.constant 0 : index
    %c0_180 = arith.constant 0 : index
    %817 = vector.load %arg25[%c0_179, %c0_180] : memref<1x128xf32, #tpu.memory_space<vmem>>, vector<1x128xf32>
    tpu.vector_store %arg25[%c0_179, %c0_180], %816 {strides = array<i32>} : memref<1x128xf32, #tpu.memory_space<vmem>>, vector<1x128xf32>,
    return
  }
}

</mosaic_0001>

<bundles_post_ra>
// kernel: tpu_custom_call.1
= control target key start
LH: loop header
LB: loop body
LE: loop exit
PB: predicated region body
PF: predicated region fallthrough
CT: control target
= control target key end

     0   :  { %s10470_s0 = inlined_call_operand.hbm [shape: bf16[32,32], index: 0, kind: input, shape index: {}]   ;;  %s10471_s1 = inlined_call_operand.hbm [shape: f32[32,32], index: 1, kind: input, shape index: {}]   ;;  %s10472_s2 = inlined_call_operand.vmem [shape: f32[32,16], index: 2, kind: input, shape index: {}]   ;;  %s10473_s3 = inlined_call_operand.hbm [shape: bf16[8,32,32], index: 3, kind: input, shape index: {}]   ;;  %s10474_s4 = inlined_call_operand.hbm [shape: bf16[3,32,32], index: 4, kind: input, shape index: {}]   ;;  %s10475_s5 = inlined_call_operand.hbm [shape: bf16[3,32,32], index: 5, kind: input, shape index: {}]   ;;  %s10476_s6 = inlined_call_operand.hbm [shape: f32[3,1,32], index: 6, kind: input, shape index: {}]   ;;  %s10477_s7 = inlined_call_operand.hbm [shape: f32[3,1,32], index: 7, kind: input, shape index: {}]   ;;  %s10478_s8 = inlined_call_operand.vmem [shape: bf16[4,32,32], index: 8, kind: input, shape index: {}]   ;;  %s10479_s9 = inlined_call_operand.hbm [shape: f32[1,32], index: 9, kind: input, shape index: {}]   ;;  %s10480_s10 = inlined_call_operand.hbm [shape: bf16[2,32,32], index: 10, kind: input, shape index: {}]   ;;  %s10481_s11 = inlined_call_operand.hbm [shape: f32[1,32], index: 11, kind: input, shape index: {}]   ;;  %s10482_s12 = inlined_call_operand.hbm [shape: f32[1,32], index: 12, kind: input, shape index: {}]   ;;  %s10483_s13 = inlined_call_operand.hbm [shape: f32[1,32], index: 13, kind: input, shape index: {}]   ;;  %s10484_s14 = inlined_call_operand.hbm [shape: bf16[4,32,48], index: 14, kind: input, shape index: {}]   ;;  %s10485_s15 = inlined_call_operand.hbm [shape: bf16[4,16,48], index: 15, kind: input, shape index: {}]   ;;  %s10486_s16 = inlined_call_operand.hbm [shape: f32[1,48], index: 16, kind: input, shape index: {}]   ;;  %s10487_s17 = inlined_call_operand.vmem [shape: bf16[2,48,48], index: 17, kind: input, shape index: {}]   ;;  %s10488_s18 = inlined_call_operand.vmem [shape: f32[1,48], index: 18, kind: input, shape index: {}]   ;;  %s10489_s19 = inlined_call_operand.vmem [shape: f32[1,48], index: 19, kind: input, shape index: {}]   ;;  %s10490_s20 = inlined_call_operand.vmem [shape: f32[1,48], index: 20, kind: input, shape index: {}]   ;;  %s10491_s21 = inlined_call_operand.hbm [shape: f32[32,128], index: 21, kind: input, shape index: {}]   ;;  %s10492_s22 = inlined_call_operand.vmem [shape: f32[1,128], index: 22, kind: input, shape index: {}]   ;;  %s10493_s23 = inlined_call_operand.hbm [shape: f32[48,128], index: 23, kind: input, shape index: {}]   ;;  %s10494_s24 = inlined_call_operand.vmem [shape: f32[1,128], index: 24, kind: input, shape index: {}]   ;;  %s10495_s25 = inlined_call_operand.hbm [shape: f32[1,128], index: 25, kind: output, shape index: {}]  }
   0x1   :  { %10515 = sst [smem:[#allocation40_spill]] %s10470_s0 }
   0x2   :  { %10516 = sst [smem:[#allocation41_spill]] %s10471_s1 }
   0x3   :  { %10517 = sst [smem:[#allocation42_spill]] %s10472_s2 }
   0x4   :  { %10518 = sst [smem:[#allocation43_spill]] %s10473_s3 }
   0x5   :  { %10519 = sst [smem:[#allocation44_spill]] %s10474_s4 }
   0x6   :  { %10520 = sst [smem:[#allocation45_spill]] %s10475_s5 }
   0x7   :  { %10521 = sst [smem:[#allocation46_spill]] %s10476_s6 }
   0x8   :  { %10522 = sst [smem:[#allocation47_spill]] %s10477_s7 }
   0x9   :  { %10523 = sst [smem:[#allocation48_spill]] %s10478_s8 }
   0xa   :  { %10524 = sst [smem:[#allocation49_spill]] %s10479_s9 }
   0xb   :  { %10525 = sst [smem:[#allocation50_spill]] %s10492_s22 }
   0xc   :  { %10526 = sst [smem:[#allocation51_spill]] %s10494_s24 }
   0xd   :  { %10527 = sst [smem:[#allocation52_spill]] %s10495_s25 }
   0xe   :  { %30 = vsyncpa [#allocation3], 0 }
   0xf   :  { %31 = vsyncpa [#allocation6], 0 }
  0x10   :  { %32 = vsyncpa [#allocation9], 0 }
  0x11   :  { %33 = vsyncpa [#allocation12], 0 }
  0x12   :  { %34 = vsyncpa [#allocation15], 0 }
  0x13   :  { %35 = vsyncpa [#allocation18], 0 }
  0x14   :  { %36 = vsyncpa [#allocation21], 0 }
  0x15   :  { %37 = vsyncpa [#allocation24], 0 }
  0x16   :  { %38 = vsyncpa [#allocation27], 0 }
  0x17   :  { %39 = vsyncpa [#allocation4], 0  ;;  %s8977_s29 = smov [#allocation5]   ;;  %s10528_s7 = sld [smem:[#allocation41_spill]] }
  0x18   :  { %s57_s2 = sshll.u32 %s8977_s29, 4  ;;  %s58_s2 = int_to_ptr.vmem [resolvable:$true] %s57_s2 }
  0x1d   :  { %s8561_s3 = scalar_lea.hbm %s10528_s7, 512 }
  0x1e   :  { %p8562_p0 = scmp.ne.s32.totalorder %s10528_s7, %s8561_s3  ;;  %p8565_p1 = scmp.lt.u32.totalorder %s8561_s3, %s10528_s7 }
  0x20   :  { %p8567_p2 = pnand %p8565_p1, %p8562_p0 }
  0x22   :  { %8570 = shalt.err (!%p8567_p2)
}
  0x23   :  { %s8571_s4 = scalar_lea.vmem %s58_s2, 512  ;;  %p8576_p4 = scmp.lt.s32.totalorder %s58_s2, %s58_s2 }
  0x24   :  { %p8572_p3 = scmp.ne.s32.totalorder %s58_s2, %s8571_s4  ;;  %p8577_p5 = scmp.lt.s32.totalorder %s8571_s4, %s8571_s4 }
  0x26   :  { %p8578_p6 = por %p8577_p5, %p8576_p4 }
  0x28   :  { %p8579_p7 = pnand %p8578_p6, %p8572_p3 }
  0x2a   :  { %8582 = shalt.err (!%p8579_p7)
}
  0x2b   :  { %s10507_s28 = smov 128   ;;  %s10509_s9 = smov 8  }
  0x2c   :  { %63 = dma.hbm_to_vmem [thread:$0]  %s10528_s7, 512, %s58_s2, [#allocation6], %s10507_s28, %s10507_s28, %s10509_s9  }
  0x2d   :  { %s8980_s29 = smov [#allocation8]   ;;  %s8981_s30 = smov [#allocation11]  }
  0x2e   :  { %s83_s6 = sshll.u32 %s8980_s29, 4  ;;  %s107_s3 = sshll.u32 %s8981_s30, 4  ;;  %s84_s6 = int_to_ptr.vmem [resolvable:$true] %s83_s6  ;;  %s108_s3 = int_to_ptr.vmem [resolvable:$true] %s107_s3 }
  0x2f   :  { %s10529_s8 = sld [smem:[#allocation44_spill]] }
  0x35   :  { %s8583_s27 = scalar_lea.hbm %s10529_s8, 768 }
  0x36   :  { %p8584_p8 = scmp.ne.s32.totalorder %s10529_s8, %s8583_s27  ;;  %p8587_p9 = scmp.lt.u32.totalorder %s8583_s27, %s10529_s8 }
  0x38   :  { %p8589_p10 = pnand %p8587_p9, %p8584_p8 }
  0x3a   :  { %8592 = shalt.err (!%p8589_p10)
}
  0x3b   :  { %s8593_s2 = scalar_lea.vmem %s84_s6, 768  ;;  %p8598_p12 = scmp.lt.s32.totalorder %s84_s6, %s84_s6 }
  0x3c   :  { %p8594_p11 = scmp.ne.s32.totalorder %s84_s6, %s8593_s2  ;;  %p8599_p13 = scmp.lt.s32.totalorder %s8593_s2, %s8593_s2 }
  0x3e   :  { %p8600_p0 = por %p8599_p13, %p8598_p12 }
  0x40   :  { %p8601_p1 = pnand %p8600_p0, %p8594_p11 }
  0x42   :  { %8604 = shalt.err (!%p8601_p1)
}
  0x43   :  { %s10511_s7 = smov 64   ;;  %s10513_s5 = smov 4  }
  0x44   :  { %89 = dma.hbm_to_vmem [thread:$0]  %s10529_s8, 768, %s84_s6, [#allocation9], %s10511_s7, %s10511_s7, %s10513_s5  }
  0x45   :  { %s10530_s29 = sld [smem:[#allocation46_spill]] }
  0x4b   :  { %s8605_s30 = scalar_lea.hbm %s10530_s29, 48 }
  0x4c   :  { %p8606_p2 = scmp.ne.s32.totalorder %s10530_s29, %s8605_s30  ;;  %p8609_p3 = scmp.lt.u32.totalorder %s8605_s30, %s10530_s29 }
  0x4e   :  { %p8611_p4 = pnand %p8609_p3, %p8606_p2 }
  0x50   :  { %8614 = shalt.err (!%p8611_p4)
}
  0x51   :  { %s8615_s2 = scalar_lea.vmem %s108_s3, 48  ;;  %s8619_s28 = scalar_lea.vmem %s108_s3, 64 }
  0x52   :  { %p8616_p5 = scmp.ne.s32.totalorder %s108_s3, %s8615_s2  ;;  %p8620_p6 = scmp.lt.s32.totalorder %s108_s3, %s108_s3 }
  0x53   :  { %p8621_p7 = scmp.lt.s32.totalorder %s8619_s28, %s8615_s2 }
  0x55   :  { %p8622_p8 = por %p8621_p7, %p8620_p6 }
  0x57   :  { %p8623_p9 = pnand %p8622_p8, %p8616_p5 }
  0x59   :  { %8626 = shalt.err (!%p8623_p9)
}
  0x5a   :  { %s8984_s6 = smov 16   ;;  %s8985_s8 = smov 1  }
  0x5b   :  { %113 = dma.hbm_to_vmem [thread:$0]  %s10530_s29, 48, %s108_s3, [#allocation12], %s8984_s6, %s8984_s6, %s8985_s8  }
  0x5c   :  { %s8986_s22 = smov [#allocation14]   ;;  %s8987_s30 = smov [#allocation17]  }
  0x5d   :  { %s134_s24 = sshll.u32 %s8986_s22, 4  ;;  %s156_s26 = sshll.u32 %s8987_s30, 4  ;;  %s135_s24 = int_to_ptr.vmem [resolvable:$true] %s134_s24  ;;  %s157_s26 = int_to_ptr.vmem [resolvable:$true] %s156_s26 }
  0x5e   :  { %s10531_s28 = sld [smem:[#allocation49_spill]] }
  0x64   :  { %s8627_s4 = scalar_lea.hbm %s10531_s28, 16 }
  0x65   :  { %p8628_p10 = scmp.ne.s32.totalorder %s10531_s28, %s8627_s4  ;;  %p8631_p11 = scmp.lt.u32.totalorder %s8627_s4, %s10531_s28 }
  0x67   :  { %p8633_p12 = pnand %p8631_p11, %p8628_p10 }
  0x69   :  { %8636 = shalt.err (!%p8633_p12)
}
  0x6a   :  { %s8637_s3 = scalar_lea.vmem %s135_s24, 16  ;;  %s8641_s29 = scalar_lea.vmem %s135_s24, 32 }
  0x6b   :  { %p8638_p13 = scmp.ne.s32.totalorder %s135_s24, %s8637_s3  ;;  %p8642_p0 = scmp.lt.s32.totalorder %s135_s24, %s135_s24 }
  0x6c   :  { %p8643_p1 = scmp.lt.s32.totalorder %s8641_s29, %s8637_s3 }
  0x6e   :  { %p8644_p2 = por %p8643_p1, %p8642_p0 }
  0x70   :  { %p8645_p3 = pnand %p8644_p2, %p8638_p13 }
  0x72   :  { %8648 = shalt.err (!%p8645_p3)
}
  0x73   :  { %137 = dma.hbm_to_vmem [thread:$0]  %s10531_s28, 16, %s135_s24, [#allocation15]  }
  0x74   :  { %s8649_s7 = scalar_lea.hbm %s10481_s11, 16 }
  0x75   :  { %p8650_p4 = scmp.ne.s32.totalorder %s10481_s11, %s8649_s7  ;;  %p8653_p5 = scmp.lt.u32.totalorder %s8649_s7, %s10481_s11 }
  0x77   :  { %p8655_p6 = pnand %p8653_p5, %p8650_p4 }
  0x79   :  { %8658 = shalt.err (!%p8655_p6)
}
  0x7a   :  { %s8659_s4 = scalar_lea.vmem %s157_s26, 16  ;;  %s8663_s2 = scalar_lea.vmem %s157_s26, 32 }
  0x7b   :  { %p8660_p7 = scmp.ne.s32.totalorder %s157_s26, %s8659_s4  ;;  %p8664_p8 = scmp.lt.s32.totalorder %s157_s26, %s157_s26 }
  0x7c   :  { %p8665_p9 = scmp.lt.s32.totalorder %s8663_s2, %s8659_s4 }
  0x7e   :  { %p8666_p10 = por %p8665_p9, %p8664_p8 }
  0x80   :  { %p8667_p11 = pnand %p8666_p10, %p8660_p7 }
  0x82   :  { %8670 = shalt.err (!%p8667_p11)
}
  0x83   :  { %159 = dma.hbm_to_vmem [thread:$0]  %s10481_s11, 16, %s157_s26, [#allocation18]  }
  0x84   :  { %s8988_s3 = smov [#allocation20]   ;;  %s8989_s25 = smov [#allocation23]  }
  0x85   :  { %s176_s29 = sshll.u32 %s8988_s3, 4  ;;  %s197_s0 = sshll.u32 %s8989_s25, 4  ;;  %s177_s29 = int_to_ptr.vmem [resolvable:$true] %s176_s29  ;;  %s198_s0 = int_to_ptr.vmem [resolvable:$true] %s197_s0 }
  0x86   :  { %s8671_s7 = scalar_lea.hbm %s10483_s13, 16 }
  0x87   :  { %p8672_p12 = scmp.ne.s32.totalorder %s10483_s13, %s8671_s7  ;;  %p8675_p13 = scmp.lt.u32.totalorder %s8671_s7, %s10483_s13 }
  0x89   :  { %p8677_p0 = pnand %p8675_p13, %p8672_p12 }
  0x8b   :  { %8680 = shalt.err (!%p8677_p0)
}
  0x8c   :  { %s8681_s11 = scalar_lea.vmem %s177_s29, 16  ;;  %s8685_s26 = scalar_lea.vmem %s177_s29, 32 }
  0x8d   :  { %p8682_p1 = scmp.ne.s32.totalorder %s177_s29, %s8681_s11  ;;  %p8686_p2 = scmp.lt.s32.totalorder %s177_s29, %s177_s29 }
  0x8e   :  { %p8687_p3 = scmp.lt.s32.totalorder %s8685_s26, %s8681_s11 }
  0x90   :  { %p8688_p4 = por %p8687_p3, %p8686_p2 }
  0x92   :  { %p8689_p5 = pnand %p8688_p4, %p8682_p1 }
  0x94   :  { %8692 = shalt.err (!%p8689_p5)
}
  0x95   :  { %179 = dma.hbm_to_vmem [thread:$0]  %s10483_s13, 16, %s177_s29, [#allocation21]  }
  0x96   :  { %s8693_s3 = scalar_lea.hbm %s10485_s15, 512 }
  0x97   :  { %p8694_p6 = scmp.ne.s32.totalorder %s10485_s15, %s8693_s3  ;;  %p8697_p7 = scmp.lt.u32.totalorder %s8693_s3, %s10485_s15 }
  0x99   :  { %p8699_p8 = pnand %p8697_p7, %p8694_p6 }
  0x9b   :  { %8702 = shalt.err (!%p8699_p8)
}
  0x9c   :  { %s8703_s5 = scalar_lea.vmem %s198_s0, 512  ;;  %p8708_p10 = scmp.lt.s32.totalorder %s198_s0, %s198_s0 }
  0x9d   :  { %p8704_p9 = scmp.ne.s32.totalorder %s198_s0, %s8703_s5  ;;  %p8709_p11 = scmp.lt.s32.totalorder %s8703_s5, %s8703_s5 }
  0x9f   :  { %p8710_p12 = por %p8709_p11, %p8708_p10 }
  0xa1   :  { %p8711_p13 = pnand %p8710_p12, %p8704_p9 }
  0xa3   :  { %8714 = shalt.err (!%p8711_p13)
}
  0xa4   :  { %s10532_s13 = smov 4   ;;  %s10533_s29 = smov 64  }
  0xa5   :  { %203 = dma.hbm_to_vmem [thread:$0]  %s10485_s15, 512, %s198_s0, [#allocation24], %s10533_s29, %s10533_s29, %s10532_s13  }
  0xa6   :  { %s8990_s27 = smov [#allocation26]   ;;  %s8991_s26 = smov [#allocation2]  }
  0xa7   :  { %s227_s11 = sshll.u32 %s8990_s27, 4  ;;  %s45_s4 = sshll.u32 %s8991_s26, 4  ;;  %s228_s11 = int_to_ptr.vmem [resolvable:$true] %s227_s11  ;;  %s46_s4 = int_to_ptr.vmem [resolvable:$true] %s45_s4 }
  0xa8   :  { %s8715_s28 = scalar_lea.hbm %s10491_s21, 512 }
  0xa9   :  { %p8716_p0 = scmp.ne.s32.totalorder %s10491_s21, %s8715_s28  ;;  %p8719_p1 = scmp.lt.u32.totalorder %s8715_s28, %s10491_s21 }
  0xab   :  { %p8721_p2 = pnand %p8719_p1, %p8716_p0 }
  0xad   :  { %8724 = shalt.err (!%p8721_p2)
}
  0xae   :  { %s8725_s15 = scalar_lea.vmem %s228_s11, 512  ;;  %p8730_p4 = scmp.lt.s32.totalorder %s228_s11, %s228_s11 }
  0xaf   :  { %p8726_p3 = scmp.ne.s32.totalorder %s228_s11, %s8725_s15  ;;  %p8731_p5 = scmp.lt.s32.totalorder %s8725_s15, %s8725_s15 }
  0xb1   :  { %p8732_p6 = por %p8731_p5, %p8730_p4 }
  0xb3   :  { %p8733_p7 = pnand %p8732_p6, %p8726_p3 }
  0xb5   :  { %8736 = shalt.err (!%p8733_p7)
}
  0xb6   :  { %s10534_s0 = smov 8   ;;  %s10535_s7 = smov 128  }
  0xb7   :  { %233 = dma.hbm_to_vmem [thread:$0]  %s10491_s21, 512, %s228_s11, [#allocation27], %s10535_s7, %s10535_s7, %s10534_s0  }
  0xb8   :  { %s10536_s26 = sld [smem:[#allocation40_spill]] }
  0xbe   :  { %s8737_s2 = scalar_lea.hbm %s10536_s26, 256 }
  0xbf   :  { %p8738_p8 = scmp.ne.s32.totalorder %s10536_s26, %s8737_s2  ;;  %p8741_p9 = scmp.lt.u32.totalorder %s8737_s2, %s10536_s26 }
  0xc1   :  { %p8743_p10 = pnand %p8741_p9, %p8738_p8 }
  0xc3   :  { %8746 = shalt.err (!%p8743_p10)
}
  0xc4   :  { %s8747_s9 = scalar_lea.vmem %s46_s4, 256  ;;  %p8752_p12 = scmp.lt.s32.totalorder %s46_s4, %s46_s4 }
  0xc5   :  { %p8748_p11 = scmp.ne.s32.totalorder %s46_s4, %s8747_s9  ;;  %p8753_p13 = scmp.lt.s32.totalorder %s8747_s9, %s8747_s9 }
  0xc7   :  { %p8754_p0 = por %p8753_p13, %p8752_p12 }
  0xc9   :  { %p8755_p1 = pnand %p8754_p0, %p8748_p11 }
  0xcb   :  { %8758 = shalt.err (!%p8755_p1)
}
  0xcc   :  { %51 = dma.hbm_to_vmem [thread:$0]  %s10536_s26, 256, %s46_s4, [#allocation3], %s10533_s29, %s10533_s29, %s10532_s13  }
  0xcd   :  { %s8992_s22 = smov [#allocation7]   ;;  %s8993_s5 = smov [#allocation10]  }
  0xce   :  { %s71_s15 = sshll.u32 %s8992_s22, 4  ;;  %s95_s30 = sshll.u32 %s8993_s5, 4  ;;  %s72_s15 = int_to_ptr.vmem [resolvable:$true] %s71_s15  ;;  %s96_s30 = int_to_ptr.vmem [resolvable:$true] %s95_s30 }
  0xcf   :  { %s10537_s2 = sld [smem:[#allocation43_spill]] }
  0xd5   :  { %s8759_s24 = scalar_lea.hbm %s10537_s2, 2048 }
  0xd6   :  { %p8760_p2 = scmp.ne.s32.totalorder %s10537_s2, %s8759_s24  ;;  %p8763_p3 = scmp.lt.u32.totalorder %s8759_s24, %s10537_s2 }
  0xd8   :  { %p8765_p4 = pnand %p8763_p3, %p8760_p2 }
  0xda   :  { %8768 = shalt.err (!%p8765_p4)
}
  0xdb   :  { %s8769_s4 = scalar_lea.vmem %s72_s15, 2048  ;;  %p8774_p6 = scmp.lt.s32.totalorder %s72_s15, %s72_s15 }
  0xdc   :  { %p8770_p5 = scmp.ne.s32.totalorder %s72_s15, %s8769_s4  ;;  %p8775_p7 = scmp.lt.s32.totalorder %s8769_s4, %s8769_s4 }
  0xde   :  { %p8776_p8 = por %p8775_p7, %p8774_p6 }
  0xe0   :  { %p8777_p9 = pnand %p8776_p8, %p8770_p5 }
  0xe2   :  { %8780 = shalt.err (!%p8777_p9)
}
  0xe3   :  { %77 = dma.hbm_to_vmem [thread:$0]  %s10537_s2, 2048, %s72_s15, [#allocation6], %s10533_s29, %s10533_s29, %s10532_s13  }
  0xe4   :  { %s10538_s5 = sld [smem:[#allocation45_spill]] }
  0xea   :  { %s8781_s1 = scalar_lea.hbm %s10538_s5, 768 }
  0xeb   :  { %p8782_p10 = scmp.ne.s32.totalorder %s10538_s5, %s8781_s1  ;;  %p8785_p11 = scmp.lt.u32.totalorder %s8781_s1, %s10538_s5 }
  0xed   :  { %p8787_p12 = pnand %p8785_p11, %p8782_p10 }
  0xef   :  { %8790 = shalt.err (!%p8787_p12)
}
  0xf0   :  { %s8791_s25 = scalar_lea.vmem %s96_s30, 768  ;;  %p8796_p0 = scmp.lt.s32.totalorder %s96_s30, %s96_s30 }
  0xf1   :  { %p8792_p13 = scmp.ne.s32.totalorder %s96_s30, %s8791_s25  ;;  %p8797_p1 = scmp.lt.s32.totalorder %s8791_s25, %s8791_s25 }
  0xf3   :  { %p8798_p2 = por %p8797_p1, %p8796_p0 }
  0xf5   :  { %p8799_p3 = pnand %p8798_p2, %p8792_p13 }
  0xf7   :  { %8802 = shalt.err (!%p8799_p3)
}
  0xf8   :  { %101 = dma.hbm_to_vmem [thread:$0]  %s10538_s5, 768, %s96_s30, [#allocation9], %s10533_s29, %s10533_s29, %s10532_s13  }
  0xf9   :  { %s8994_s9 = smov [#allocation13]   ;;  %s8995_s26 = smov [#allocation16]  }
  0xfa   :  { %s119_s4 = sshll.u32 %s8994_s9, 4  ;;  %s143_s21 = sshll.u32 %s8995_s26, 4  ;;  %s120_s4 = int_to_ptr.vmem [resolvable:$true] %s119_s4  ;;  %s144_s21 = int_to_ptr.vmem [resolvable:$true] %s143_s21 }
  0xfb   :  { %s10539_s1 = sld [smem:[#allocation47_spill]] }
 0x101   :  { %s8803_s27 = scalar_lea.hbm %s10539_s1, 48 }
 0x102   :  { %p8804_p4 = scmp.ne.s32.totalorder %s10539_s1, %s8803_s27  ;;  %p8807_p5 = scmp.lt.u32.totalorder %s8803_s27, %s10539_s1 }
 0x104   :  { %p8809_p6 = pnand %p8807_p5, %p8804_p4 }
 0x106   :  { %8812 = shalt.err (!%p8809_p6)
}
 0x107   :  { %s8813_s30 = scalar_lea.vmem %s120_s4, 48  ;;  %s8817_s5 = scalar_lea.vmem %s120_s4, 64 }
 0x108   :  { %p8814_p7 = scmp.ne.s32.totalorder %s120_s4, %s8813_s30  ;;  %p8818_p8 = scmp.lt.s32.totalorder %s120_s4, %s120_s4 }
 0x109   :  { %p8819_p9 = scmp.lt.s32.totalorder %s8817_s5, %s8813_s30 }
 0x10b   :  { %p8820_p10 = por %p8819_p9, %p8818_p8 }
 0x10d   :  { %p8821_p11 = pnand %p8820_p10, %p8814_p7 }
 0x10f   :  { %8824 = shalt.err (!%p8821_p11)
}
 0x110   :  { %125 = dma.hbm_to_vmem [thread:$0]  %s10539_s1, 48, %s120_s4, [#allocation12], %s8984_s6, %s8984_s6, %s8985_s8  }
 0x111   :  { %s8825_s11 = scalar_lea.hbm %s10480_s10, 512 }
 0x112   :  { %p8826_p12 = scmp.ne.s32.totalorder %s10480_s10, %s8825_s11  ;;  %p8829_p13 = scmp.lt.u32.totalorder %s8825_s11, %s10480_s10 }
 0x114   :  { %p8831_p0 = pnand %p8829_p13, %p8826_p12 }
 0x116   :  { %8834 = shalt.err (!%p8831_p0)
}
 0x117   :  { %s8835_s3 = scalar_lea.vmem %s144_s21, 512  ;;  %p8840_p2 = scmp.lt.s32.totalorder %s144_s21, %s144_s21 }
 0x118   :  { %p8836_p1 = scmp.ne.s32.totalorder %s144_s21, %s8835_s3  ;;  %p8841_p3 = scmp.lt.s32.totalorder %s8835_s3, %s8835_s3 }
 0x11a   :  { %p8842_p4 = por %p8841_p3, %p8840_p2 }
 0x11c   :  { %p8843_p5 = pnand %p8842_p4, %p8836_p1 }
 0x11e   :  { %8846 = shalt.err (!%p8843_p5)
}
 0x11f   :  { %149 = dma.hbm_to_vmem [thread:$0]  %s10480_s10, 512, %s144_s21, [#allocation15], %s10533_s29, %s10533_s29, %s10532_s13  }
 0x120   :  { %s8996_s4 = smov [#allocation19]   ;;  %s8997_s25 = smov [#allocation22]  }
 0x121   :  { %s166_s1 = sshll.u32 %s8996_s4, 4  ;;  %s185_s30 = sshll.u32 %s8997_s25, 4  ;;  %s167_s1 = int_to_ptr.vmem [resolvable:$true] %s166_s1  ;;  %s186_s30 = int_to_ptr.vmem [resolvable:$true] %s185_s30 }
 0x122   :  { %s8847_s2 = scalar_lea.hbm %s10482_s12, 16 }
 0x123   :  { %p8848_p6 = scmp.ne.s32.totalorder %s10482_s12, %s8847_s2  ;;  %p8851_p7 = scmp.lt.u32.totalorder %s8847_s2, %s10482_s12 }
 0x125   :  { %p8853_p8 = pnand %p8851_p7, %p8848_p6 }
 0x127   :  { %8856 = shalt.err (!%p8853_p8)
}
 0x128   :  { %s8857_s10 = scalar_lea.vmem %s167_s1, 16  ;;  %s8861_s21 = scalar_lea.vmem %s167_s1, 32 }
 0x129   :  { %p8858_p9 = scmp.ne.s32.totalorder %s167_s1, %s8857_s10  ;;  %p8862_p10 = scmp.lt.s32.totalorder %s167_s1, %s167_s1 }
 0x12a   :  { %p8863_p11 = scmp.lt.s32.totalorder %s8861_s21, %s8857_s10 }
 0x12c   :  { %p8864_p12 = por %p8863_p11, %p8862_p10 }
 0x12e   :  { %p8865_p13 = pnand %p8864_p12, %p8858_p9 }
 0x130   :  { %8868 = shalt.err (!%p8865_p13)
}
 0x131   :  { %169 = dma.hbm_to_vmem [thread:$0]  %s10482_s12, 16, %s167_s1, [#allocation18]  }
 0x132   :  { %s8869_s6 = scalar_lea.hbm %s10484_s14, 1024 }
 0x133   :  { %p8870_p0 = scmp.ne.s32.totalorder %s10484_s14, %s8869_s6  ;;  %p8873_p1 = scmp.lt.u32.totalorder %s8869_s6, %s10484_s14 }
 0x135   :  { %p8875_p2 = pnand %p8873_p1, %p8870_p0 }
 0x137   :  { %8878 = shalt.err (!%p8875_p2)
}
 0x138   :  { %s8879_s15 = scalar_lea.vmem %s186_s30, 1024  ;;  %p8884_p4 = scmp.lt.s32.totalorder %s186_s30, %s186_s30 }
 0x139   :  { %p8880_p3 = scmp.ne.s32.totalorder %s186_s30, %s8879_s15  ;;  %p8885_p5 = scmp.lt.s32.totalorder %s8879_s15, %s8879_s15 }
 0x13b   :  { %p8886_p6 = por %p8885_p5, %p8884_p4 }
 0x13d   :  { %p8887_p7 = pnand %p8886_p6, %p8880_p3 }
 0x13f   :  { %8890 = shalt.err (!%p8887_p7)
}
 0x140   :  { %191 = dma.hbm_to_vmem [thread:$0]  %s10484_s14, 1024, %s186_s30, [#allocation21], %s10533_s29, %s10533_s29, %s10532_s13  }
 0x141   :  { %s8998_s2 = smov [#allocation25]   ;;  %s8999_s26 = smov [#allocation28]  }
 0x142   :  { %s210_s9 = sshll.u32 %s8998_s2, 4  ;;  %s241_s11 = sshll.u32 %s8999_s26, 4  ;;  %s211_s9 = int_to_ptr.vmem [resolvable:$true] %s210_s9  ;;  %s242_s11 = int_to_ptr.vmem [resolvable:$true] %s241_s11 }
 0x143   :  { %s8891_s21 = scalar_lea.hbm %s10486_s16, 16 }
 0x144   :  { %p8892_p8 = scmp.ne.s32.totalorder %s10486_s16, %s8891_s21  ;;  %p8895_p9 = scmp.lt.u32.totalorder %s8891_s21, %s10486_s16 }
 0x146   :  { %p8897_p10 = pnand %p8895_p9, %p8892_p8 }
 0x148   :  { %8900 = shalt.err (!%p8897_p10)
}
 0x149   :  { %s8901_s14 = scalar_lea.vmem %s211_s9, 16  ;;  %s8905_s13 = scalar_lea.vmem %s211_s9, 32 }
 0x14a   :  { %p8902_p11 = scmp.ne.s32.totalorder %s211_s9, %s8901_s14  ;;  %p8906_p12 = scmp.lt.s32.totalorder %s211_s9, %s211_s9 }
 0x14b   :  { %p8907_p13 = scmp.lt.s32.totalorder %s8905_s13, %s8901_s14 }
 0x14d   :  { %p8908_p0 = por %p8907_p13, %p8906_p12 }
 0x14f   :  { %p8909_p1 = pnand %p8908_p0, %p8902_p11 }
 0x151   :  { %8912 = shalt.err (!%p8909_p1)
}
 0x152   :  { %213 = dma.hbm_to_vmem [thread:$0]  %s10486_s16, 16, %s211_s9, [#allocation24]  }
 0x153   :  { %s8913_s4 = scalar_lea.hbm %s10493_s23, 768 }
 0x154   :  { %p8914_p2 = scmp.ne.s32.totalorder %s10493_s23, %s8913_s4  ;;  %p8917_p3 = scmp.lt.u32.totalorder %s8913_s4, %s10493_s23 }
 0x156   :  { %p8919_p4 = pnand %p8917_p3, %p8914_p2 }
 0x158   :  { %8922 = shalt.err (!%p8919_p4)
}
 0x159   :  { %s8923_s1 = scalar_lea.vmem %s242_s11, 768  ;;  %p8928_p6 = scmp.lt.s32.totalorder %s242_s11, %s242_s11 }
 0x15a   :  { %p8924_p5 = scmp.ne.s32.totalorder %s242_s11, %s8923_s1  ;;  %p8929_p7 = scmp.lt.s32.totalorder %s8923_s1, %s8923_s1 }
 0x15c   :  { %p8930_p8 = por %p8929_p7, %p8928_p6 }
 0x15e   :  { %p8931_p9 = pnand %p8930_p8, %p8924_p5 }
 0x160   :  { %8934 = shalt.err (!%p8931_p9)
}
 0x161   :  { %247 = dma.hbm_to_vmem [thread:$0]  %s10493_s23, 768, %s242_s11, [#allocation27], %s10535_s7, %s10535_s7, %s10534_s0  }
 0x162   :  { %8957 = dma.done.wait [#allocation3], 256  }
 0x163   :  { %8958 = vsyncadd [#allocation3], 4294967040 }
 0x164   :  { %8959 = dma.done.wait [#allocation6], 2560  }
 0x165   :  { %8960 = vsyncadd [#allocation6], 4294964736 }
 0x166   :  { %8961 = dma.done.wait [#allocation9], 1536  }
 0x167   :  { %8962 = vsyncadd [#allocation9], 4294965760 }
 0x168   :  { %8963 = dma.done.wait [#allocation12], 96  }
 0x169   :  { %8964 = vsyncadd [#allocation12], 4294967200 }
 0x16a   :  { %8965 = dma.done.wait [#allocation15], 528  }
 0x16b   :  { %8966 = vsyncadd [#allocation15], 4294966768 }
 0x16c   :  { %8967 = dma.done.wait [#allocation18], 32  }
 0x16d   :  { %8968 = vsyncadd [#allocation18], 4294967264 }
 0x16e   :  { %8969 = dma.done.wait [#allocation21], 1040  }
 0x16f   :  { %8970 = vsyncadd [#allocation21], 4294966256 }
 0x170   :  { %8971 = dma.done.wait [#allocation24], 528  }
 0x171   :  { %8972 = vsyncadd [#allocation24], 4294966768 }
 0x172   :  { %8973 = dma.done.wait [#allocation27], 1280  }
 0x173   :  { %8974 = vsyncadd [#allocation27], 4294966016  ;;  %v8137_v0 = vld [vmem:[#allocation7] sm:$0xff]   ;;  %v8138_v1 = vld [vmem:[#allocation7 + $0x8] sm:$0xff]   ;;  %vm470_vm0 = vcmask 261120   ;;  %s10540_s7 = sld [smem:[#allocation48_spill]] }
 0x174   :  { %7200 = vmatprep.subr.bf16.mxu0 %v8137_v0  ;;  %v9375_v2 = vld [vmem:[#allocation5] sm:$0xff]  ;;  %v9377_v3 = vld [vmem:[#allocation5 + $0x8] sm:$0xff]  ;;  %v9379_v4 = vld [vmem:[#allocation5 + $0x10] sm:$0xff]  ;;  %vm4695_vm1 = vsmask.f32 7424  ;;  %vm4845_vm2 = vcmask 1046528  }
 0x175   :  { %7201 = vmatpush3.bf16.msra.mxu0 %v8137_v0  ;;  %v9383_v5 = vpack.c.bf16 %v9377_v3, %v9375_v2  ;;  %v9385_v6 = vld [vmem:[#allocation5 + $0x18] sm:$0xff]  ;;  %v9395_v8 = vld [vmem:[#allocation2] sm:$0xff]   ;;  %v9399_v9 = vld [vmem:[#allocation8] sm:$0xff]   ;;  %vm4920_vm3 = vsmask.f32 6400  ;;  %vm5098_vm4 = vcmask 211968  }
 0x176   :  { %7202 = vmatprep.subr.bf16.mxu0 %v8138_v1  ;;  %v9391_v7 = vpack.c.bf16 %v9385_v6, %v9379_v4  ;;  %7212 = vmatprep.mubr.msk.bf16.mxu1 %vm470_vm0, %v9395_v8  ;;  %v9403_v16 = vld [vmem:[#allocation8 + $0x10] sm:$0xff]   ;;  %v9405_v17 = vld [vmem:[#allocation2 + $0x8] sm:$0xff]   ;;  %v9411_v18 = vld [vmem:[#allocation8 + $0x8] sm:$0xff]   ;;  %vm5053_vm7 = vcmask 1045504   ;;  %vm5069_vm8 = vcmask 1044480   ;;  %vm5105_vm9 = vcmask 1041408  }
 0x177   :  { %7204 = vmatprep.mubr.msk.bf16.mxu0 %vm470_vm0, %v9383_v5  ;;  %v9413_v19 = vld [vmem:[#allocation8 + $0x18] sm:$0xff]   ;;  %v9419_v20 = vld [vmem:[#allocation10] sm:$0xff]   ;;  %v9421_v21 = vld [vmem:[#allocation10 + $0x10] sm:$0xff]   ;;  %vm9001_vm10 = vmmov 1   ;;  %vm9002_vm12 = vmmov 0   ;;  %s10545_s4 = sld [smem:[#allocation42_spill]] }
 0x178   :  { %v9425_v28 = vld [vmem:[#allocation10 + $0x8] sm:$0xff]   ;;  %v9427_v29 = vld [vmem:[#allocation10 + $0x18] sm:$0xff]   ;;  %v9437_v30 = vld [vmem:[#allocation8 + $0x20] sm:$0xff]   ;;  %vm5333_vm13 = vcmask 80896   ;;  %vm5417_vm14 = vcmask 130048   ;;  %vm6136_vm15 = vcmask 392192  }
 0x179   :  { %7203 = vmatpush3.bf16.msra.mxu0 %v8138_v1  ;;  %v9439_v31 = vld [vmem:[#allocation10 + $0x20] sm:$0xff]   ;;  %v9449_v32 = vld [vmem:[#allocation8 + $0x28] sm:$0xff]   ;;  %v9451_v33 = vld [vmem:[#allocation10 + $0x28] sm:$0xff]   ;;  %s10546_s29 = sld [smem:[#allocation50_spill]]  ;;  %s10547_s8 = sld [smem:[#allocation51_spill]] }
 0x17a   :  { %7216 = vmatprep.subr.bf16.mxu0 %v9399_v9  ;;  %v8153_v34 = vld [vmem:[#allocation7 + $0x10] sm:$0xff]   ;;  %v8154_v35 = vld [vmem:[#allocation7 + $0x18] sm:$0xff]   ;;  %v9472_v36 = vld [vmem:[#allocation11] ss:$0 sm:$0xff] }
 0x17b   :  { %v9474_v37 = vld [vmem:[#allocation11 + $0x1] ss:$0 sm:$0xff]  ;;  %v9476_v38 = vld [vmem:[#allocation13] ss:$0 sm:$0xff]  ;;  %v9482_v49 = vld [vmem:[#allocation13 + $0x1] ss:$0 sm:$0xff] }
 0x17c   :  { %7205 = vmatmul.mubr.msk.bf16.vlgmr.msra.gmra.mrb[0].mxu0 %vm470_vm0, %v9391_v7  ;;  %vm10275_vm11 = vmpackc.low %vm5105_vm9, %vm9001_vm10 }
 0x17d   :  { %7217 = vmatpush3.bf16.msra.mxu0 %v9399_v9 }
 0x17e   :  { %7218 = vmatprep.subr.bf16.mxu0 %v9411_v18 }
 0x181   :  { %7219 = vmatpush3.bf16.msra.mxu0 %v9411_v18 }
 0x182   :  { %7224 = vmatprep.subr.bf16.mxu0 %v9419_v20 }
 0x24f   :  { %v7206_v10 = vpop.f32.mrb[0].mxu0 }
 0x250   :  { %v511_v11 = vpop.f32.mrb[1].mxu0 }
 0x251   :  { %v7207_v12 = vpop.f32.mrb[2].mxu0 }
 0x252   :  { %v527_v13 = vpack.c.bf16 %v7207_v12, %v7206_v10  ;;  %v514_v14 = vpop.f32.mrb[3].mxu0 }
 0x253   :  { %v526_v15 = vpack.c.bf16 %v514_v14, %v511_v11 }
 0x255   :  { %7208 = vmatprep.subr.bf16.mxu1 %v526_v15 }
 0x256   :  { %7209 = vmatpush3.bf16.msra.mxu1 %v526_v15 }
 0x257   :  { %7210 = vmatprep.subr.bf16.mxu1 %v527_v13 }
 0x25a   :  { %7211 = vmatpush3.bf16.msra.mxu1 %v527_v13 }
 0x25b   :  { %7232 = vmatprep.subr.bf16.mxu1 %v9403_v16 }
 0x25d   :  { %7213 = vmatmul.mubr.msk.bf16.vlgmr.msra.gmra.mrb[0].mxu1 %vm470_vm0, %v9405_v17 }
 0x25e   :  { %7233 = vmatpush3.bf16.msra.mxu1 %v9403_v16 }
 0x25f   :  { %7234 = vmatprep.subr.bf16.mxu1 %v9413_v19 }
 0x262   :  { %7235 = vmatpush3.bf16.msra.mxu1 %v9413_v19 }
 0x263   :  { %7240 = vmatprep.subr.bf16.mxu1 %v9421_v21 }
 0x330   :  { %v7214_v22 = vpop.f32.mrb[0].mxu1 }
 0x331   :  { %v578_v23 = vpop.f32.mrb[1].mxu1 }
 0x332   :  { %v7215_v24 = vpop.f32.mrb[2].mxu1 }
 0x333   :  { %v594_v25 = vpack.c.bf16 %v7215_v24, %v7214_v22  ;;  %v581_v26 = vpop.f32.mrb[3].mxu1 }
 0x334   :  { %v593_v27 = vpack.c.bf16 %v581_v26, %v578_v23 }
 0x336   :  { %7220 = vmatprep.mubr.msk.bf16.mxu0 %vm470_vm0, %v593_v27  ;;  %7236 = vmatprep.mubr.msk.bf16.mxu1 %vm470_vm0, %v593_v27 }
 0x337   :  { %7221 = vmatmul.mubr.msk.bf16.vlgmr.msra.gmra.mrb[4].mxu0 %vm470_vm0, %v594_v25  ;;  %7237 = vmatmul.mubr.msk.bf16.vlgmr.msra.gmra.mrb[4].mxu1 %vm470_vm0, %v594_v25 }
 0x338   :  { %7225 = vmatpush3.bf16.msra.mxu0 %v9419_v20  ;;  %7241 = vmatpush3.bf16.msra.mxu1 %v9421_v21 }
 0x339   :  { %7226 = vmatprep.subr.bf16.mxu0 %v9425_v28  ;;  %7242 = vmatprep.subr.bf16.mxu1 %v9427_v29 }
 0x33a   :  { %7228 = vmatprep.mubr.msk.bf16.mxu0 %vm470_vm0, %v9383_v5  ;;  %7244 = vmatprep.mubr.msk.bf16.mxu1 %vm470_vm0, %v9383_v5 }
 0x33c   :  { %7227 = vmatpush3.bf16.msra.mxu0 %v9425_v28  ;;  %7243 = vmatpush3.bf16.msra.mxu1 %v9427_v29 }
 0x33d   :  { %7248 = vmatprep.subr.bf16.mxu0 %v9437_v30  ;;  %7256 = vmatprep.subr.bf16.mxu1 %v9439_v31 }
 0x343   :  { %7229 = vmatmul.mubr.msk.bf16.vlgmr.msra.gmra.mrb[4].mxu0 %vm470_vm0, %v9391_v7  ;;  %7245 = vmatmul.mubr.msk.bf16.vlgmr.msra.gmra.mrb[4].mxu1 %vm470_vm0, %v9391_v7 }
 0x344   :  { %7249 = vmatpush3.bf16.msra.mxu0 %v9437_v30  ;;  %7252 = vmatprep.mubr.msk.bf16.mxu0 %vm470_vm0, %v593_v27 }
 0x345   :  { %7250 = vmatprep.subr.bf16.mxu0 %v9449_v32  ;;  %7257 = vmatpush3.bf16.msra.mxu1 %v9439_v31 }
 0x346   :  { %7258 = vmatprep.subr.bf16.mxu1 %v9451_v33  ;;  %7260 = vmatprep.mubr.msk.bf16.mxu1 %vm470_vm0, %v9383_v5 }
 0x348   :  { %7251 = vmatpush3.bf16.msra.mxu0 %v9449_v32 }
 0x349   :  { %7259 = vmatpush3.bf16.msra.mxu1 %v9451_v33  ;;  %7264 = vmatprep.subr.bf16.mxu0 %v8153_v34 }
 0x34b   :  { %7253 = vmatmul.mubr.msk.bf16.vlgmr.msra.gmra.mrb[8].mxu0 %vm470_vm0, %v594_v25 }
 0x34c   :  { %7261 = vmatmul.mubr.msk.bf16.vlgmr.msra.gmra.mrb[8].mxu1 %vm470_vm0, %v9391_v7  ;;  %7265 = vmatpush3.bf16.msra.mxu0 %v8153_v34 }
 0x34d   :  { %7276 = vmatprep.mubr.msk.bf16.mxu1 %vm470_vm0, %v9395_v8  ;;  %7266 = vmatprep.subr.bf16.mxu0 %v8154_v35 }
 0x350   :  { %7267 = vmatpush3.bf16.msra.mxu0 %v8154_v35 }
 0x351   :  { %7280 = vmatprep.subr.bf16.mxu0 %v9399_v9 }
 0x416   :  { %v7230_v39 = vpop.f32.mrb[4].mxu0  ;;  %v7246_v40 = vpop.f32.mrb[4].mxu1 }
 0x417   :  { %v7941_v41 = vadd.f32 %v7230_v39, %v9472_v36  ;;  %v714_v42 = vpop.f32.mrb[5].mxu0  ;;  %v880_v43 = vpop.f32.mrb[5].mxu1  ;;  %v7945_v44 = vadd.f32 %v7246_v40, %v9474_v37 }
 0x418   :  { %v7942_v45 = vadd.f32 %v9472_v36, %v714_v42  ;;  %v7231_v46 = vpop.f32.mrb[6].mxu0  ;;  %v7247_v47 = vpop.f32.mrb[6].mxu1  ;;  %v7946_v54 = vadd.f32 %v9474_v37, %v880_v43 }
 0x419   :  { %v741_v48 = vadd.f32 %v7941_v41, %v9476_v38  ;;  %v7943_v50 = vadd.f32 %v7231_v46, %v9472_v36  ;;  %v717_v51 = vpop.f32.mrb[7].mxu0  ;;  %v883_v52 = vpop.f32.mrb[7].mxu1  ;;  %v7947_v58 = vadd.f32 %v7247_v47, %v9474_v37  ;;  %v907_v59 = vadd.f32 %v7945_v44, %v9482_v49  ;;  %v9496_v46 = vld [vmem:[#allocation13 + $0x2] ss:$0 sm:$0xff] }
 0x41a   :  { %v739_v53 = vadd.f32 %v7942_v45, %v9476_v38  ;;  %v7944_v55 = vadd.f32 %v9472_v36, %v717_v51  ;;  %v7948_v63 = vadd.f32 %v9474_v37, %v883_v52  ;;  %v905_v0 = vadd.f32 %v7946_v54, %v9482_v49  ;;  %v9499_v52 = vld [vmem:[#allocation11 + $0x2] ss:$0 sm:$0xff] }
 0x41b   :  { %v6566_v56 = vmul.f32 -1.442695, %v741_v48  ;;  %v742_v57 = vadd.f32 %v7943_v50, %v9476_v38  ;;  %v908_v5 = vadd.f32 %v7947_v58, %v9482_v49  ;;  %v6580_v12 = vmul.f32 -1.442695, %v907_v59 }
 0x41c   :  { %v6564_v60 = vmul.f32 -1.442695, %v739_v53  ;;  %v740_v61 = vadd.f32 %v7944_v55, %v9476_v38  ;;  %v906_v15 = vadd.f32 %v7948_v63, %v9482_v49  ;;  %v6578_v24 = vmul.f32 -1.442695, %v905_v0 }
 0x41d   :  { %8197 = vpow2.f32 %v6566_v56  ;;  %v6567_v62 = vmul.f32 -1.442695, %v742_v57  ;;  %v6581_v26 = vmul.f32 -1.442695, %v908_v5 }
 0x41e   :  { %v7254_v1 = vpop.f32.mrb[8].mxu0  ;;  %8199 = vpow2.f32 %v6564_v60  ;;  %v6565_v7 = vmul.f32 -1.442695, %v740_v61  ;;  %v6579_v27 = vmul.f32 -1.442695, %v906_v15 }
 0x41f   :  { %v985_v10 = vpop.f32.mrb[9].mxu0  ;;  %v7262_v11 = vpop.f32.mrb[8].mxu1  ;;  %8201 = vpow2.f32 %v6567_v62  ;;  %v994_v58 = vadd.f32 %v7254_v1, %v9499_v52 }
 0x420   :  { %v7255_v13 = vpop.f32.mrb[10].mxu0  ;;  %v1052_v14 = vpop.f32.mrb[9].mxu1  ;;  %8203 = vpow2.f32 %v6565_v7  ;;  %v1061_v51 = vadd.f32 %v7262_v11, %v9496_v46  ;;  %v986_v62 = vadd.f32 %v9499_v52, %v985_v10 }
 0x421   :  { %v988_v22 = vpop.f32.mrb[11].mxu0  ;;  %v7263_v23 = vpop.f32.mrb[10].mxu1  ;;  %8205 = vpow2.f32 %v6580_v12  ;;  %v1053_v55 = vadd.f32 %v9496_v46, %v1052_v14  ;;  %v997_v11 = vadd.f32 %v7255_v13, %v9499_v52 }
 0x422   :  { %v1055_v25 = vpop.f32.mrb[11].mxu1  ;;  %8207 = vpow2.f32 %v6578_v24  ;;  %v1064_v5 = vadd.f32 %v7263_v23, %v9496_v46  ;;  %v989_v24 = vadd.f32 %v9499_v52, %v988_v22 }
 0x423   :  { %8209 = vpow2.f32 %v6581_v26  ;;  %v1056_v15 = vadd.f32 %v9496_v46, %v1055_v25 }
 0x424   :  { %8211 = vpow2.f32 %v6579_v27 }
 0x427   :  { %v8198_v34 = vpop.eup %8197 }
 0x428   :  { %v757_v35 = vadd.f32 1.0, %v8198_v34  ;;  %v8200_v39 = vpop.eup %8199 }
 0x429   :  { %v755_v40 = vadd.f32 1.0, %v8200_v39  ;;  %v8202_v41 = vpop.eup %8201 }
 0x42a   :  { %8213 = vrcp.f32 %v757_v35  ;;  %v758_v42 = vadd.f32 1.0, %v8202_v41  ;;  %v8204_v43 = vpop.eup %8203 }
 0x42b   :  { %8215 = vrcp.f32 %v755_v40  ;;  %v8206_v44 = vpop.eup %8205  ;;  %v756_v45 = vadd.f32 1.0, %v8204_v43 }
 0x42c   :  { %8217 = vrcp.f32 %v758_v42  ;;  %v8208_v47 = vpop.eup %8207  ;;  %v923_v50 = vadd.f32 1.0, %v8206_v44 }
 0x42d   :  { %8219 = vrcp.f32 %v756_v45  ;;  %v8210_v48 = vpop.eup %8209  ;;  %v921_v54 = vadd.f32 1.0, %v8208_v47 }
 0x42e   :  { %v8212_v53 = vpop.eup %8211  ;;  %v924_v57 = vadd.f32 1.0, %v8210_v48  ;;  %8221 = vrcp.f32 %v923_v50 }
 0x42f   :  { %v922_v61 = vadd.f32 1.0, %v8212_v53  ;;  %8223 = vrcp.f32 %v921_v54 }
 0x430   :  { %8225 = vrcp.f32 %v924_v57 }
 0x434   :  { %v8214_v56 = vpop.eup %8213 }
 0x435   :  { %v1069_v59 = vmul.f32 %v8214_v56, %v1061_v51  ;;  %v8216_v60 = vpop.eup %8215 }
 0x436   :  { %v1067_v0 = vmul.f32 %v8216_v60, %v1053_v55  ;;  %v8218_v7 = vpop.eup %8217 }
 0x437   :  { %v1073_v63 = vadd.f32 %v1069_v59, %v994_v58  ;;  %v1070_v14 = vmul.f32 %v8218_v7, %v1064_v5  ;;  %v8220_v1 = vpop.eup %8219 }
 0x438   :  { %v1071_v12 = vadd.f32 %v1067_v0, %v986_v62  ;;  %v1068_v26 = vmul.f32 %v8220_v1, %v1056_v15  ;;  %v8222_v34 = vpop.eup %8221  ;;  %v8155_v15 = vld [vmem:[#allocation7 + $0x20] sm:$0xff]   ;;  %v8156_v1 = vld [vmem:[#allocation7 + $0x28] sm:$0xff]  }
 0x439   :  { %8227 = vtanh.f32 %v1073_v63  ;;  %v1074_v10 = vadd.f32 %v1070_v14, %v997_v11  ;;  %v8224_v23 = vpop.eup %8223  ;;  %v1081_v39 = vsub.f32 1.0, %v8222_v34  ;;  %v1089_v25 = vmul.f32 %v8222_v34, %v9379_v4 }
 0x43a   :  { %8229 = vrcp.f32 %v922_v61  ;;  %v1072_v27 = vadd.f32 %v1068_v26, %v989_v24  ;;  %v8226_v35 = vpop.eup %8225  ;;  %v1079_v41 = vsub.f32 1.0, %v8224_v23  ;;  %v1087_v22 = vmul.f32 %v8224_v23, %v9375_v2 }
 0x43b   :  { %8231 = vtanh.f32 %v1071_v12  ;;  %v1082_v44 = vsub.f32 1.0, %v8226_v35  ;;  %v1090_v54 = vmul.f32 %v8226_v35, %v9385_v6 }
 0x43c   :  { %8233 = vtanh.f32 %v1074_v10 }
 0x43d   :  { %8235 = vtanh.f32 %v1072_v27 }
 0x443   :  { %v8228_v13 = vpop.eup %8227 }
 0x444   :  { %v8230_v40 = vpop.eup %8229  ;;  %v1085_v42 = vmul.f32 %v8228_v13, %v1081_v39 }
 0x445   :  { %v8232_v43 = vpop.eup %8231  ;;  %v1080_v50 = vsub.f32 1.0, %v8230_v40  ;;  %v1088_v57 = vmul.f32 %v8230_v40, %v9377_v3 }
 0x446   :  { %v1083_v45 = vmul.f32 %v8232_v43, %v1079_v41  ;;  %v9510_v47 = vadd.f32 %v1089_v25, %v1085_v42  ;;  %v8234_v48 = vpop.eup %8233 }
 0x447   :  { %v1086_v53 = vmul.f32 %v8234_v48, %v1082_v44  ;;  %v8236_v55 = vpop.eup %8235 }
 0x448   :  { %v9512_v51 = vadd.f32 %v1087_v22, %v1083_v45  ;;  %v1084_v56 = vmul.f32 %v8236_v55, %v1080_v50 }
 0x449   :  { %v9516_v58 = vadd.f32 %v1090_v54, %v1086_v53 }
 0x44a   :  { %v9518_v4 = vadd.f32 %v1088_v57, %v1084_v56 }
 0x44b   :  { %v1096_v59 = vpack.c.bf16 %v9516_v58, %v9510_v47 }
 0x44c   :  { %v1095_v2 = vpack.c.bf16 %v9518_v4, %v9512_v51 }
 0x44e   :  { %7268 = vmatprep.mubr.msk.bf16.mxu0 %vm470_vm0, %v1095_v2 }
 0x44f   :  { %7269 = vmatmul.mubr.msk.bf16.vlgmr.msra.gmra.mrb[12].mxu0 %vm470_vm0, %v1096_v59 }
 0x450   :  { %7281 = vmatpush3.bf16.msra.mxu0 %v9399_v9 }
 0x451   :  { %7282 = vmatprep.subr.bf16.mxu0 %v9411_v18 }
 0x454   :  { %7283 = vmatpush3.bf16.msra.mxu0 %v9411_v18 }
 0x455   :  { %7288 = vmatprep.subr.bf16.mxu0 %v9419_v20 }
 0x522   :  { %v7270_v3 = vpop.f32.mrb[12].mxu0 }
 0x523   :  { %v1149_v6 = vpop.f32.mrb[13].mxu0 }
 0x524   :  { %v7271_v60 = vpop.f32.mrb[14].mxu0 }
 0x525   :  { %v1165_v61 = vpack.c.bf16 %v7271_v60, %v7270_v3  ;;  %v1152_v62 = vpop.f32.mrb[15].mxu0 }
 0x526   :  { %v1164_v63 = vpack.c.bf16 %v1152_v62, %v1149_v6 }
 0x528   :  { %7272 = vmatprep.subr.bf16.mxu1 %v1164_v63 }
 0x529   :  { %7273 = vmatpush3.bf16.msra.mxu1 %v1164_v63 }
 0x52a   :  { %7274 = vmatprep.subr.bf16.mxu1 %v1165_v61 }
 0x52d   :  { %7275 = vmatpush3.bf16.msra.mxu1 %v1165_v61 }
 0x52e   :  { %7296 = vmatprep.subr.bf16.mxu1 %v9403_v16 }
 0x530   :  { %7277 = vmatmul.mubr.msk.bf16.vlgmr.msra.gmra.mrb[12].mxu1 %vm470_vm0, %v9405_v17 }
 0x531   :  { %7297 = vmatpush3.bf16.msra.mxu1 %v9403_v16 }
 0x532   :  { %7298 = vmatprep.subr.bf16.mxu1 %v9413_v19 }
 0x535   :  { %7299 = vmatpush3.bf16.msra.mxu1 %v9413_v19 }
 0x536   :  { %7304 = vmatprep.subr.bf16.mxu1 %v9421_v21 }
 0x603   :  { %v7278_v0 = vpop.f32.mrb[12].mxu1 }
 0x604   :  { %v1200_v5 = vpop.f32.mrb[13].mxu1 }
 0x605   :  { %v7279_v7 = vpop.f32.mrb[14].mxu1 }
 0x606   :  { %v1216_v11 = vpack.c.bf16 %v7279_v7, %v7278_v0  ;;  %v1203_v12 = vpop.f32.mrb[15].mxu1 }
 0x607   :  { %v1215_v14 = vpack.c.bf16 %v1203_v12, %v1200_v5 }
 0x609   :  { %7284 = vmatprep.mubr.msk.bf16.mxu0 %vm470_vm0, %v1215_v14  ;;  %7300 = vmatprep.mubr.msk.bf16.mxu1 %vm470_vm0, %v1215_v14 }
 0x60a   :  { %7285 = vmatmul.mubr.msk.bf16.vlgmr.msra.gmra.mrb[16].mxu0 %vm470_vm0, %v1216_v11  ;;  %7301 = vmatmul.mubr.msk.bf16.vlgmr.msra.gmra.mrb[16].mxu1 %vm470_vm0, %v1216_v11 }
 0x60b   :  { %7292 = vmatprep.mubr.msk.bf16.mxu0 %vm470_vm0, %v1095_v2  ;;  %7308 = vmatprep.mubr.msk.bf16.mxu1 %vm470_vm0, %v1095_v2 }
 0x60c   :  { %7289 = vmatpush3.bf16.msra.mxu0 %v9419_v20  ;;  %7305 = vmatpush3.bf16.msra.mxu1 %v9421_v21 }
 0x60d   :  { %7290 = vmatprep.subr.bf16.mxu0 %v9425_v28  ;;  %7306 = vmatprep.subr.bf16.mxu1 %v9427_v29 }
 0x610   :  { %7291 = vmatpush3.bf16.msra.mxu0 %v9425_v28  ;;  %7307 = vmatpush3.bf16.msra.mxu1 %v9427_v29 }
 0x611   :  { %7312 = vmatprep.subr.bf16.mxu0 %v9437_v30  ;;  %7320 = vmatprep.subr.bf16.mxu1 %v9439_v31 }
 0x616   :  { %7293 = vmatmul.mubr.msk.bf16.vlgmr.msra.gmra.mrb[16].mxu0 %vm470_vm0, %v1096_v59  ;;  %7309 = vmatmul.mubr.msk.bf16.vlgmr.msra.gmra.mrb[16].mxu1 %vm470_vm0, %v1096_v59 }
 0x617   :  { %7313 = vmatpush3.bf16.msra.mxu0 %v9437_v30  ;;  %7316 = vmatprep.mubr.msk.bf16.mxu0 %vm470_vm0, %v1215_v14 }
 0x618   :  { %7321 = vmatpush3.bf16.msra.mxu1 %v9439_v31  ;;  %7324 = vmatprep.mubr.msk.bf16.mxu1 %vm470_vm0, %v1095_v2 }
 0x619   :  { %7314 = vmatprep.subr.bf16.mxu0 %v9449_v32  ;;  %7322 = vmatprep.subr.bf16.mxu1 %v9451_v33 }
 0x61b   :  { %7315 = vmatpush3.bf16.msra.mxu0 %v9449_v32 }
 0x61c   :  { %7323 = vmatpush3.bf16.msra.mxu1 %v9451_v33  ;;  %7328 = vmatprep.subr.bf16.mxu0 %v8155_v15 }
 0x61e   :  { %7317 = vmatmul.mubr.msk.bf16.vlgmr.msra.gmra.mrb[20].mxu0 %vm470_vm0, %v1216_v11 }
 0x61f   :  { %7325 = vmatmul.mubr.msk.bf16.vlgmr.msra.gmra.mrb[20].mxu1 %vm470_vm0, %v1096_v59  ;;  %7329 = vmatpush3.bf16.msra.mxu0 %v8155_v15 }
 0x620   :  { %7340 = vmatprep.mubr.msk.bf16.mxu1 %vm470_vm0, %v9395_v8  ;;  %7330 = vmatprep.subr.bf16.mxu0 %v8156_v1 }
 0x623   :  { %7331 = vmatpush3.bf16.msra.mxu0 %v8156_v1 }
 0x624   :  { %7344 = vmatprep.subr.bf16.mxu0 %v9399_v9 }
 0x6e9   :  { %v7294_v24 = vpop.f32.mrb[16].mxu0  ;;  %v7310_v10 = vpop.f32.mrb[16].mxu1 }
 0x6ea   :  { %v7949_v26 = vadd.f32 %v7294_v24, %v9472_v36  ;;  %v1306_v27 = vpop.f32.mrb[17].mxu0  ;;  %v1436_v34 = vpop.f32.mrb[17].mxu1  ;;  %v7953_v23 = vadd.f32 %v7310_v10, %v9474_v37 }
 0x6eb   :  { %v7950_v35 = vadd.f32 %v9472_v36, %v1306_v27  ;;  %v7295_v39 = vpop.f32.mrb[18].mxu0  ;;  %v7311_v13 = vpop.f32.mrb[18].mxu1  ;;  %v7954_v44 = vadd.f32 %v9474_v37, %v1436_v34 }
 0x6ec   :  { %v1327_v40 = vadd.f32 %v7949_v26, %v9476_v38  ;;  %v7951_v41 = vadd.f32 %v7295_v39, %v9472_v36  ;;  %v1309_v42 = vpop.f32.mrb[19].mxu0  ;;  %v1439_v25 = vpop.f32.mrb[19].mxu1  ;;  %v7955_v50 = vadd.f32 %v7311_v13, %v9474_v37  ;;  %v1457_v53 = vadd.f32 %v7953_v23, %v9482_v49 }
 0x6ed   :  { %v1325_v43 = vadd.f32 %v7950_v35, %v9476_v38  ;;  %v7952_v45 = vadd.f32 %v9472_v36, %v1309_v42  ;;  %v7956_v57 = vadd.f32 %v9474_v37, %v1439_v25  ;;  %v1455_v2 = vadd.f32 %v7954_v44, %v9482_v49 }
 0x6ee   :  { %v6604_v22 = vmul.f32 -1.442695, %v1327_v40  ;;  %v1328_v48 = vadd.f32 %v7951_v41, %v9476_v38  ;;  %v1458_v3 = vadd.f32 %v7955_v50, %v9482_v49  ;;  %v6612_v62 = vmul.f32 -1.442695, %v1457_v53 }
 0x6ef   :  { %v6602_v54 = vmul.f32 -1.442695, %v1325_v43  ;;  %v1326_v55 = vadd.f32 %v7952_v45, %v9476_v38  ;;  %v1456_v5 = vadd.f32 %v7956_v57, %v9482_v49  ;;  %v6610_v12 = vmul.f32 -1.442695, %v1455_v2 }
 0x6f0   :  { %8237 = vpow2.f32 %v6604_v22  ;;  %v6605_v56 = vmul.f32 -1.442695, %v1328_v48  ;;  %v6613_v15 = vmul.f32 -1.442695, %v1458_v3 }
 0x6f1   :  { %v7318_v59 = vpop.f32.mrb[20].mxu0  ;;  %8239 = vpow2.f32 %v6602_v54  ;;  %v6603_v6 = vmul.f32 -1.442695, %v1326_v55  ;;  %v6611_v1 = vmul.f32 -1.442695, %v1456_v5 }
 0x6f2   :  { %v7326_v60 = vpop.f32.mrb[20].mxu1  ;;  %v1517_v61 = vpop.f32.mrb[21].mxu0  ;;  %8241 = vpow2.f32 %v6605_v56  ;;  %v1526_v48 = vadd.f32 %v7318_v59, %v9499_v52 }
 0x6f3   :  { %v1566_v63 = vpop.f32.mrb[21].mxu1  ;;  %v7319_v0 = vpop.f32.mrb[22].mxu0  ;;  %8243 = vpow2.f32 %v6603_v6  ;;  %v1575_v44 = vadd.f32 %v7326_v60, %v9496_v46  ;;  %v1518_v56 = vadd.f32 %v9499_v52, %v1517_v61 }
 0x6f4   :  { %v7327_v7 = vpop.f32.mrb[22].mxu1  ;;  %v1520_v11 = vpop.f32.mrb[23].mxu0  ;;  %8245 = vpow2.f32 %v6612_v62  ;;  %v1567_v53 = vadd.f32 %v9496_v46, %v1566_v63  ;;  %v1529_v60 = vadd.f32 %v7319_v0, %v9499_v52 }
 0x6f5   :  { %v1569_v14 = vpop.f32.mrb[23].mxu1  ;;  %8247 = vpow2.f32 %v6610_v12  ;;  %v1578_v3 = vadd.f32 %v7327_v7, %v9496_v46  ;;  %v1521_v61 = vadd.f32 %v9499_v52, %v1520_v11 }
 0x6f6   :  { %8249 = vpow2.f32 %v6613_v15  ;;  %v1570_v59 = vadd.f32 %v9496_v46, %v1569_v14 }
 0x6f7   :  { %8251 = vpow2.f32 %v6611_v1 }
 0x6fa   :  { %v8238_v24 = vpop.eup %8237 }
 0x6fb   :  { %v1343_v10 = vadd.f32 1.0, %v8238_v24  ;;  %v8240_v26 = vpop.eup %8239 }
 0x6fc   :  { %v1341_v27 = vadd.f32 1.0, %v8240_v26  ;;  %v8242_v34 = vpop.eup %8241 }
 0x6fd   :  { %8253 = vrcp.f32 %v1343_v10  ;;  %v1344_v23 = vadd.f32 1.0, %v8242_v34  ;;  %v8244_v35 = vpop.eup %8243 }
 0x6fe   :  { %8255 = vrcp.f32 %v1341_v27  ;;  %v8246_v39 = vpop.eup %8245  ;;  %v1342_v13 = vadd.f32 1.0, %v8244_v35 }
 0x6ff   :  { %8257 = vrcp.f32 %v1344_v23  ;;  %v8248_v40 = vpop.eup %8247  ;;  %v1473_v42 = vadd.f32 1.0, %v8246_v39 }
 0x700   :  { %8259 = vrcp.f32 %v1342_v13  ;;  %v8250_v41 = vpop.eup %8249  ;;  %v1471_v43 = vadd.f32 1.0, %v8248_v40 }
 0x701   :  { %v8252_v25 = vpop.eup %8251  ;;  %v1474_v22 = vadd.f32 1.0, %v8250_v41  ;;  %8261 = vrcp.f32 %v1473_v42 }
 0x702   :  { %v1472_v55 = vadd.f32 1.0, %v8252_v25  ;;  %8263 = vrcp.f32 %v1471_v43 }
 0x703   :  { %8265 = vrcp.f32 %v1474_v22 }
 0x707   :  { %v8254_v45 = vpop.eup %8253 }
 0x708   :  { %v1583_v50 = vmul.f32 %v8254_v45, %v1575_v44  ;;  %v8256_v54 = vpop.eup %8255 }
 0x709   :  { %v1581_v2 = vmul.f32 %v8256_v54, %v1567_v53  ;;  %v8258_v6 = vpop.eup %8257 }
 0x70a   :  { %v1587_v57 = vadd.f32 %v1583_v50, %v1526_v48  ;;  %v1584_v5 = vmul.f32 %v8258_v6, %v1578_v3  ;;  %v8260_v12 = vpop.eup %8259 }
 0x70b   :  { %v1585_v62 = vadd.f32 %v1581_v2, %v1518_v56  ;;  %v1582_v15 = vmul.f32 %v8260_v12, %v1570_v59  ;;  %v8262_v24 = vpop.eup %8261 }
 0x70c   :  { %8267 = vtanh.f32 %v1587_v57  ;;  %v1588_v63 = vadd.f32 %v1584_v5, %v1529_v60  ;;  %v8264_v7 = vpop.eup %8263  ;;  %v1595_v26 = vsub.f32 1.0, %v8262_v24  ;;  %v1603_v14 = vmul.f32 %v8262_v24, %v9510_v47 }
 0x70d   :  { %8269 = vrcp.f32 %v1472_v55  ;;  %v1586_v1 = vadd.f32 %v1582_v15, %v1521_v61  ;;  %v8266_v10 = vpop.eup %8265  ;;  %v1593_v34 = vsub.f32 1.0, %v8264_v7  ;;  %v1601_v40 = vmul.f32 %v8264_v7, %v9512_v51 }
 0x70e   :  { %8271 = vtanh.f32 %v1585_v62  ;;  %v1596_v39 = vsub.f32 1.0, %v8266_v10  ;;  %v1604_v44 = vmul.f32 %v8266_v10, %v9516_v58 }
 0x70f   :  { %8273 = vtanh.f32 %v1588_v63 }
 0x710   :  { %8275 = vtanh.f32 %v1586_v1 }
 0x716   :  { %v8268_v0 = vpop.eup %8267 }
 0x717   :  { %v8270_v27 = vpop.eup %8269  ;;  %v1599_v23 = vmul.f32 %v8268_v0, %v1595_v26 }
 0x718   :  { %v8272_v35 = vpop.eup %8271  ;;  %v1594_v42 = vsub.f32 1.0, %v8270_v27  ;;  %v1602_v48 = vmul.f32 %v8270_v27, %v9518_v4 }
 0x719   :  { %v1597_v13 = vmul.f32 %v8272_v35, %v1593_v34  ;;  %v9592_v11 = vadd.f32 %v1603_v14, %v1599_v23  ;;  %v8274_v41 = vpop.eup %8273 }
 0x71a   :  { %v1600_v43 = vmul.f32 %v8274_v41, %v1596_v39  ;;  %v8276_v45 = vpop.eup %8275 }
 0x71b   :  { %v9594_v25 = vadd.f32 %v1601_v40, %v1597_v13  ;;  %v1598_v22 = vmul.f32 %v8276_v45, %v1594_v42 }
 0x71c   :  { %v9598_v50 = vadd.f32 %v1604_v44, %v1600_v43 }
 0x71d   :  { %v9600_v47 = vadd.f32 %v1602_v48, %v1598_v22 }
 0x71e   :  { %v1610_v53 = vpack.c.bf16 %v9598_v50, %v9592_v11 }
 0x71f   :  { %v1609_v51 = vpack.c.bf16 %v9600_v47, %v9594_v25 }
 0x721   :  { %7332 = vmatprep.mubr.msk.bf16.mxu0 %vm470_vm0, %v1609_v51 }
 0x722   :  { %7333 = vmatmul.mubr.msk.bf16.vlgmr.msra.gmra.mrb[24].mxu0 %vm470_vm0, %v1610_v53 }
 0x723   :  { %7345 = vmatpush3.bf16.msra.mxu0 %v9399_v9 }
 0x724   :  { %7346 = vmatprep.subr.bf16.mxu0 %v9411_v18 }
 0x727   :  { %7347 = vmatpush3.bf16.msra.mxu0 %v9411_v18 }
 0x728   :  { %7352 = vmatprep.subr.bf16.mxu0 %v9419_v20 }
 0x7f5   :  { %v7334_v58 = vpop.f32.mrb[24].mxu0 }
 0x7f6   :  { %v1663_v4 = vpop.f32.mrb[25].mxu0 }
 0x7f7   :  { %v7335_v54 = vpop.f32.mrb[26].mxu0 }
 0x7f8   :  { %v1679_v55 = vpack.c.bf16 %v7335_v54, %v7334_v58  ;;  %v1666_v56 = vpop.f32.mrb[27].mxu0 }
 0x7f9   :  { %v1678_v57 = vpack.c.bf16 %v1666_v56, %v1663_v4 }
 0x7fb   :  { %7336 = vmatprep.subr.bf16.mxu1 %v1678_v57 }
 0x7fc   :  { %7337 = vmatpush3.bf16.msra.mxu1 %v1678_v57 }
 0x7fd   :  { %7338 = vmatprep.subr.bf16.mxu1 %v1679_v55 }
 0x800   :  { %7339 = vmatpush3.bf16.msra.mxu1 %v1679_v55 }
 0x801   :  { %7360 = vmatprep.subr.bf16.mxu1 %v9403_v16 }
 0x803   :  { %7341 = vmatmul.mubr.msk.bf16.vlgmr.msra.gmra.mrb[24].mxu1 %vm470_vm0, %v9405_v17  ;;  %v8158_v17 = vld [vmem:[#allocation7 + $0x38] sm:$0xff]  }
 0x804   :  { %7361 = vmatpush3.bf16.msra.mxu1 %v9403_v16  ;;  %v8157_v16 = vld [vmem:[#allocation7 + $0x30] sm:$0xff]  }
 0x805   :  { %7362 = vmatprep.subr.bf16.mxu1 %v9413_v19 }
 0x808   :  { %7363 = vmatpush3.bf16.msra.mxu1 %v9413_v19 }
 0x809   :  { %7368 = vmatprep.subr.bf16.mxu1 %v9421_v21 }
 0x8d6   :  { %v7342_v18 = vpop.f32.mrb[24].mxu1 }
 0x8d7   :  { %v1714_v2 = vpop.f32.mrb[25].mxu1 }
 0x8d8   :  { %v7343_v3 = vpop.f32.mrb[26].mxu1 }
 0x8d9   :  { %v1730_v6 = vpack.c.bf16 %v7343_v3, %v7342_v18  ;;  %v1717_v60 = vpop.f32.mrb[27].mxu1 }
 0x8da   :  { %v1729_v62 = vpack.c.bf16 %v1717_v60, %v1714_v2 }
 0x8dc   :  { %7348 = vmatprep.mubr.msk.bf16.mxu0 %vm470_vm0, %v1729_v62  ;;  %7364 = vmatprep.mubr.msk.bf16.mxu1 %vm470_vm0, %v1729_v62 }
 0x8dd   :  { %7349 = vmatmul.mubr.msk.bf16.vlgmr.msra.gmra.mrb[28].mxu0 %vm470_vm0, %v1730_v6  ;;  %7365 = vmatmul.mubr.msk.bf16.vlgmr.msra.gmra.mrb[28].mxu1 %vm470_vm0, %v1730_v6 }
 0x8de   :  { %7356 = vmatprep.mubr.msk.bf16.mxu0 %vm470_vm0, %v1609_v51  ;;  %7372 = vmatprep.mubr.msk.bf16.mxu1 %vm470_vm0, %v1609_v51 }
 0x8df   :  { %7353 = vmatpush3.bf16.msra.mxu0 %v9419_v20  ;;  %7369 = vmatpush3.bf16.msra.mxu1 %v9421_v21 }
 0x8e0   :  { %7354 = vmatprep.subr.bf16.mxu0 %v9425_v28  ;;  %7370 = vmatprep.subr.bf16.mxu1 %v9427_v29 }
 0x8e3   :  { %7355 = vmatpush3.bf16.msra.mxu0 %v9425_v28  ;;  %7371 = vmatpush3.bf16.msra.mxu1 %v9427_v29 }
 0x8e4   :  { %7376 = vmatprep.subr.bf16.mxu0 %v9437_v30  ;;  %7384 = vmatprep.subr.bf16.mxu1 %v9439_v31 }
 0x8e9   :  { %7357 = vmatmul.mubr.msk.bf16.vlgmr.msra.gmra.mrb[28].mxu0 %vm470_vm0, %v1610_v53  ;;  %7373 = vmatmul.mubr.msk.bf16.vlgmr.msra.gmra.mrb[28].mxu1 %vm470_vm0, %v1610_v53 }
 0x8ea   :  { %7377 = vmatpush3.bf16.msra.mxu0 %v9437_v30  ;;  %7380 = vmatprep.mubr.msk.bf16.mxu0 %vm470_vm0, %v1729_v62 }
 0x8eb   :  { %7385 = vmatpush3.bf16.msra.mxu1 %v9439_v31  ;;  %7388 = vmatprep.mubr.msk.bf16.mxu1 %vm470_vm0, %v1609_v51 }
 0x8ec   :  { %7378 = vmatprep.subr.bf16.mxu0 %v9449_v32  ;;  %7386 = vmatprep.subr.bf16.mxu1 %v9451_v33 }
 0x8ee   :  { %7379 = vmatpush3.bf16.msra.mxu0 %v9449_v32 }
 0x8ef   :  { %7387 = vmatpush3.bf16.msra.mxu1 %v9451_v33  ;;  %7392 = vmatprep.subr.bf16.mxu0 %v8157_v16 }
 0x8f1   :  { %7381 = vmatmul.mubr.msk.bf16.vlgmr.msra.gmra.mrb[32].mxu0 %vm470_vm0, %v1730_v6 }
 0x8f2   :  { %7389 = vmatmul.mubr.msk.bf16.vlgmr.msra.gmra.mrb[32].mxu1 %vm470_vm0, %v1610_v53  ;;  %7393 = vmatpush3.bf16.msra.mxu0 %v8157_v16 }
 0x8f3   :  { %7404 = vmatprep.mubr.msk.bf16.mxu1 %vm470_vm0, %v9395_v8  ;;  %7394 = vmatprep.subr.bf16.mxu0 %v8158_v17 }
 0x8f6   :  { %7395 = vmatpush3.bf16.msra.mxu0 %v8158_v17 }
 0x8f7   :  { %7408 = vmatprep.subr.bf16.mxu0 %v9399_v9 }
 0x9bc   :  { %v7358_v19 = vpop.f32.mrb[28].mxu0  ;;  %v7374_v20 = vpop.f32.mrb[28].mxu1 }
 0x9bd   :  { %v7957_v21 = vadd.f32 %v7358_v19, %v9472_v36  ;;  %v1820_v28 = vpop.f32.mrb[29].mxu0  ;;  %v1950_v29 = vpop.f32.mrb[29].mxu1  ;;  %v7961_v30 = vadd.f32 %v7374_v20, %v9474_v37 }
 0x9be   :  { %v7958_v31 = vadd.f32 %v9472_v36, %v1820_v28  ;;  %v7359_v32 = vpop.f32.mrb[30].mxu0  ;;  %v7375_v8 = vpop.f32.mrb[30].mxu1  ;;  %v7962_v63 = vadd.f32 %v9474_v37, %v1950_v29 }
 0x9bf   :  { %v1841_v33 = vadd.f32 %v7957_v21, %v9476_v38  ;;  %v7959_v5 = vadd.f32 %v7359_v32, %v9472_v36  ;;  %v1823_v59 = vpop.f32.mrb[31].mxu0  ;;  %v1953_v12 = vpop.f32.mrb[31].mxu1  ;;  %v7963_v24 = vadd.f32 %v7375_v8, %v9474_v37  ;;  %v1971_v7 = vadd.f32 %v7961_v30, %v9482_v49 }
 0x9c0   :  { %v1839_v9 = vadd.f32 %v7958_v31, %v9476_v38  ;;  %v7960_v61 = vadd.f32 %v9472_v36, %v1823_v59  ;;  %v7964_v27 = vadd.f32 %v9474_v37, %v1953_v12  ;;  %v1969_v34 = vadd.f32 %v7962_v63, %v9482_v49 }
 0x9c1   :  { %v6630_v15 = vmul.f32 -1.442695, %v1841_v33  ;;  %v1842_v1 = vadd.f32 %v7959_v5, %v9476_v38  ;;  %v1972_v36 = vadd.f32 %v7963_v24, %v9482_v49  ;;  %v6638_v13 = vmul.f32 -1.442695, %v1971_v7 }
 0x9c2   :  { %v6628_v10 = vmul.f32 -1.442695, %v1839_v9  ;;  %v1840_v26 = vadd.f32 %v7960_v61, %v9476_v38  ;;  %v1970_v42 = vadd.f32 %v7964_v27, %v9482_v49  ;;  %v6636_v44 = vmul.f32 -1.442695, %v1969_v34 }
 0x9c3   :  { %8277 = vpow2.f32 %v6630_v15  ;;  %v6631_v0 = vmul.f32 -1.442695, %v1842_v1  ;;  %v6639_v37 = vmul.f32 -1.442695, %v1972_v36 }
 0x9c4   :  { %v7382_v23 = vpop.f32.mrb[32].mxu0  ;;  %8279 = vpow2.f32 %v6628_v10  ;;  %v6629_v14 = vmul.f32 -1.442695, %v1840_v26  ;;  %v6637_v22 = vmul.f32 -1.442695, %v1970_v42 }
 0x9c5   :  { %v7390_v35 = vpop.f32.mrb[32].mxu1  ;;  %v2031_v39 = vpop.f32.mrb[33].mxu0  ;;  %8281 = vpow2.f32 %v6631_v0  ;;  %v2040_v17 = vadd.f32 %v7382_v23, %v9499_v52 }
 0x9c6   :  { %v2080_v40 = vpop.f32.mrb[33].mxu1  ;;  %v7383_v41 = vpop.f32.mrb[34].mxu0  ;;  %8283 = vpow2.f32 %v6629_v14  ;;  %v2089_v60 = vadd.f32 %v7390_v35, %v9496_v46  ;;  %v2032_v29 = vadd.f32 %v9499_v52, %v2031_v39 }
 0x9c7   :  { %v7391_v38 = vpop.f32.mrb[34].mxu1  ;;  %v2034_v43 = vpop.f32.mrb[35].mxu0  ;;  %8285 = vpow2.f32 %v6638_v13  ;;  %v2081_v20 = vadd.f32 %v9496_v46, %v2080_v40  ;;  %v2043_v33 = vadd.f32 %v7383_v41, %v9499_v52 }
 0x9c8   :  { %v2083_v45 = vpop.f32.mrb[35].mxu1  ;;  %8287 = vpow2.f32 %v6636_v44  ;;  %v2092_v32 = vadd.f32 %v7391_v38, %v9496_v46  ;;  %v2035_v61 = vadd.f32 %v9499_v52, %v2034_v43 }
 0x9c9   :  { %8289 = vpow2.f32 %v6639_v37  ;;  %v2084_v12 = vadd.f32 %v9496_v46, %v2083_v45 }
 0x9ca   :  { %8291 = vpow2.f32 %v6637_v22 }
 0x9cd   :  { %v8278_v48 = vpop.eup %8277 }
 0x9ce   :  { %v1857_v51 = vadd.f32 1.0, %v8278_v48  ;;  %v8280_v53 = vpop.eup %8279  ;;  %v9700_v48 = vld [vmem:[#allocation10] sm:$0xff]  }
 0x9cf   :  { %v1855_v58 = vadd.f32 1.0, %v8280_v53  ;;  %v8282_v4 = vpop.eup %8281 }
 0x9d0   :  { %8293 = vrcp.f32 %v1857_v51  ;;  %v1858_v54 = vadd.f32 1.0, %v8282_v4  ;;  %v8284_v49 = vpop.eup %8283 }
 0x9d1   :  { %8295 = vrcp.f32 %v1855_v58  ;;  %v8286_v55 = vpop.eup %8285  ;;  %v1856_v56 = vadd.f32 1.0, %v8284_v49 }
 0x9d2   :  { %8297 = vrcp.f32 %v1858_v54  ;;  %v8288_v57 = vpop.eup %8287  ;;  %v1987_v2 = vadd.f32 1.0, %v8286_v55  ;;  %v9703_v55 = vld [vmem:[#allocation8 + $0x10] sm:$0xff]  }
 0x9d3   :  { %8299 = vrcp.f32 %v1856_v56  ;;  %v8290_v18 = vpop.eup %8289  ;;  %v1985_v6 = vadd.f32 1.0, %v8288_v57  ;;  %v9706_v56 = vld [vmem:[#allocation2 + $0x8] sm:$0xff]  }
 0x9d4   :  { %v8292_v3 = vpop.eup %8291  ;;  %v1988_v16 = vadd.f32 1.0, %v8290_v18  ;;  %8301 = vrcp.f32 %v1987_v2  ;;  %v9711_v57 = vld [vmem:[#allocation8 + $0x18] sm:$0xff]   ;;  %v9715_v18 = vld [vmem:[#allocation10 + $0x10] sm:$0xff]  }
 0x9d5   :  { %v1986_v28 = vadd.f32 1.0, %v8292_v3  ;;  %8303 = vrcp.f32 %v1985_v6 }
 0x9d6   :  { %8305 = vrcp.f32 %v1988_v16 }
 0x9da   :  { %v8294_v62 = vpop.eup %8293 }
 0x9db   :  { %v2097_v19 = vmul.f32 %v8294_v62, %v2089_v60  ;;  %v8296_v21 = vpop.eup %8295 }
 0x9dc   :  { %v2095_v31 = vmul.f32 %v8296_v21, %v2081_v20  ;;  %v8298_v8 = vpop.eup %8297  ;;  %v9734_v20 = vld [vmem:[#allocation8 + $0x20] sm:$0xff]   ;;  %v9737_v21 = vld [vmem:[#allocation10 + $0x20] sm:$0xff]  }
 0x9dd   :  { %v2101_v30 = vadd.f32 %v2097_v19, %v2040_v17  ;;  %v2098_v59 = vmul.f32 %v8298_v8, %v2092_v32  ;;  %v8300_v9 = vpop.eup %8299  ;;  %v9726_v17 = vld [vmem:[#allocation10 + $0x8] sm:$0xff]   ;;  %v9729_v19 = vld [vmem:[#allocation10 + $0x18] sm:$0xff]  }
 0x9de   :  { %v2099_v5 = vadd.f32 %v2095_v31, %v2032_v29  ;;  %v2096_v15 = vmul.f32 %v8300_v9, %v2084_v12  ;;  %v8302_v24 = vpop.eup %8301  ;;  %v9751_v29 = vld [vmem:[#allocation10 + $0x28] sm:$0xff]   ;;  %v8159_v31 = vld [vmem:[#allocation7 + $0x40] sm:$0xff]   ;;  %v8160_v32 = vld [vmem:[#allocation7 + $0x48] sm:$0xff]  }
 0x9df   :  { %8307 = vtanh.f32 %v2101_v30  ;;  %v2102_v63 = vadd.f32 %v2098_v59, %v2043_v33  ;;  %v8304_v7 = vpop.eup %8303  ;;  %v2109_v26 = vsub.f32 1.0, %v8302_v24  ;;  %v2117_v46 = vmul.f32 %v8302_v24, %v9592_v11  ;;  %v9759_v30 = vld [vmem:[#allocation2] sm:$0xff]  }
 0x9e0   :  { %8309 = vrcp.f32 %v1986_v28  ;;  %v2100_v1 = vadd.f32 %v2096_v15, %v2035_v61  ;;  %v8306_v10 = vpop.eup %8305  ;;  %v2107_v34 = vsub.f32 1.0, %v8304_v7  ;;  %v2115_v39 = vmul.f32 %v8304_v7, %v9594_v25  ;;  %v9748_v28 = vld [vmem:[#allocation8 + $0x28] sm:$0xff]   ;;  %v9771_v7 = vld [vmem:[#allocation13] ss:$0 sm:$0xff] }
 0x9e1   :  { %8311 = vtanh.f32 %v2099_v5  ;;  %v2110_v14 = vsub.f32 1.0, %v8306_v10  ;;  %v2118_v38 = vmul.f32 %v8306_v10, %v9598_v50  ;;  %v9693_v50 = vld [vmem:[#allocation8] sm:$0xff]  }
 0x9e2   :  { %8313 = vtanh.f32 %v2102_v63  ;;  %v9764_v5 = vld [vmem:[#allocation11] ss:$0 sm:$0xff]  ;;  %v9767_v63 = vld [vmem:[#allocation11 + $0x1] ss:$0 sm:$0xff] }
 0x9e3   :  { %8315 = vtanh.f32 %v2100_v1 }
 0x9e9   :  { %v8308_v0 = vpop.eup %8307 }
 0x9ea   :  { %v8310_v27 = vpop.eup %8309  ;;  %v2113_v23 = vmul.f32 %v8308_v0, %v2109_v26 }
 0x9eb   :  { %v8312_v36 = vpop.eup %8311  ;;  %v2108_v40 = vsub.f32 1.0, %v8310_v27  ;;  %v2116_v45 = vmul.f32 %v8310_v27, %v9600_v47  ;;  %v9696_v47 = vld [vmem:[#allocation8 + $0x8] sm:$0xff]  }
 0x9ec   :  { %v2111_v35 = vmul.f32 %v8312_v36, %v2107_v34  ;;  %v9674_v52 = vadd.f32 %v2117_v46, %v2113_v23  ;;  %v8314_v13 = vpop.eup %8313 }
 0x9ed   :  { %v2114_v42 = vmul.f32 %v8314_v13, %v2110_v14  ;;  %v8316_v43 = vpop.eup %8315 }
 0x9ee   :  { %v9676_v41 = vadd.f32 %v2115_v39, %v2111_v35  ;;  %v2112_v44 = vmul.f32 %v8316_v43, %v2108_v40  ;;  %v9780_v39 = vld [vmem:[#allocation13 + $0x1] ss:$0 sm:$0xff] }
 0x9ef   :  { %v9680_v37 = vadd.f32 %v2118_v38, %v2114_v42 }
 0x9f0   :  { %v9682_v11 = vadd.f32 %v2116_v45, %v2112_v44 }
 0x9f1   :  { %v9688_v22 = vpack.c.bf16 %v9680_v37, %v9674_v52 }
 0x9f2   :  { %v2123_v25 = vpack.c.bf16 %v9682_v11, %v9676_v41 }
 0x9f4   :  { %7396 = vmatprep.mubr.msk.bf16.mxu0 %vm470_vm0, %v2123_v25 }
 0x9f5   :  { %7397 = vmatmul.mubr.msk.bf16.vlgmr.msra.gmra.mrb[36].mxu0 %vm470_vm0, %v9688_v22 }
 0x9f6   :  { %7409 = vmatpush3.bf16.msra.mxu0 %v9693_v50 }
 0x9f7   :  { %7410 = vmatprep.subr.bf16.mxu0 %v9696_v47 }
 0x9fa   :  { %7411 = vmatpush3.bf16.msra.mxu0 %v9696_v47 }
 0x9fb   :  { %7416 = vmatprep.subr.bf16.mxu0 %v9700_v48 }
 0xac8   :  { %v7398_v51 = vpop.f32.mrb[36].mxu0 }
 0xac9   :  { %v2177_v53 = vpop.f32.mrb[37].mxu0 }
 0xaca   :  { %v7399_v58 = vpop.f32.mrb[38].mxu0 }
 0xacb   :  { %v2193_v4 = vpack.c.bf16 %v7399_v58, %v7398_v51  ;;  %v2180_v54 = vpop.f32.mrb[39].mxu0 }
 0xacc   :  { %v2192_v49 = vpack.c.bf16 %v2180_v54, %v2177_v53 }
 0xace   :  { %7400 = vmatprep.subr.bf16.mxu1 %v2192_v49 }
 0xacf   :  { %7401 = vmatpush3.bf16.msra.mxu1 %v2192_v49 }
 0xad0   :  { %7402 = vmatprep.subr.bf16.mxu1 %v2193_v4 }
 0xad3   :  { %7403 = vmatpush3.bf16.msra.mxu1 %v2193_v4 }
 0xad4   :  { %7424 = vmatprep.subr.bf16.mxu1 %v9703_v55 }
 0xad6   :  { %7405 = vmatmul.mubr.msk.bf16.vlgmr.msra.gmra.mrb[36].mxu1 %vm470_vm0, %v9706_v56 }
 0xad7   :  { %7425 = vmatpush3.bf16.msra.mxu1 %v9703_v55 }
 0xad8   :  { %7426 = vmatprep.subr.bf16.mxu1 %v9711_v57 }
 0xadb   :  { %7427 = vmatpush3.bf16.msra.mxu1 %v9711_v57 }
 0xadc   :  { %7432 = vmatprep.subr.bf16.mxu1 %v9715_v18 }
 0xba9   :  { %v7406_v2 = vpop.f32.mrb[36].mxu1 }
 0xbaa   :  { %v2228_v3 = vpop.f32.mrb[37].mxu1 }
 0xbab   :  { %v7407_v6 = vpop.f32.mrb[38].mxu1 }
 0xbac   :  { %v2244_v60 = vpack.c.bf16 %v7407_v6, %v7406_v2  ;;  %v2231_v62 = vpop.f32.mrb[39].mxu1 }
 0xbad   :  { %v2243_v16 = vpack.c.bf16 %v2231_v62, %v2228_v3 }
 0xbaf   :  { %7412 = vmatprep.mubr.msk.bf16.mxu0 %vm470_vm0, %v2243_v16  ;;  %7428 = vmatprep.mubr.msk.bf16.mxu1 %vm470_vm0, %v2243_v16 }
 0xbb0   :  { %7413 = vmatmul.mubr.msk.bf16.vlgmr.msra.gmra.mrb[40].mxu0 %vm470_vm0, %v2244_v60  ;;  %7429 = vmatmul.mubr.msk.bf16.vlgmr.msra.gmra.mrb[40].mxu1 %vm470_vm0, %v2244_v60 }
 0xbb1   :  { %7420 = vmatprep.mubr.msk.bf16.mxu0 %vm470_vm0, %v2123_v25  ;;  %7436 = vmatprep.mubr.msk.bf16.mxu1 %vm470_vm0, %v2123_v25 }
 0xbb2   :  { %7417 = vmatpush3.bf16.msra.mxu0 %v9700_v48  ;;  %7433 = vmatpush3.bf16.msra.mxu1 %v9715_v18 }
 0xbb3   :  { %7418 = vmatprep.subr.bf16.mxu0 %v9726_v17  ;;  %7434 = vmatprep.subr.bf16.mxu1 %v9729_v19 }
 0xbb6   :  { %7419 = vmatpush3.bf16.msra.mxu0 %v9726_v17  ;;  %7435 = vmatpush3.bf16.msra.mxu1 %v9729_v19 }
 0xbb7   :  { %7440 = vmatprep.subr.bf16.mxu0 %v9734_v20  ;;  %7448 = vmatprep.subr.bf16.mxu1 %v9737_v21 }
 0xbbc   :  { %7421 = vmatmul.mubr.msk.bf16.vlgmr.msra.gmra.mrb[40].mxu0 %vm470_vm0, %v9688_v22  ;;  %7437 = vmatmul.mubr.msk.bf16.vlgmr.msra.gmra.mrb[40].mxu1 %vm470_vm0, %v9688_v22 }
 0xbbd   :  { %7441 = vmatpush3.bf16.msra.mxu0 %v9734_v20  ;;  %7444 = vmatprep.mubr.msk.bf16.mxu0 %vm470_vm0, %v2243_v16 }
 0xbbe   :  { %7449 = vmatpush3.bf16.msra.mxu1 %v9737_v21  ;;  %7452 = vmatprep.mubr.msk.bf16.mxu1 %vm470_vm0, %v2123_v25 }
 0xbbf   :  { %7442 = vmatprep.subr.bf16.mxu0 %v9748_v28  ;;  %7450 = vmatprep.subr.bf16.mxu1 %v9751_v29 }
 0xbc1   :  { %7443 = vmatpush3.bf16.msra.mxu0 %v9748_v28 }
 0xbc2   :  { %7451 = vmatpush3.bf16.msra.mxu1 %v9751_v29  ;;  %7456 = vmatprep.subr.bf16.mxu0 %v8159_v31 }
 0xbc4   :  { %7445 = vmatmul.mubr.msk.bf16.vlgmr.msra.gmra.mrb[44].mxu0 %vm470_vm0, %v2244_v60 }
 0xbc5   :  { %7453 = vmatmul.mubr.msk.bf16.vlgmr.msra.gmra.mrb[44].mxu1 %vm470_vm0, %v9688_v22  ;;  %7457 = vmatpush3.bf16.msra.mxu0 %v8159_v31 }
 0xbc6   :  { %7468 = vmatprep.mubr.msk.bf16.mxu1 %vm470_vm0, %v9759_v30  ;;  %7458 = vmatprep.subr.bf16.mxu0 %v8160_v32 }
 0xbc9   :  { %7459 = vmatpush3.bf16.msra.mxu0 %v8160_v32 }
 0xbca   :  { %7472 = vmatprep.subr.bf16.mxu0 %v9693_v50 }
 0xc8f   :  { %v7422_v8 = vpop.f32.mrb[40].mxu0  ;;  %v7438_v33 = vpop.f32.mrb[40].mxu1 }
 0xc90   :  { %v7965_v59 = vadd.f32 %v9764_v5, %v7422_v8  ;;  %v2334_v12 = vpop.f32.mrb[41].mxu0  ;;  %v2464_v9 = vpop.f32.mrb[41].mxu1  ;;  %v7969_v61 = vadd.f32 %v9767_v63, %v7438_v33 }
 0xc91   :  { %v7966_v15 = vadd.f32 %v9764_v5, %v2334_v12  ;;  %v7423_v1 = vpop.f32.mrb[42].mxu0  ;;  %v7439_v24 = vpop.f32.mrb[42].mxu1  ;;  %v7970_v23 = vadd.f32 %v9767_v63, %v2464_v9 }
 0xc92   :  { %v2355_v10 = vadd.f32 %v9771_v7, %v7965_v59  ;;  %v7967_v26 = vadd.f32 %v9764_v5, %v7423_v1  ;;  %v2337_v0 = vpop.f32.mrb[43].mxu0  ;;  %v2467_v27 = vpop.f32.mrb[43].mxu1  ;;  %v7971_v35 = vadd.f32 %v9767_v63, %v7439_v24  ;;  %v2485_v13 = vadd.f32 %v9780_v39, %v7969_v61 }
 0xc93   :  { %v2353_v34 = vadd.f32 %v9771_v7, %v7966_v15  ;;  %v7968_v46 = vadd.f32 %v9764_v5, %v2337_v0  ;;  %v7972_v43 = vadd.f32 %v9767_v63, %v2467_v27  ;;  %v2483_v44 = vadd.f32 %v9780_v39, %v7970_v23  ;;  %v9788_v27 = vld [vmem:[#allocation13 + $0x2] ss:$0 sm:$0xff] }
 0xc94   :  { %v6656_v36 = vmul.f32 -1.442695, %v2355_v10  ;;  %v2356_v14 = vadd.f32 %v9771_v7, %v7967_v26  ;;  %v2486_v25 = vadd.f32 %v9780_v39, %v7971_v35  ;;  %v6664_v58 = vmul.f32 -1.442695, %v2485_v13 }
 0xc95   :  { %v6654_v40 = vmul.f32 -1.442695, %v2353_v34  ;;  %v2354_v42 = vadd.f32 %v9771_v7, %v7968_v46  ;;  %v2484_v49 = vadd.f32 %v9780_v39, %v7972_v43  ;;  %v6662_v6 = vmul.f32 -1.442695, %v2483_v44 }
 0xc96   :  { %8317 = vpow2.f32 %v6656_v36  ;;  %v6657_v38 = vmul.f32 -1.442695, %v2356_v14  ;;  %v6665_v62 = vmul.f32 -1.442695, %v2486_v25  ;;  %v9791_v36 = vld [vmem:[#allocation11 + $0x2] ss:$0 sm:$0xff] }
 0xc97   :  { %v7446_v45 = vpop.f32.mrb[44].mxu0  ;;  %8319 = vpow2.f32 %v6654_v40  ;;  %v6655_v22 = vmul.f32 -1.442695, %v2354_v42  ;;  %v6663_v16 = vmul.f32 -1.442695, %v2484_v49 }
 0xc98   :  { %v7454_v51 = vpop.f32.mrb[44].mxu1  ;;  %v2545_v53 = vpop.f32.mrb[45].mxu0  ;;  %8321 = vpow2.f32 %v6657_v38  ;;  %v2554_v14 = vadd.f32 %v9791_v36, %v7446_v45 }
 0xc99   :  { %v2594_v4 = vpop.f32.mrb[45].mxu1  ;;  %v7447_v54 = vpop.f32.mrb[46].mxu0  ;;  %8323 = vpow2.f32 %v6655_v22  ;;  %v2603_v34 = vadd.f32 %v9788_v27, %v7454_v51  ;;  %v2546_v38 = vadd.f32 %v9791_v36, %v2545_v53 }
 0xc9a   :  { %v7455_v2 = vpop.f32.mrb[46].mxu1  ;;  %v2548_v3 = vpop.f32.mrb[47].mxu0  ;;  %8325 = vpow2.f32 %v6664_v58  ;;  %v2595_v13 = vadd.f32 %v9788_v27, %v2594_v4  ;;  %v2557_v51 = vadd.f32 %v9791_v36, %v7447_v54 }
 0xc9b   :  { %v2597_v60 = vpop.f32.mrb[47].mxu1  ;;  %8327 = vpow2.f32 %v6662_v6  ;;  %v2606_v25 = vadd.f32 %v9788_v27, %v7455_v2  ;;  %v2549_v53 = vadd.f32 %v9791_v36, %v2548_v3 }
 0xc9c   :  { %8329 = vpow2.f32 %v6665_v62  ;;  %v2598_v45 = vadd.f32 %v9788_v27, %v2597_v60 }
 0xc9d   :  { %8331 = vpow2.f32 %v6663_v16 }
 0xca0   :  { %v8318_v31 = vpop.eup %8317 }
 0xca1   :  { %v2371_v32 = vadd.f32 1.0, %v8318_v31  ;;  %v8320_v8 = vpop.eup %8319 }
 0xca2   :  { %v2369_v33 = vadd.f32 1.0, %v8320_v8  ;;  %v8322_v59 = vpop.eup %8321 }
 0xca3   :  { %8333 = vrcp.f32 %v2371_v32  ;;  %v2372_v12 = vadd.f32 1.0, %v8322_v59  ;;  %v8324_v9 = vpop.eup %8323 }
 0xca4   :  { %8335 = vrcp.f32 %v2369_v33  ;;  %v8326_v61 = vpop.eup %8325  ;;  %v2370_v15 = vadd.f32 1.0, %v8324_v9 }
 0xca5   :  { %8337 = vrcp.f32 %v2372_v12  ;;  %v8328_v1 = vpop.eup %8327  ;;  %v2501_v10 = vadd.f32 1.0, %v8326_v61 }
 0xca6   :  { %8339 = vrcp.f32 %v2370_v15  ;;  %v8330_v24 = vpop.eup %8329  ;;  %v2499_v0 = vadd.f32 1.0, %v8328_v1 }
 0xca7   :  { %v8332_v26 = vpop.eup %8331  ;;  %v2502_v46 = vadd.f32 1.0, %v8330_v24  ;;  %8341 = vrcp.f32 %v2501_v10 }
 0xca8   :  { %v2500_v42 = vadd.f32 1.0, %v8332_v26  ;;  %8343 = vrcp.f32 %v2499_v0 }
 0xca9   :  { %8345 = vrcp.f32 %v2502_v46 }
 0xcad   :  { %v8334_v23 = vpop.eup %8333 }
 0xcae   :  { %v2611_v35 = vmul.f32 %v8334_v23, %v2603_v34  ;;  %v8336_v40 = vpop.eup %8335 }
 0xcaf   :  { %v2609_v44 = vmul.f32 %v8336_v40, %v2595_v13  ;;  %v8338_v22 = vpop.eup %8337 }
 0xcb0   :  { %v2615_v43 = vadd.f32 %v2611_v35, %v2554_v14  ;;  %v2612_v49 = vmul.f32 %v8338_v22, %v2606_v25  ;;  %v8340_v6 = vpop.eup %8339 }
 0xcb1   :  { %v2613_v58 = vadd.f32 %v2609_v44, %v2546_v38  ;;  %v2610_v62 = vmul.f32 %v8340_v6, %v2598_v45  ;;  %v8342_v31 = vpop.eup %8341  ;;  %v8161_v45 = vld [vmem:[#allocation7 + $0x50] sm:$0xff]   ;;  %v8162_v6 = vld [vmem:[#allocation7 + $0x58] sm:$0xff]  }
 0xcb2   :  { %8347 = vtanh.f32 %v2615_v43  ;;  %v2616_v4 = vadd.f32 %v2612_v49, %v2557_v51  ;;  %v8344_v2 = vpop.eup %8343  ;;  %v2623_v8 = vsub.f32 1.0, %v8342_v31  ;;  %v2631_v60 = vmul.f32 %v8342_v31, %v9674_v52 }
 0xcb3   :  { %8349 = vrcp.f32 %v2500_v42  ;;  %v2614_v16 = vadd.f32 %v2610_v62, %v2549_v53  ;;  %v8346_v32 = vpop.eup %8345  ;;  %v2621_v59 = vsub.f32 1.0, %v8344_v2  ;;  %v2629_v1 = vmul.f32 %v8344_v2, %v9676_v41 }
 0xcb4   :  { %8351 = vtanh.f32 %v2613_v58  ;;  %v2624_v61 = vsub.f32 1.0, %v8346_v32  ;;  %v2632_v34 = vmul.f32 %v8346_v32, %v9680_v37 }
 0xcb5   :  { %8353 = vtanh.f32 %v2616_v4 }
 0xcb6   :  { %8355 = vtanh.f32 %v2614_v16 }
 0xcbc   :  { %v8348_v54 = vpop.eup %8347 }
 0xcbd   :  { %v8350_v33 = vpop.eup %8349  ;;  %v2627_v12 = vmul.f32 %v8348_v54, %v2623_v8 }
 0xcbe   :  { %v8352_v9 = vpop.eup %8351  ;;  %v2622_v10 = vsub.f32 1.0, %v8350_v33  ;;  %v2630_v14 = vmul.f32 %v8350_v33, %v9682_v11 }
 0xcbf   :  { %v2625_v15 = vmul.f32 %v8352_v9, %v2621_v59  ;;  %v9802_v3 = vadd.f32 %v2631_v60, %v2627_v12  ;;  %v8354_v24 = vpop.eup %8353 }
 0xcc0   :  { %v2628_v0 = vmul.f32 %v8354_v24, %v2624_v61  ;;  %v8356_v23 = vpop.eup %8355 }
 0xcc1   :  { %v9804_v26 = vadd.f32 %v2629_v1, %v2625_v15  ;;  %v2626_v46 = vmul.f32 %v8356_v23, %v2622_v10 }
 0xcc2   :  { %v9808_v35 = vadd.f32 %v2632_v34, %v2628_v0 }
 0xcc3   :  { %v9810_v52 = vadd.f32 %v2630_v14, %v2626_v46 }
 0xcc4   :  { %v2638_v13 = vpack.c.bf16 %v9808_v35, %v9802_v3 }
 0xcc5   :  { %v2637_v41 = vpack.c.bf16 %v9810_v52, %v9804_v26 }
 0xcc7   :  { %7460 = vmatprep.mubr.msk.bf16.mxu0 %vm470_vm0, %v2637_v41 }
 0xcc8   :  { %7461 = vmatmul.mubr.msk.bf16.vlgmr.msra.gmra.mrb[48].mxu0 %vm470_vm0, %v2638_v13 }
 0xcc9   :  { %7473 = vmatpush3.bf16.msra.mxu0 %v9693_v50 }
 0xcca   :  { %7474 = vmatprep.subr.bf16.mxu0 %v9696_v47 }
 0xccd   :  { %7475 = vmatpush3.bf16.msra.mxu0 %v9696_v47 }
 0xcce   :  { %7480 = vmatprep.subr.bf16.mxu0 %v9700_v48 }
 0xd9b   :  { %v7462_v37 = vpop.f32.mrb[48].mxu0 }
 0xd9c   :  { %v2691_v11 = vpop.f32.mrb[49].mxu0 }
 0xd9d   :  { %v7463_v40 = vpop.f32.mrb[50].mxu0 }
 0xd9e   :  { %v2707_v42 = vpack.c.bf16 %v7463_v40, %v7462_v37  ;;  %v2694_v38 = vpop.f32.mrb[51].mxu0 }
 0xd9f   :  { %v2706_v43 = vpack.c.bf16 %v2694_v38, %v2691_v11 }
 0xda1   :  { %7464 = vmatprep.subr.bf16.mxu1 %v2706_v43 }
 0xda2   :  { %7465 = vmatpush3.bf16.msra.mxu1 %v2706_v43 }
 0xda3   :  { %7466 = vmatprep.subr.bf16.mxu1 %v2707_v42 }
 0xda6   :  { %7467 = vmatpush3.bf16.msra.mxu1 %v2707_v42 }
 0xda7   :  { %7488 = vmatprep.subr.bf16.mxu1 %v9703_v55 }
 0xda9   :  { %7469 = vmatmul.mubr.msk.bf16.vlgmr.msra.gmra.mrb[48].mxu1 %vm470_vm0, %v9706_v56 }
 0xdaa   :  { %7489 = vmatpush3.bf16.msra.mxu1 %v9703_v55 }
 0xdab   :  { %7490 = vmatprep.subr.bf16.mxu1 %v9711_v57 }
 0xdae   :  { %7491 = vmatpush3.bf16.msra.mxu1 %v9711_v57 }
 0xdaf   :  { %7496 = vmatprep.subr.bf16.mxu1 %v9715_v18 }
 0xe7c   :  { %v7470_v44 = vpop.f32.mrb[48].mxu1 }
 0xe7d   :  { %v2742_v25 = vpop.f32.mrb[49].mxu1 }
 0xe7e   :  { %v7471_v22 = vpop.f32.mrb[50].mxu1 }
 0xe7f   :  { %v2758_v51 = vpack.c.bf16 %v7471_v22, %v7470_v44  ;;  %v2745_v58 = vpop.f32.mrb[51].mxu1 }
 0xe80   :  { %v2757_v49 = vpack.c.bf16 %v2745_v58, %v2742_v25 }
 0xe82   :  { %7476 = vmatprep.mubr.msk.bf16.mxu0 %vm470_vm0, %v2757_v49  ;;  %7492 = vmatprep.mubr.msk.bf16.mxu1 %vm470_vm0, %v2757_v49 }
 0xe83   :  { %7477 = vmatmul.mubr.msk.bf16.vlgmr.msra.gmra.mrb[52].mxu0 %vm470_vm0, %v2758_v51  ;;  %7493 = vmatmul.mubr.msk.bf16.vlgmr.msra.gmra.mrb[52].mxu1 %vm470_vm0, %v2758_v51 }
 0xe84   :  { %7484 = vmatprep.mubr.msk.bf16.mxu0 %vm470_vm0, %v2637_v41  ;;  %7500 = vmatprep.mubr.msk.bf16.mxu1 %vm470_vm0, %v2637_v41 }
 0xe85   :  { %7481 = vmatpush3.bf16.msra.mxu0 %v9700_v48  ;;  %7497 = vmatpush3.bf16.msra.mxu1 %v9715_v18 }
 0xe86   :  { %7482 = vmatprep.subr.bf16.mxu0 %v9726_v17  ;;  %7498 = vmatprep.subr.bf16.mxu1 %v9729_v19 }
 0xe89   :  { %7483 = vmatpush3.bf16.msra.mxu0 %v9726_v17  ;;  %7499 = vmatpush3.bf16.msra.mxu1 %v9729_v19 }
 0xe8a   :  { %7504 = vmatprep.subr.bf16.mxu0 %v9734_v20  ;;  %7512 = vmatprep.subr.bf16.mxu1 %v9737_v21 }
 0xe8f   :  { %7485 = vmatmul.mubr.msk.bf16.vlgmr.msra.gmra.mrb[52].mxu0 %vm470_vm0, %v2638_v13  ;;  %7501 = vmatmul.mubr.msk.bf16.vlgmr.msra.gmra.mrb[52].mxu1 %vm470_vm0, %v2638_v13 }
 0xe90   :  { %7505 = vmatpush3.bf16.msra.mxu0 %v9734_v20  ;;  %7508 = vmatprep.mubr.msk.bf16.mxu0 %vm470_vm0, %v2757_v49 }
 0xe91   :  { %7513 = vmatpush3.bf16.msra.mxu1 %v9737_v21  ;;  %7516 = vmatprep.mubr.msk.bf16.mxu1 %vm470_vm0, %v2637_v41 }
 0xe92   :  { %7506 = vmatprep.subr.bf16.mxu0 %v9748_v28  ;;  %7514 = vmatprep.subr.bf16.mxu1 %v9751_v29 }
 0xe94   :  { %7507 = vmatpush3.bf16.msra.mxu0 %v9748_v28 }
 0xe95   :  { %7515 = vmatpush3.bf16.msra.mxu1 %v9751_v29  ;;  %7520 = vmatprep.subr.bf16.mxu0 %v8161_v45 }
 0xe97   :  { %7509 = vmatmul.mubr.msk.bf16.vlgmr.msra.gmra.mrb[56].mxu0 %vm470_vm0, %v2758_v51 }
 0xe98   :  { %7517 = vmatmul.mubr.msk.bf16.vlgmr.msra.gmra.mrb[56].mxu1 %vm470_vm0, %v2638_v13  ;;  %7521 = vmatpush3.bf16.msra.mxu0 %v8161_v45 }
 0xe99   :  { %7532 = vmatprep.mubr.msk.bf16.mxu1 %vm470_vm0, %v9759_v30  ;;  %7522 = vmatprep.subr.bf16.mxu0 %v8162_v6 }
 0xe9c   :  { %7523 = vmatpush3.bf16.msra.mxu0 %v8162_v6 }
 0xe9d   :  { %7536 = vmatprep.subr.bf16.mxu0 %v9693_v50 }
 0xf62   :  { %v7486_v4 = vpop.f32.mrb[52].mxu0  ;;  %v7502_v53 = vpop.f32.mrb[52].mxu1 }
 0xf63   :  { %v7973_v62 = vadd.f32 %v9764_v5, %v7486_v4  ;;  %v2848_v16 = vpop.f32.mrb[53].mxu0  ;;  %v2978_v31 = vpop.f32.mrb[53].mxu1  ;;  %v7977_v2 = vadd.f32 %v9767_v63, %v7502_v53 }
 0xf64   :  { %v7974_v32 = vadd.f32 %v9764_v5, %v2848_v16  ;;  %v7487_v8 = vpop.f32.mrb[54].mxu0  ;;  %v7503_v54 = vpop.f32.mrb[54].mxu1  ;;  %v7978_v61 = vadd.f32 %v9767_v63, %v2978_v31 }
 0xf65   :  { %v2869_v33 = vadd.f32 %v9771_v7, %v7973_v62  ;;  %v7975_v59 = vadd.f32 %v9764_v5, %v7487_v8  ;;  %v2851_v12 = vpop.f32.mrb[55].mxu0  ;;  %v2981_v60 = vpop.f32.mrb[55].mxu1  ;;  %v7979_v10 = vadd.f32 %v9767_v63, %v7503_v54  ;;  %v2999_v0 = vadd.f32 %v9780_v39, %v7977_v2 }
 0xf66   :  { %v2867_v9 = vadd.f32 %v9771_v7, %v7974_v32  ;;  %v7976_v15 = vadd.f32 %v9764_v5, %v2851_v12  ;;  %v7980_v14 = vadd.f32 %v9767_v63, %v2981_v60  ;;  %v2997_v41 = vadd.f32 %v9780_v39, %v7978_v61 }
 0xf67   :  { %v6682_v1 = vmul.f32 -1.442695, %v2869_v33  ;;  %v2870_v24 = vadd.f32 %v9771_v7, %v7975_v59  ;;  %v3000_v37 = vadd.f32 %v9780_v39, %v7979_v10  ;;  %v6690_v38 = vmul.f32 -1.442695, %v2999_v0 }
 0xf68   :  { %v6680_v34 = vmul.f32 -1.442695, %v2867_v9  ;;  %v2868_v23 = vadd.f32 %v9771_v7, %v7976_v15  ;;  %v2998_v25 = vadd.f32 %v9780_v39, %v7980_v14  ;;  %v6688_v58 = vmul.f32 -1.442695, %v2997_v41 }
 0xf69   :  { %8357 = vpow2.f32 %v6682_v1  ;;  %v6683_v46 = vmul.f32 -1.442695, %v2870_v24  ;;  %v6691_v45 = vmul.f32 -1.442695, %v3000_v37 }
 0xf6a   :  { %v7510_v13 = vpop.f32.mrb[56].mxu0  ;;  %8359 = vpow2.f32 %v6680_v34  ;;  %v6681_v11 = vmul.f32 -1.442695, %v2868_v23  ;;  %v6689_v6 = vmul.f32 -1.442695, %v2998_v25 }
 0xf6b   :  { %v7518_v40 = vpop.f32.mrb[56].mxu1  ;;  %v3059_v42 = vpop.f32.mrb[57].mxu0  ;;  %8361 = vpow2.f32 %v6683_v46  ;;  %v3068_v24 = vadd.f32 %v9791_v36, %v7510_v13 }
 0xf6c   :  { %v3108_v43 = vpop.f32.mrb[57].mxu1  ;;  %v7511_v44 = vpop.f32.mrb[58].mxu0  ;;  %8363 = vpow2.f32 %v6681_v11  ;;  %v3117_v61 = vadd.f32 %v9788_v27, %v7518_v40  ;;  %v3060_v46 = vadd.f32 %v9791_v36, %v3059_v42 }
 0xf6d   :  { %v7519_v22 = vpop.f32.mrb[58].mxu1  ;;  %v3062_v51 = vpop.f32.mrb[59].mxu0  ;;  %8365 = vpow2.f32 %v6690_v38  ;;  %v3109_v0 = vadd.f32 %v9788_v27, %v3108_v43  ;;  %v3071_v40 = vadd.f32 %v9791_v36, %v7511_v44 }
 0xf6e   :  { %v3111_v49 = vpop.f32.mrb[59].mxu1  ;;  %8367 = vpow2.f32 %v6688_v58  ;;  %v3120_v37 = vadd.f32 %v9788_v27, %v7519_v22  ;;  %v3063_v42 = vadd.f32 %v9791_v36, %v3062_v51 }
 0xf6f   :  { %8369 = vpow2.f32 %v6691_v45  ;;  %v3112_v13 = vadd.f32 %v9788_v27, %v3111_v49 }
 0xf70   :  { %8371 = vpow2.f32 %v6689_v6 }
 0xf73   :  { %v8358_v4 = vpop.eup %8357 }
 0xf74   :  { %v2885_v53 = vadd.f32 1.0, %v8358_v4  ;;  %v8360_v62 = vpop.eup %8359 }
 0xf75   :  { %v2883_v16 = vadd.f32 1.0, %v8360_v62  ;;  %v8362_v31 = vpop.eup %8361 }
 0xf76   :  { %8373 = vrcp.f32 %v2885_v53  ;;  %v2886_v2 = vadd.f32 1.0, %v8362_v31  ;;  %v8364_v32 = vpop.eup %8363 }
 0xf77   :  { %8375 = vrcp.f32 %v2883_v16  ;;  %v8366_v8 = vpop.eup %8365  ;;  %v2884_v54 = vadd.f32 1.0, %v8364_v32 }
 0xf78   :  { %8377 = vrcp.f32 %v2886_v2  ;;  %v8368_v33 = vpop.eup %8367  ;;  %v3015_v12 = vadd.f32 1.0, %v8366_v8 }
 0xf79   :  { %8379 = vrcp.f32 %v2884_v54  ;;  %v8370_v59 = vpop.eup %8369  ;;  %v3013_v9 = vadd.f32 1.0, %v8368_v33 }
 0xf7a   :  { %v8372_v60 = vpop.eup %8371  ;;  %v3016_v1 = vadd.f32 1.0, %v8370_v59  ;;  %8381 = vrcp.f32 %v3015_v12 }
 0xf7b   :  { %v3014_v23 = vadd.f32 1.0, %v8372_v60  ;;  %8383 = vrcp.f32 %v3013_v9 }
 0xf7c   :  { %8385 = vrcp.f32 %v3016_v1 }
 0xf80   :  { %v8374_v15 = vpop.eup %8373 }
 0xf81   :  { %v3125_v10 = vmul.f32 %v8374_v15, %v3117_v61  ;;  %v8376_v34 = vpop.eup %8375 }
 0xf82   :  { %v3123_v41 = vmul.f32 %v8376_v34, %v3109_v0  ;;  %v8378_v11 = vpop.eup %8377 }
 0xf83   :  { %v3129_v14 = vadd.f32 %v3125_v10, %v3068_v24  ;;  %v3126_v25 = vmul.f32 %v8378_v11, %v3120_v37  ;;  %v8380_v58 = vpop.eup %8379 }
 0xf84   :  { %v3127_v38 = vadd.f32 %v3123_v41, %v3060_v46  ;;  %v3124_v45 = vmul.f32 %v8380_v58, %v3112_v13  ;;  %v8382_v4 = vpop.eup %8381 }
 0xf85   :  { %8387 = vtanh.f32 %v3129_v14  ;;  %v3130_v43 = vadd.f32 %v3126_v25, %v3071_v40  ;;  %v8384_v22 = vpop.eup %8383  ;;  %v3137_v62 = vsub.f32 1.0, %v8382_v4  ;;  %v3145_v49 = vmul.f32 %v8382_v4, %v9802_v3 }
 0xf86   :  { %8389 = vrcp.f32 %v3014_v23  ;;  %v3128_v6 = vadd.f32 %v3124_v45, %v3063_v42  ;;  %v8386_v53 = vpop.eup %8385  ;;  %v3135_v31 = vsub.f32 1.0, %v8384_v22  ;;  %v3143_v33 = vmul.f32 %v8384_v22, %v9804_v26 }
 0xf87   :  { %8391 = vtanh.f32 %v3127_v38  ;;  %v3138_v8 = vsub.f32 1.0, %v8386_v53  ;;  %v3146_v61 = vmul.f32 %v8386_v53, %v9808_v35 }
 0xf88   :  { %8393 = vtanh.f32 %v3130_v43 }
 0xf89   :  { %8395 = vtanh.f32 %v3128_v6 }
 0xf8f   :  { %v8388_v44 = vpop.eup %8387 }
 0xf90   :  { %v8390_v16 = vpop.eup %8389  ;;  %v3141_v2 = vmul.f32 %v8388_v44, %v3137_v62 }
 0xf91   :  { %v8392_v32 = vpop.eup %8391  ;;  %v3136_v12 = vsub.f32 1.0, %v8390_v16  ;;  %v3144_v24 = vmul.f32 %v8390_v16, %v9810_v52 }
 0xf92   :  { %v3139_v54 = vmul.f32 %v8392_v32, %v3135_v31  ;;  %v9884_v51 = vadd.f32 %v3145_v49, %v3141_v2  ;;  %v8394_v59 = vpop.eup %8393 }
 0xf93   :  { %v3142_v9 = vmul.f32 %v8394_v59, %v3138_v8  ;;  %v8396_v15 = vpop.eup %8395 }
 0xf94   :  { %v9886_v60 = vadd.f32 %v3143_v33, %v3139_v54  ;;  %v3140_v1 = vmul.f32 %v8396_v15, %v3136_v12 }
 0xf95   :  { %v9890_v10 = vadd.f32 %v3146_v61, %v3142_v9 }
 0xf96   :  { %v9892_v3 = vadd.f32 %v3144_v24, %v3140_v1 }
 0xf97   :  { %v3152_v0 = vpack.c.bf16 %v9890_v10, %v9884_v51 }
 0xf98   :  { %v3151_v26 = vpack.c.bf16 %v9892_v3, %v9886_v60 }
 0xf9a   :  { %7524 = vmatprep.mubr.msk.bf16.mxu0 %vm470_vm0, %v3151_v26 }
 0xf9b   :  { %7525 = vmatmul.mubr.msk.bf16.vlgmr.msra.gmra.mrb[60].mxu0 %vm470_vm0, %v3152_v0 }
 0xf9c   :  { %7537 = vmatpush3.bf16.msra.mxu0 %v9693_v50 }
 0xf9d   :  { %7538 = vmatprep.subr.bf16.mxu0 %v9696_v47 }
 0xfa0   :  { %7539 = vmatpush3.bf16.msra.mxu0 %v9696_v47 }
 0xfa1   :  { %7544 = vmatprep.subr.bf16.mxu0 %v9700_v48 }
0x106e   :  { %v7526_v35 = vpop.f32.mrb[60].mxu0 }
0x106f   :  { %v3205_v52 = vpop.f32.mrb[61].mxu0 }
0x1070   :  { %v7527_v34 = vpop.f32.mrb[62].mxu0 }
0x1071   :  { %v3221_v23 = vpack.c.bf16 %v7527_v34, %v7526_v35  ;;  %v3208_v46 = vpop.f32.mrb[63].mxu0 }
0x1072   :  { %v3220_v14 = vpack.c.bf16 %v3208_v46, %v3205_v52 }
0x1074   :  { %7528 = vmatprep.subr.bf16.mxu1 %v3220_v14 }
0x1075   :  { %7529 = vmatpush3.bf16.msra.mxu1 %v3220_v14 }
0x1076   :  { %7530 = vmatprep.subr.bf16.mxu1 %v3221_v23 }
0x1079   :  { %7531 = vmatpush3.bf16.msra.mxu1 %v3221_v23 }
0x107a   :  { %7552 = vmatprep.subr.bf16.mxu1 %v9703_v55 }
0x107c   :  { %7533 = vmatmul.mubr.msk.bf16.vlgmr.msra.gmra.mrb[60].mxu1 %vm470_vm0, %v9706_v56 }
0x107d   :  { %7553 = vmatpush3.bf16.msra.mxu1 %v9703_v55  ;;  %v8164_v55 = vld [vmem:[#allocation7 + $0x68] sm:$0xff]  }
0x107e   :  { %7554 = vmatprep.subr.bf16.mxu1 %v9711_v57 }
0x1081   :  { %7555 = vmatpush3.bf16.msra.mxu1 %v9711_v57 }
0x1082   :  { %7560 = vmatprep.subr.bf16.mxu1 %v9715_v18 }
0x114f   :  { %v7534_v47 = vpop.f32.mrb[60].mxu1 }
0x1150   :  { %v3256_v41 = vpop.f32.mrb[61].mxu1 }
0x1151   :  { %v7535_v37 = vpop.f32.mrb[62].mxu1 }
0x1152   :  { %v3272_v11 = vpack.c.bf16 %v7535_v37, %v7534_v47  ;;  %v3259_v40 = vpop.f32.mrb[63].mxu1 }
0x1153   :  { %v3271_v38 = vpack.c.bf16 %v3259_v40, %v3256_v41 }
0x1155   :  { %7540 = vmatprep.mubr.msk.bf16.mxu0 %vm470_vm0, %v3271_v38  ;;  %7556 = vmatprep.mubr.msk.bf16.mxu1 %vm470_vm0, %v3271_v38 }
0x1156   :  { %7541 = vmatmul.mubr.msk.bf16.vlgmr.msra.gmra.mrb[64].mxu0 %vm470_vm0, %v3272_v11  ;;  %7557 = vmatmul.mubr.msk.bf16.vlgmr.msra.gmra.mrb[64].mxu1 %vm470_vm0, %v3272_v11 }
0x1157   :  { %7548 = vmatprep.mubr.msk.bf16.mxu0 %vm470_vm0, %v3151_v26  ;;  %7564 = vmatprep.mubr.msk.bf16.mxu1 %vm470_vm0, %v3151_v26 }
0x1158   :  { %7545 = vmatpush3.bf16.msra.mxu0 %v9700_v48  ;;  %7561 = vmatpush3.bf16.msra.mxu1 %v9715_v18  ;;  %v8163_v48 = vld [vmem:[#allocation7 + $0x60] sm:$0xff]  }
0x1159   :  { %7546 = vmatprep.subr.bf16.mxu0 %v9726_v17  ;;  %7562 = vmatprep.subr.bf16.mxu1 %v9729_v19 }
0x115c   :  { %7547 = vmatpush3.bf16.msra.mxu0 %v9726_v17  ;;  %7563 = vmatpush3.bf16.msra.mxu1 %v9729_v19 }
0x115d   :  { %7568 = vmatprep.subr.bf16.mxu0 %v9734_v20  ;;  %7576 = vmatprep.subr.bf16.mxu1 %v9737_v21 }
0x1162   :  { %7549 = vmatmul.mubr.msk.bf16.vlgmr.msra.gmra.mrb[64].mxu0 %vm470_vm0, %v3152_v0  ;;  %7565 = vmatmul.mubr.msk.bf16.vlgmr.msra.gmra.mrb[64].mxu1 %vm470_vm0, %v3152_v0 }
0x1163   :  { %7569 = vmatpush3.bf16.msra.mxu0 %v9734_v20  ;;  %7572 = vmatprep.mubr.msk.bf16.mxu0 %vm470_vm0, %v3271_v38 }
0x1164   :  { %7577 = vmatpush3.bf16.msra.mxu1 %v9737_v21  ;;  %7580 = vmatprep.mubr.msk.bf16.mxu1 %vm470_vm0, %v3151_v26 }
0x1165   :  { %7570 = vmatprep.subr.bf16.mxu0 %v9748_v28  ;;  %7578 = vmatprep.subr.bf16.mxu1 %v9751_v29 }
0x1167   :  { %7571 = vmatpush3.bf16.msra.mxu0 %v9748_v28 }
0x1168   :  { %7579 = vmatpush3.bf16.msra.mxu1 %v9751_v29  ;;  %7584 = vmatprep.subr.bf16.mxu0 %v8163_v48 }
0x116a   :  { %7573 = vmatmul.mubr.msk.bf16.vlgmr.msra.gmra.mrb[68].mxu0 %vm470_vm0, %v3272_v11 }
0x116b   :  { %7581 = vmatmul.mubr.msk.bf16.vlgmr.msra.gmra.mrb[68].mxu1 %vm470_vm0, %v3152_v0  ;;  %7585 = vmatpush3.bf16.msra.mxu0 %v8163_v48 }
0x116c   :  { %7596 = vmatprep.mubr.msk.bf16.mxu1 %vm470_vm0, %v9759_v30  ;;  %7586 = vmatprep.subr.bf16.mxu0 %v8164_v55 }
0x116f   :  { %7587 = vmatpush3.bf16.msra.mxu0 %v8164_v55 }
0x1170   :  { %7600 = vmatprep.subr.bf16.mxu0 %v9693_v50 }
0x1235   :  { %v7550_v56 = vpop.f32.mrb[64].mxu0  ;;  %v7566_v57 = vpop.f32.mrb[64].mxu1 }
0x1236   :  { %v7981_v18 = vadd.f32 %v9764_v5, %v7550_v56  ;;  %v3362_v17 = vpop.f32.mrb[65].mxu0  ;;  %v3492_v19 = vpop.f32.mrb[65].mxu1  ;;  %v7985_v20 = vadd.f32 %v9767_v63, %v7566_v57 }
0x1237   :  { %v7982_v21 = vadd.f32 %v9764_v5, %v3362_v17  ;;  %v7551_v28 = vpop.f32.mrb[66].mxu0  ;;  %v7567_v29 = vpop.f32.mrb[66].mxu1  ;;  %v7986_v43 = vadd.f32 %v9767_v63, %v3492_v19 }
0x1238   :  { %v3383_v30 = vadd.f32 %v9771_v7, %v7981_v18  ;;  %v7983_v25 = vadd.f32 %v9764_v5, %v7551_v28  ;;  %v3365_v13 = vpop.f32.mrb[67].mxu0  ;;  %v3495_v58 = vpop.f32.mrb[67].mxu1  ;;  %v7987_v4 = vadd.f32 %v9767_v63, %v7567_v29  ;;  %v3513_v22 = vadd.f32 %v9780_v39, %v7985_v20 }
0x1239   :  { %v3381_v50 = vadd.f32 %v9771_v7, %v7982_v21  ;;  %v7984_v42 = vadd.f32 %v9764_v5, %v3365_v13  ;;  %v7988_v16 = vadd.f32 %v9767_v63, %v3495_v58  ;;  %v3511_v31 = vadd.f32 %v9780_v39, %v7986_v43 }
0x123a   :  { %v6708_v45 = vmul.f32 -1.442695, %v3383_v30  ;;  %v3384_v6 = vadd.f32 %v9771_v7, %v7983_v25  ;;  %v3514_v5 = vadd.f32 %v9780_v39, %v7987_v4  ;;  %v6716_v54 = vmul.f32 -1.442695, %v3513_v22 }
0x123b   :  { %v6706_v53 = vmul.f32 -1.442695, %v3381_v50  ;;  %v3382_v62 = vadd.f32 %v9771_v7, %v7984_v42  ;;  %v3512_v12 = vadd.f32 %v9780_v39, %v7988_v16  ;;  %v6714_v61 = vmul.f32 -1.442695, %v3511_v31 }
0x123c   :  { %8397 = vpow2.f32 %v6708_v45  ;;  %v6709_v44 = vmul.f32 -1.442695, %v3384_v6  ;;  %v6717_v63 = vmul.f32 -1.442695, %v3514_v5 }
0x123d   :  { %v7574_v2 = vpop.f32.mrb[68].mxu0  ;;  %8399 = vpow2.f32 %v6706_v53  ;;  %v6707_v49 = vmul.f32 -1.442695, %v3382_v62  ;;  %v6715_v1 = vmul.f32 -1.442695, %v3512_v12 }
0x123e   :  { %v7582_v32 = vpop.f32.mrb[68].mxu1  ;;  %v3573_v8 = vpop.f32.mrb[69].mxu0  ;;  %8401 = vpow2.f32 %v6709_v44  ;;  %v3582_v55 = vadd.f32 %v9791_v36, %v7574_v2 }
0x123f   :  { %v3622_v33 = vpop.f32.mrb[69].mxu1  ;;  %v7575_v59 = vpop.f32.mrb[70].mxu0  ;;  %8403 = vpow2.f32 %v6707_v49  ;;  %v3631_v40 = vadd.f32 %v9788_v27, %v7582_v32  ;;  %v3574_v19 = vadd.f32 %v9791_v36, %v3573_v8 }
0x1240   :  { %v7583_v7 = vpop.f32.mrb[70].mxu1  ;;  %v3576_v9 = vpop.f32.mrb[71].mxu0  ;;  %8405 = vpow2.f32 %v6716_v54  ;;  %v3623_v57 = vadd.f32 %v9788_v27, %v3622_v33  ;;  %v3585_v30 = vadd.f32 %v9791_v36, %v7575_v59 }
0x1241   :  { %v3625_v15 = vpop.f32.mrb[71].mxu1  ;;  %8407 = vpow2.f32 %v6714_v61  ;;  %v3634_v28 = vadd.f32 %v9788_v27, %v7583_v7  ;;  %v3577_v42 = vadd.f32 %v9791_v36, %v3576_v9 }
0x1242   :  { %8409 = vpow2.f32 %v6717_v63  ;;  %v3626_v58 = vadd.f32 %v9788_v27, %v3625_v15 }
0x1243   :  { %8411 = vpow2.f32 %v6715_v1 }
0x1246   :  { %v8398_v24 = vpop.eup %8397 }
0x1247   :  { %v3399_v26 = vadd.f32 1.0, %v8398_v24  ;;  %v8400_v0 = vpop.eup %8399  ;;  %v9992_v24 = vld [vmem:[#allocation10] sm:$0xff]  }
0x1248   :  { %v3397_v35 = vadd.f32 1.0, %v8400_v0  ;;  %v8402_v52 = vpop.eup %8401 }
0x1249   :  { %8413 = vrcp.f32 %v3399_v26  ;;  %v3400_v34 = vadd.f32 1.0, %v8402_v52  ;;  %v8404_v39 = vpop.eup %8403 }
0x124a   :  { %8415 = vrcp.f32 %v3397_v35  ;;  %v8406_v23 = vpop.eup %8405  ;;  %v3398_v46 = vadd.f32 1.0, %v8404_v39 }
0x124b   :  { %8417 = vrcp.f32 %v3400_v34  ;;  %v8408_v14 = vpop.eup %8407  ;;  %v3529_v41 = vadd.f32 1.0, %v8406_v23  ;;  %v9995_v23 = vld [vmem:[#allocation8 + $0x10] sm:$0xff]  }
0x124c   :  { %8419 = vrcp.f32 %v3398_v46  ;;  %v8410_v47 = vpop.eup %8409  ;;  %v3527_v11 = vadd.f32 1.0, %v8408_v14  ;;  %v9998_v46 = vld [vmem:[#allocation2 + $0x8] sm:$0xff]  }
0x124d   :  { %v8412_v37 = vpop.eup %8411  ;;  %v3530_v48 = vadd.f32 1.0, %v8410_v47  ;;  %8421 = vrcp.f32 %v3529_v41  ;;  %v10003_v14 = vld [vmem:[#allocation8 + $0x18] sm:$0xff]   ;;  %v10007_v47 = vld [vmem:[#allocation10 + $0x10] sm:$0xff]  }
0x124e   :  { %v3528_v17 = vadd.f32 1.0, %v8412_v37  ;;  %8423 = vrcp.f32 %v3527_v11 }
0x124f   :  { %8425 = vrcp.f32 %v3530_v48 }
0x1253   :  { %v8414_v38 = vpop.eup %8413 }
0x1254   :  { %v3639_v56 = vmul.f32 %v8414_v38, %v3631_v40  ;;  %v8416_v18 = vpop.eup %8415 }
0x1255   :  { %v3637_v21 = vmul.f32 %v8416_v18, %v3623_v57  ;;  %v8418_v29 = vpop.eup %8417  ;;  %v10026_v57 = vld [vmem:[#allocation8 + $0x20] sm:$0xff]   ;;  %v10029_v18 = vld [vmem:[#allocation10 + $0x20] sm:$0xff]  }
0x1256   :  { %v3643_v20 = vadd.f32 %v3639_v56, %v3582_v55  ;;  %v3640_v13 = vmul.f32 %v8418_v29, %v3634_v28  ;;  %v8420_v50 = vpop.eup %8419  ;;  %v10018_v55 = vld [vmem:[#allocation10 + $0x8] sm:$0xff]   ;;  %v10021_v56 = vld [vmem:[#allocation10 + $0x18] sm:$0xff]  }
0x1257   :  { %v3641_v25 = vadd.f32 %v3637_v21, %v3574_v19  ;;  %v3638_v45 = vmul.f32 %v8420_v50, %v3626_v58  ;;  %v8422_v4 = vpop.eup %8421  ;;  %v10043_v19 = vld [vmem:[#allocation10 + $0x28] sm:$0xff]   ;;  %v8165_v21 = vld [vmem:[#allocation7 + $0x70] sm:$0xff]  }
0x1258   :  { %8427 = vtanh.f32 %v3643_v20  ;;  %v3644_v43 = vadd.f32 %v3640_v13, %v3585_v30  ;;  %v8424_v22 = vpop.eup %8423  ;;  %v3651_v62 = vsub.f32 1.0, %v8422_v4  ;;  %v3659_v27 = vmul.f32 %v8422_v4, %v9884_v51  ;;  %v8554_v20 = vld [vmem:[#allocation2] sm:$0xff]   ;;  %v8166_v28 = vld [vmem:[#allocation7 + $0x78] sm:$0xff]  }
0x1259   :  { %8429 = vrcp.f32 %v3528_v17  ;;  %v3642_v6 = vadd.f32 %v3638_v45, %v3577_v42  ;;  %v8426_v53 = vpop.eup %8425  ;;  %v3649_v31 = vsub.f32 1.0, %v8424_v22  ;;  %v3657_v8 = vmul.f32 %v8424_v22, %v9886_v60  ;;  %v10040_v17 = vld [vmem:[#allocation8 + $0x28] sm:$0xff]   ;;  %v10060_v22 = vld [vmem:[#allocation13] ss:$0 sm:$0xff] }
0x125a   :  { %8431 = vtanh.f32 %v3641_v25  ;;  %v3652_v49 = vsub.f32 1.0, %v8426_v53  ;;  %v3660_v7 = vmul.f32 %v8426_v53, %v9890_v10  ;;  %v9985_v10 = vld [vmem:[#allocation8] sm:$0xff]  }
0x125b   :  { %8433 = vtanh.f32 %v3644_v43  ;;  %v10053_v25 = vld [vmem:[#allocation11] ss:$0 sm:$0xff]  ;;  %v10056_v43 = vld [vmem:[#allocation11 + $0x1] ss:$0 sm:$0xff] }
0x125c   :  { %8435 = vtanh.f32 %v3642_v6 }
0x1262   :  { %v8428_v44 = vpop.eup %8427 }
0x1263   :  { %v8430_v16 = vpop.eup %8429  ;;  %v3655_v2 = vmul.f32 %v8428_v44, %v3651_v62 }
0x1264   :  { %v8432_v5 = vpop.eup %8431  ;;  %v3650_v33 = vsub.f32 1.0, %v8430_v16  ;;  %v3658_v15 = vmul.f32 %v8430_v16, %v9892_v3  ;;  %v9988_v3 = vld [vmem:[#allocation8 + $0x8] sm:$0xff]  }
0x1265   :  { %v3653_v32 = vmul.f32 %v8432_v5, %v3649_v31  ;;  %v9966_v36 = vadd.f32 %v3659_v27, %v3655_v2  ;;  %v8434_v54 = vpop.eup %8433 }
0x1266   :  { %v3656_v12 = vmul.f32 %v8434_v54, %v3652_v49  ;;  %v8436_v9 = vpop.eup %8435 }
0x1267   :  { %v9968_v59 = vadd.f32 %v3657_v8, %v3653_v32  ;;  %v3654_v61 = vmul.f32 %v8436_v9, %v3650_v33  ;;  %v10069_v8 = vld [vmem:[#allocation13 + $0x1] ss:$0 sm:$0xff] }
0x1268   :  { %v9972_v63 = vadd.f32 %v3660_v7, %v3656_v12 }
0x1269   :  { %v9974_v51 = vadd.f32 %v3658_v15, %v3654_v61 }
0x126a   :  { %v9980_v1 = vpack.c.bf16 %v9972_v63, %v9966_v36 }
0x126b   :  { %v3665_v60 = vpack.c.bf16 %v9974_v51, %v9968_v59 }
0x126d   :  { %7588 = vmatprep.mubr.msk.bf16.mxu0 %vm470_vm0, %v3665_v60 }
0x126e   :  { %7589 = vmatmul.mubr.msk.bf16.vlgmr.msra.gmra.mrb[72].mxu0 %vm470_vm0, %v9980_v1 }
0x126f   :  { %7601 = vmatpush3.bf16.msra.mxu0 %v9985_v10 }
0x1270   :  { %7602 = vmatprep.subr.bf16.mxu0 %v9988_v3 }
0x1273   :  { %7603 = vmatpush3.bf16.msra.mxu0 %v9988_v3 }
0x1274   :  { %7608 = vmatprep.subr.bf16.mxu0 %v9992_v24 }
0x1341   :  { %v7590_v26 = vpop.f32.mrb[72].mxu0 }
0x1342   :  { %v3719_v0 = vpop.f32.mrb[73].mxu0 }
0x1343   :  { %v7591_v35 = vpop.f32.mrb[74].mxu0 }
0x1344   :  { %v3735_v52 = vpack.c.bf16 %v7591_v35, %v7590_v26  ;;  %v3722_v34 = vpop.f32.mrb[75].mxu0 }
0x1345   :  { %v3734_v39 = vpack.c.bf16 %v3722_v34, %v3719_v0 }
0x1347   :  { %7592 = vmatprep.subr.bf16.mxu1 %v3734_v39 }
0x1348   :  { %7593 = vmatpush3.bf16.msra.mxu1 %v3734_v39 }
0x1349   :  { %7594 = vmatprep.subr.bf16.mxu1 %v3735_v52 }
0x134c   :  { %7595 = vmatpush3.bf16.msra.mxu1 %v3735_v52 }
0x134d   :  { %7616 = vmatprep.subr.bf16.mxu1 %v9995_v23 }
0x134f   :  { %7597 = vmatmul.mubr.msk.bf16.vlgmr.msra.gmra.mrb[72].mxu1 %vm470_vm0, %v9998_v46 }
0x1350   :  { %7617 = vmatpush3.bf16.msra.mxu1 %v9995_v23 }
0x1351   :  { %7618 = vmatprep.subr.bf16.mxu1 %v10003_v14 }
0x1354   :  { %7619 = vmatpush3.bf16.msra.mxu1 %v10003_v14 }
0x1355   :  { %7624 = vmatprep.subr.bf16.mxu1 %v10007_v47 }
0x1422   :  { %v7598_v41 = vpop.f32.mrb[72].mxu1 }
0x1423   :  { %v3770_v37 = vpop.f32.mrb[73].mxu1 }
0x1424   :  { %v7599_v11 = vpop.f32.mrb[74].mxu1 }
0x1425   :  { %v3786_v40 = vpack.c.bf16 %v7599_v11, %v7598_v41  ;;  %v3773_v38 = vpop.f32.mrb[75].mxu1 }
0x1426   :  { %v3785_v48 = vpack.c.bf16 %v3773_v38, %v3770_v37 }
0x1428   :  { %7604 = vmatprep.mubr.msk.bf16.mxu0 %vm470_vm0, %v3785_v48  ;;  %7620 = vmatprep.mubr.msk.bf16.mxu1 %vm470_vm0, %v3785_v48 }
0x1429   :  { %7605 = vmatmul.mubr.msk.bf16.vlgmr.msra.gmra.mrb[76].mxu0 %vm470_vm0, %v3786_v40  ;;  %7621 = vmatmul.mubr.msk.bf16.vlgmr.msra.gmra.mrb[76].mxu1 %vm470_vm0, %v3786_v40 }
0x142a   :  { %7612 = vmatprep.mubr.msk.bf16.mxu0 %vm470_vm0, %v3665_v60  ;;  %7628 = vmatprep.mubr.msk.bf16.mxu1 %vm470_vm0, %v3665_v60 }
0x142b   :  { %7609 = vmatpush3.bf16.msra.mxu0 %v9992_v24  ;;  %7625 = vmatpush3.bf16.msra.mxu1 %v10007_v47 }
0x142c   :  { %7610 = vmatprep.subr.bf16.mxu0 %v10018_v55  ;;  %7626 = vmatprep.subr.bf16.mxu1 %v10021_v56 }
0x142f   :  { %7611 = vmatpush3.bf16.msra.mxu0 %v10018_v55  ;;  %7627 = vmatpush3.bf16.msra.mxu1 %v10021_v56 }
0x1430   :  { %7632 = vmatprep.subr.bf16.mxu0 %v10026_v57  ;;  %7640 = vmatprep.subr.bf16.mxu1 %v10029_v18 }
0x1435   :  { %7613 = vmatmul.mubr.msk.bf16.vlgmr.msra.gmra.mrb[76].mxu0 %vm470_vm0, %v9980_v1  ;;  %7629 = vmatmul.mubr.msk.bf16.vlgmr.msra.gmra.mrb[76].mxu1 %vm470_vm0, %v9980_v1 }
0x1436   :  { %7633 = vmatpush3.bf16.msra.mxu0 %v10026_v57  ;;  %7636 = vmatprep.mubr.msk.bf16.mxu0 %vm470_vm0, %v3785_v48 }
0x1437   :  { %7641 = vmatpush3.bf16.msra.mxu1 %v10029_v18  ;;  %7644 = vmatprep.mubr.msk.bf16.mxu1 %vm470_vm0, %v3665_v60 }
0x1438   :  { %7634 = vmatprep.subr.bf16.mxu0 %v10040_v17  ;;  %7642 = vmatprep.subr.bf16.mxu1 %v10043_v19 }
0x143a   :  { %7635 = vmatpush3.bf16.msra.mxu0 %v10040_v17 }
0x143b   :  { %7643 = vmatpush3.bf16.msra.mxu1 %v10043_v19  ;;  %7648 = vmatprep.subr.bf16.mxu0 %v8165_v21 }
0x143d   :  { %7637 = vmatmul.mubr.msk.bf16.vlgmr.msra.gmra.mrb[80].mxu0 %vm470_vm0, %v3786_v40 }
0x143e   :  { %7645 = vmatmul.mubr.msk.bf16.vlgmr.msra.gmra.mrb[80].mxu1 %vm470_vm0, %v9980_v1  ;;  %7649 = vmatpush3.bf16.msra.mxu0 %v8165_v21 }
0x143f   :  { %7660 = vmatprep.mubr.msk.bf16.mxu1 %vm470_vm0, %v8554_v20  ;;  %7650 = vmatprep.subr.bf16.mxu0 %v8166_v28 }
0x1442   :  { %7651 = vmatpush3.bf16.msra.mxu0 %v8166_v28 }
0x1443   :  { %7664 = vmatprep.subr.bf16.mxu0 %v9985_v10 }
0x1508   :  { %v7614_v29 = vpop.f32.mrb[76].mxu0  ;;  %v7630_v30 = vpop.f32.mrb[76].mxu1 }
0x1509   :  { %v7989_v13 = vadd.f32 %v10053_v25, %v7614_v29  ;;  %v3876_v58 = vpop.f32.mrb[77].mxu0  ;;  %v4006_v50 = vpop.f32.mrb[77].mxu1  ;;  %v7993_v42 = vadd.f32 %v10056_v43, %v7630_v30 }
0x150a   :  { %v7990_v45 = vadd.f32 %v10053_v25, %v3876_v58  ;;  %v7615_v6 = vpop.f32.mrb[78].mxu0  ;;  %v7631_v4 = vpop.f32.mrb[78].mxu1  ;;  %v7994_v2 = vadd.f32 %v10056_v43, %v4006_v50 }
0x150b   :  { %v3897_v53 = vadd.f32 %v10060_v22, %v7989_v13  ;;  %v7991_v62 = vadd.f32 %v10053_v25, %v7615_v6  ;;  %v3879_v44 = vpop.f32.mrb[79].mxu0  ;;  %v4009_v16 = vpop.f32.mrb[79].mxu1  ;;  %v7995_v32 = vadd.f32 %v10056_v43, %v7631_v4  ;;  %v4027_v54 = vadd.f32 %v10069_v8, %v7993_v42 }
0x150c   :  { %v3895_v31 = vadd.f32 %v10060_v22, %v7990_v45  ;;  %v7992_v27 = vadd.f32 %v10053_v25, %v3879_v44  ;;  %v7996_v9 = vadd.f32 %v10056_v43, %v4009_v16  ;;  %v4025_v61 = vadd.f32 %v10069_v8, %v7994_v2  ;;  %v10077_v44 = vld [vmem:[#allocation13 + $0x2] ss:$0 sm:$0xff] }
0x150d   :  { %v6734_v5 = vmul.f32 -1.442695, %v3897_v53  ;;  %v3898_v49 = vadd.f32 %v10060_v22, %v7991_v62  ;;  %v4028_v60 = vadd.f32 %v10069_v8, %v7995_v32  ;;  %v6742_v35 = vmul.f32 -1.442695, %v4027_v54 }
0x150e   :  { %v6732_v33 = vmul.f32 -1.442695, %v3895_v31  ;;  %v3896_v12 = vadd.f32 %v10060_v22, %v7992_v27  ;;  %v4026_v39 = vadd.f32 %v10069_v8, %v7996_v9  ;;  %v6740_v11 = vmul.f32 -1.442695, %v4025_v61  ;;  %v10080_v27 = vld [vmem:[#allocation11 + $0x2] ss:$0 sm:$0xff] }
0x150f   :  { %8437 = vpow2.f32 %v6734_v5  ;;  %v6735_v7 = vmul.f32 -1.442695, %v3898_v49  ;;  %v6743_v38 = vmul.f32 -1.442695, %v4028_v60 }
0x1510   :  { %v7638_v15 = vpop.f32.mrb[80].mxu0  ;;  %8439 = vpow2.f32 %v6732_v33  ;;  %v6733_v1 = vmul.f32 -1.442695, %v3896_v12  ;;  %v6741_v48 = vmul.f32 -1.442695, %v4026_v39 }
0x1511   :  { %v7646_v26 = vpop.f32.mrb[80].mxu1  ;;  %v4087_v0 = vpop.f32.mrb[81].mxu0  ;;  %8441 = vpow2.f32 %v6735_v7  ;;  %v4096_v5 = vadd.f32 %v10080_v27, %v7638_v15 }
0x1512   :  { %v4136_v52 = vpop.f32.mrb[81].mxu1  ;;  %v7639_v34 = vpop.f32.mrb[82].mxu0  ;;  %8443 = vpow2.f32 %v6733_v1  ;;  %v4145_v16 = vadd.f32 %v10077_v44, %v7646_v26  ;;  %v4088_v12 = vadd.f32 %v10080_v27, %v4087_v0 }
0x1513   :  { %v7647_v41 = vpop.f32.mrb[82].mxu1  ;;  %v4090_v37 = vpop.f32.mrb[83].mxu0  ;;  %8445 = vpow2.f32 %v6742_v35  ;;  %v4137_v32 = vadd.f32 %v10077_v44, %v4136_v52  ;;  %v4099_v1 = vadd.f32 %v10080_v27, %v7639_v34 }
0x1514   :  { %v4139_v40 = vpop.f32.mrb[83].mxu1  ;;  %8447 = vpow2.f32 %v6740_v11  ;;  %v4148_v61 = vadd.f32 %v10077_v44, %v7647_v41  ;;  %v4091_v0 = vadd.f32 %v10080_v27, %v4090_v37 }
0x1515   :  { %8449 = vpow2.f32 %v6743_v38  ;;  %v4140_v15 = vadd.f32 %v10077_v44, %v4139_v40 }
0x1516   :  { %8451 = vpow2.f32 %v6741_v48 }
0x1519   :  { %v8438_v20 = vpop.eup %8437 }
0x151a   :  { %v3913_v21 = vadd.f32 1.0, %v8438_v20  ;;  %v8440_v28 = vpop.eup %8439 }
0x151b   :  { %v3911_v29 = vadd.f32 1.0, %v8440_v28  ;;  %v8442_v30 = vpop.eup %8441 }
0x151c   :  { %8453 = vrcp.f32 %v3913_v21  ;;  %v3914_v13 = vadd.f32 1.0, %v8442_v30  ;;  %v8444_v58 = vpop.eup %8443 }
0x151d   :  { %8455 = vrcp.f32 %v3911_v29  ;;  %v8446_v50 = vpop.eup %8445  ;;  %v3912_v42 = vadd.f32 1.0, %v8444_v58 }
0x151e   :  { %8457 = vrcp.f32 %v3914_v13  ;;  %v8448_v45 = vpop.eup %8447  ;;  %v4043_v4 = vadd.f32 1.0, %v8446_v50 }
0x151f   :  { %8459 = vrcp.f32 %v3912_v42  ;;  %v8450_v6 = vpop.eup %8449  ;;  %v4041_v62 = vadd.f32 1.0, %v8448_v45 }
0x1520   :  { %v8452_v53 = vpop.eup %8451  ;;  %v4044_v2 = vadd.f32 1.0, %v8450_v6  ;;  %8461 = vrcp.f32 %v4043_v4 }
0x1521   :  { %v4042_v33 = vadd.f32 1.0, %v8452_v53  ;;  %8463 = vrcp.f32 %v4041_v62 }
0x1522   :  { %8465 = vrcp.f32 %v4044_v2 }
0x1526   :  { %v8454_v31 = vpop.eup %8453 }
0x1527   :  { %v4153_v49 = vmul.f32 %v8454_v31, %v4145_v16  ;;  %v8456_v54 = vpop.eup %8455 }
0x1528   :  { %v4151_v9 = vmul.f32 %v8456_v54, %v4137_v32  ;;  %v8458_v60 = vpop.eup %8457 }
0x1529   :  { %v4157_v7 = vadd.f32 %v4153_v49, %v4096_v5  ;;  %v4154_v35 = vmul.f32 %v8458_v60, %v4148_v61  ;;  %v8460_v39 = vpop.eup %8459 }
0x152a   :  { %v4155_v26 = vadd.f32 %v4151_v9, %v4088_v12  ;;  %v4152_v11 = vmul.f32 %v8460_v39, %v4140_v15  ;;  %v8462_v48 = vpop.eup %8461 }
0x152b   :  { %8467 = vtanh.f32 %v4157_v7  ;;  %v4158_v52 = vadd.f32 %v4154_v35, %v4099_v1  ;;  %v8464_v41 = vpop.eup %8463  ;;  %v4165_v21 = vsub.f32 1.0, %v8462_v48  ;;  %v4173_v40 = vmul.f32 %v8462_v48, %v9966_v36 }
0x152c   :  { %8469 = vrcp.f32 %v4042_v33  ;;  %v4156_v38 = vadd.f32 %v4152_v11, %v4091_v0  ;;  %v8466_v20 = vpop.eup %8465  ;;  %v4163_v29 = vsub.f32 1.0, %v8464_v41  ;;  %v4171_v42 = vmul.f32 %v8464_v41, %v9968_v59 }
0x152d   :  { %8471 = vtanh.f32 %v4155_v26  ;;  %v4166_v58 = vsub.f32 1.0, %v8466_v20  ;;  %v4174_v62 = vmul.f32 %v8466_v20, %v9972_v63 }
0x152e   :  { %8473 = vtanh.f32 %v4158_v52 }
0x152f   :  { %8475 = vtanh.f32 %v4156_v38 }
0x1535   :  { %v8468_v34 = vpop.eup %8467 }
0x1536   :  { %v8470_v28 = vpop.eup %8469  ;;  %v4169_v30 = vmul.f32 %v8468_v34, %v4165_v21 }
0x1537   :  { %v8472_v13 = vpop.eup %8471  ;;  %v4164_v6 = vsub.f32 1.0, %v8470_v28  ;;  %v4172_v2 = vmul.f32 %v8470_v28, %v9974_v51 }
0x1538   :  { %v4167_v50 = vmul.f32 %v8472_v13, %v4163_v29  ;;  %v10091_v37 = vadd.f32 %v4173_v40, %v4169_v30  ;;  %v8474_v45 = vpop.eup %8473 }
0x1539   :  { %v4170_v53 = vmul.f32 %v8474_v45, %v4166_v58  ;;  %v8476_v16 = vpop.eup %8475 }
0x153a   :  { %v10093_v4 = vadd.f32 %v4171_v42, %v4167_v50  ;;  %v4168_v31 = vmul.f32 %v8476_v16, %v4164_v6 }
0x153b   :  { %v10097_v5 = vadd.f32 %v4174_v62, %v4170_v53 }
0x153c   :  { %v10099_v36 = vadd.f32 %v4172_v2, %v4168_v31 }
0x153d   :  { %v4180_v49 = vpack.c.bf16 %v10097_v5, %v10091_v37 }
0x153e   :  { %v4179_v59 = vpack.c.bf16 %v10099_v36, %v10093_v4 }
0x1540   :  { %7652 = vmatprep.mubr.msk.bf16.mxu0 %vm470_vm0, %v4179_v59 }
0x1541   :  { %7653 = vmatmul.mubr.msk.bf16.vlgmr.msra.gmra.mrb[84].mxu0 %vm470_vm0, %v4180_v49 }
0x1542   :  { %7665 = vmatpush3.bf16.msra.mxu0 %v9985_v10 }
0x1543   :  { %7666 = vmatprep.subr.bf16.mxu0 %v9988_v3 }
0x1546   :  { %7667 = vmatpush3.bf16.msra.mxu0 %v9988_v3 }
0x1547   :  { %7672 = vmatprep.subr.bf16.mxu0 %v9992_v24 }
0x1614   :  { %v7654_v63 = vpop.f32.mrb[84].mxu0 }
0x1615   :  { %v4233_v51 = vpop.f32.mrb[85].mxu0 }
0x1616   :  { %v7655_v32 = vpop.f32.mrb[86].mxu0 }
0x1617   :  { %v4249_v54 = vpack.c.bf16 %v7655_v32, %v7654_v63  ;;  %v4236_v33 = vpop.f32.mrb[87].mxu0 }
0x1618   :  { %v4248_v12 = vpack.c.bf16 %v4236_v33, %v4233_v51 }
0x161a   :  { %7656 = vmatprep.subr.bf16.mxu1 %v4248_v12 }
0x161b   :  { %7657 = vmatpush3.bf16.msra.mxu1 %v4248_v12 }
0x161c   :  { %7658 = vmatprep.subr.bf16.mxu1 %v4249_v54 }
0x161f   :  { %7659 = vmatpush3.bf16.msra.mxu1 %v4249_v54 }
0x1620   :  { %7680 = vmatprep.subr.bf16.mxu1 %v9995_v23 }
0x1622   :  { %7661 = vmatmul.mubr.msk.bf16.vlgmr.msra.gmra.mrb[84].mxu1 %vm470_vm0, %v9998_v46  ;;  %v10153_v46 = vld [vmem:[%s10540_s7] sm:$0xff]  }
0x1623   :  { %7681 = vmatpush3.bf16.msra.mxu1 %v9995_v23  ;;  %v8168_v23 = vld [vmem:[%s10540_s7 + $0x18] sm:$0xff]  }
0x1624   :  { %7682 = vmatprep.subr.bf16.mxu1 %v10003_v14 }
0x1627   :  { %7683 = vmatpush3.bf16.msra.mxu1 %v10003_v14 }
0x1628   :  { %7688 = vmatprep.subr.bf16.mxu1 %v10007_v47 }
0x16f5   :  { %v7662_v10 = vpop.f32.mrb[84].mxu1 }
0x16f6   :  { %v4284_v3 = vpop.f32.mrb[85].mxu1 }
0x16f7   :  { %v7663_v7 = vpop.f32.mrb[86].mxu1 }
0x16f8   :  { %v4300_v9 = vpack.c.bf16 %v7663_v7, %v7662_v10  ;;  %v4287_v61 = vpop.f32.mrb[87].mxu1 }
0x16f9   :  { %v4299_v60 = vpack.c.bf16 %v4287_v61, %v4284_v3 }
0x16fb   :  { %7668 = vmatprep.mubr.msk.bf16.mxu0 %vm470_vm0, %v4299_v60  ;;  %7684 = vmatprep.mubr.msk.bf16.mxu1 %vm470_vm0, %v4299_v60 }
0x16fc   :  { %7669 = vmatmul.mubr.msk.bf16.vlgmr.msra.gmra.mrb[88].mxu0 %vm470_vm0, %v4300_v9  ;;  %7685 = vmatmul.mubr.msk.bf16.vlgmr.msra.gmra.mrb[88].mxu1 %vm470_vm0, %v4300_v9 }
0x16fd   :  { %7676 = vmatprep.mubr.msk.bf16.mxu0 %vm470_vm0, %v4179_v59  ;;  %7692 = vmatprep.mubr.msk.bf16.mxu1 %vm470_vm0, %v4179_v59 }
0x16fe   :  { %7673 = vmatpush3.bf16.msra.mxu0 %v9992_v24  ;;  %7689 = vmatpush3.bf16.msra.mxu1 %v10007_v47  ;;  %v8167_v24 = vld [vmem:[%s10540_s7 + $0x10] sm:$0xff]  }
0x16ff   :  { %7674 = vmatprep.subr.bf16.mxu0 %v10018_v55  ;;  %7690 = vmatprep.subr.bf16.mxu1 %v10021_v56 }
0x1702   :  { %7675 = vmatpush3.bf16.msra.mxu0 %v10018_v55  ;;  %7691 = vmatpush3.bf16.msra.mxu1 %v10021_v56 }
0x1703   :  { %7696 = vmatprep.subr.bf16.mxu0 %v10026_v57  ;;  %7704 = vmatprep.subr.bf16.mxu1 %v10029_v18 }
0x1708   :  { %7677 = vmatmul.mubr.msk.bf16.vlgmr.msra.gmra.mrb[88].mxu0 %vm470_vm0, %v4180_v49  ;;  %7693 = vmatmul.mubr.msk.bf16.vlgmr.msra.gmra.mrb[88].mxu1 %vm470_vm0, %v4180_v49 }
0x1709   :  { %7697 = vmatpush3.bf16.msra.mxu0 %v10026_v57  ;;  %7700 = vmatprep.mubr.msk.bf16.mxu0 %vm470_vm0, %v4299_v60 }
0x170a   :  { %7705 = vmatpush3.bf16.msra.mxu1 %v10029_v18  ;;  %7708 = vmatprep.mubr.msk.bf16.mxu1 %vm470_vm0, %v4179_v59 }
0x170b   :  { %7698 = vmatprep.subr.bf16.mxu0 %v10040_v17  ;;  %7706 = vmatprep.subr.bf16.mxu1 %v10043_v19 }
0x170d   :  { %7699 = vmatpush3.bf16.msra.mxu0 %v10040_v17 }
0x170e   :  { %7707 = vmatpush3.bf16.msra.mxu1 %v10043_v19  ;;  %7712 = vmatprep.subr.bf16.mxu0 %v8167_v24 }
0x1710   :  { %7701 = vmatmul.mubr.msk.bf16.vlgmr.msra.gmra.mrb[92].mxu0 %vm470_vm0, %v4300_v9 }
0x1711   :  { %7709 = vmatmul.mubr.msk.bf16.vlgmr.msra.gmra.mrb[92].mxu1 %vm470_vm0, %v4180_v49  ;;  %7713 = vmatpush3.bf16.msra.mxu0 %v8167_v24 }
0x1712   :  { %7714 = vmatprep.subr.bf16.mxu0 %v8168_v23 }
0x1715   :  { %7715 = vmatpush3.bf16.msra.mxu0 %v8168_v23 }
0x1716   :  { %7720 = vmatprep.subr.bf16.mxu0 %v10153_v46 }
0x17db   :  { %v7678_v14 = vpop.f32.mrb[88].mxu0  ;;  %v7694_v47 = vpop.f32.mrb[88].mxu1 }
0x17dc   :  { %v7997_v55 = vadd.f32 %v10053_v25, %v7678_v14  ;;  %v4390_v56 = vpop.f32.mrb[89].mxu0  ;;  %v4520_v57 = vpop.f32.mrb[89].mxu1  ;;  %v8001_v18 = vadd.f32 %v10056_v43, %v7694_v47 }
0x17dd   :  { %v7998_v17 = vadd.f32 %v10053_v25, %v4390_v56  ;;  %v7679_v19 = vpop.f32.mrb[90].mxu0  ;;  %v7695_v1 = vpop.f32.mrb[90].mxu1  ;;  %v8002_v0 = vadd.f32 %v10056_v43, %v4520_v57 }
0x17de   :  { %v4411_v26 = vadd.f32 %v10060_v22, %v7997_v55  ;;  %v7999_v35 = vadd.f32 %v10053_v25, %v7679_v19  ;;  %v4393_v15 = vpop.f32.mrb[91].mxu0  ;;  %v4523_v39 = vpop.f32.mrb[91].mxu1  ;;  %v8003_v41 = vadd.f32 %v10056_v43, %v7695_v1  ;;  %v4541_v20 = vadd.f32 %v10069_v8, %v8001_v18 }
0x17df   :  { %v4409_v52 = vadd.f32 %v10060_v22, %v7998_v17  ;;  %v8000_v11 = vadd.f32 %v10053_v25, %v4393_v15  ;;  %v8004_v29 = vadd.f32 %v10056_v43, %v4523_v39  ;;  %v4539_v30 = vadd.f32 %v10069_v8, %v8002_v0 }
0x17e0   :  { %v6760_v38 = vmul.f32 -1.442695, %v4411_v26  ;;  %v4412_v48 = vadd.f32 %v10060_v22, %v7999_v35  ;;  %v4542_v25 = vadd.f32 %v10069_v8, %v8003_v41  ;;  %v6768_v42 = vmul.f32 -1.442695, %v4541_v20 }
0x17e1   :  { %v6758_v21 = vmul.f32 -1.442695, %v4409_v52  ;;  %v4410_v34 = vadd.f32 %v10060_v22, %v8000_v11  ;;  %v4540_v53 = vadd.f32 %v10069_v8, %v8004_v29  ;;  %v6766_v16 = vmul.f32 -1.442695, %v4539_v30 }
0x17e2   :  { %8477 = vpow2.f32 %v6760_v38  ;;  %v6761_v28 = vmul.f32 -1.442695, %v4412_v48  ;;  %v6769_v43 = vmul.f32 -1.442695, %v4542_v25 }
0x17e3   :  { %v7702_v40 = vpop.f32.mrb[92].mxu0  ;;  %8479 = vpow2.f32 %v6758_v21  ;;  %v6759_v13 = vmul.f32 -1.442695, %v4410_v34  ;;  %v6767_v2 = vmul.f32 -1.442695, %v4540_v53 }
0x17e4   :  { %v7710_v58 = vpop.f32.mrb[92].mxu1  ;;  %v4601_v50 = vpop.f32.mrb[93].mxu0  ;;  %8481 = vpow2.f32 %v6761_v28  ;;  %v4610_v14 = vadd.f32 %v10080_v27, %v7702_v40 }
0x17e5   :  { %v4650_v45 = vpop.f32.mrb[93].mxu1  ;;  %v7703_v6 = vpop.f32.mrb[94].mxu0  ;;  %8483 = vpow2.f32 %v6759_v13  ;;  %v4659_v60 = vadd.f32 %v10077_v44, %v7710_v58  ;;  %v4602_v18 = vadd.f32 %v10080_v27, %v4601_v50 }
0x17e6   :  { %v7711_v22 = vpop.f32.mrb[94].mxu1  ;;  %v4604_v62 = vpop.f32.mrb[95].mxu0  ;;  %8485 = vpow2.f32 %v6768_v42  ;;  %v4651_v55 = vadd.f32 %v10077_v44, %v4650_v45  ;;  %v4613_v35 = vadd.f32 %v10080_v27, %v7703_v6 }
0x17e7   :  { %v4653_v31 = vpop.f32.mrb[95].mxu1  ;;  %8487 = vpow2.f32 %v6766_v16  ;;  %v4662_v1 = vadd.f32 %v10077_v44, %v7711_v22  ;;  %v4605_v38 = vadd.f32 %v10080_v27, %v4604_v62 }
0x17e8   :  { %8489 = vpow2.f32 %v6769_v43  ;;  %v4654_v52 = vadd.f32 %v10077_v44, %v4653_v31 }
0x17e9   :  { %8491 = vpow2.f32 %v6767_v2 }
0x17ec   :  { %v8478_v59 = vpop.eup %8477 }
0x17ed   :  { %v4427_v49 = vadd.f32 1.0, %v8478_v59  ;;  %v8480_v63 = vpop.eup %8479 }
0x17ee   :  { %v4425_v51 = vadd.f32 1.0, %v8480_v63  ;;  %v8482_v32 = vpop.eup %8481 }
0x17ef   :  { %8493 = vrcp.f32 %v4427_v49  ;;  %v4428_v54 = vadd.f32 1.0, %v8482_v32  ;;  %v8484_v8 = vpop.eup %8483 }
0x17f0   :  { %8495 = vrcp.f32 %v4425_v51  ;;  %v8486_v33 = vpop.eup %8485  ;;  %v4426_v12 = vadd.f32 1.0, %v8484_v8 }
0x17f1   :  { %8497 = vrcp.f32 %v4428_v54  ;;  %v8488_v10 = vpop.eup %8487  ;;  %v4557_v7 = vadd.f32 1.0, %v8486_v33 }
0x17f2   :  { %8499 = vrcp.f32 %v4426_v12  ;;  %v8490_v3 = vpop.eup %8489  ;;  %v4555_v61 = vadd.f32 1.0, %v8488_v10  ;;  %v8170_v12 = vld [vmem:[%s10540_s7 + $0x8] sm:$0xff]   ;;  %v8171_v10 = vld [vmem:[%s10540_s7 + $0x20] sm:$0xff]  }
0x17f3   :  { %v8492_v9 = vpop.eup %8491  ;;  %v4558_v23 = vadd.f32 1.0, %v8490_v3  ;;  %8501 = vrcp.f32 %v4557_v7 }
0x17f4   :  { %v4556_v57 = vadd.f32 1.0, %v8492_v9  ;;  %8503 = vrcp.f32 %v4555_v61  ;;  %v8172_v9 = vld [vmem:[%s10540_s7 + $0x28] sm:$0xff]   ;;  %v8173_v61 = vld [vmem:[%s10540_s7 + $0x30] sm:$0xff]  }
0x17f5   :  { %8505 = vrcp.f32 %v4558_v23 }
0x17f9   :  { %v8494_v24 = vpop.eup %8493 }
0x17fa   :  { %v4667_v47 = vmul.f32 %v8494_v24, %v4659_v60  ;;  %v8496_v56 = vpop.eup %8495 }
0x17fb   :  { %v4665_v19 = vmul.f32 %v8496_v56, %v4651_v55  ;;  %v8498_v26 = vpop.eup %8497  ;;  %v8174_v56 = vld [vmem:[%s10540_s7 + $0x38] sm:$0xff]  }
0x17fc   :  { %v4671_v17 = vadd.f32 %v4667_v47, %v4610_v14  ;;  %v4668_v39 = vmul.f32 %v8498_v26, %v4662_v1  ;;  %v8500_v0 = vpop.eup %8499 }
0x17fd   :  { %v4669_v15 = vadd.f32 %v4665_v19, %v4602_v18  ;;  %v4666_v48 = vmul.f32 %v8500_v0, %v4654_v52  ;;  %v8502_v20 = vpop.eup %8501  ;;  %v5085_v18 = vlaneseq  ;;  %v6790_v0 = vld [vmem:[#allocation14] ss:$0 sm:$0xff] }
0x17fe   :  { %8507 = vtanh.f32 %v4671_v17  ;;  %v4672_v11 = vadd.f32 %v4668_v39, %v4613_v35  ;;  %v8504_v21 = vpop.eup %8503  ;;  %v4679_v28 = vsub.f32 1.0, %v8502_v20  ;;  %v4687_v40 = vmul.f32 %v8502_v20, %v10091_v37  ;;  %v10256_v20 = vld [vmem:[#allocation20] ss:$0 sm:$0xff] }
0x17ff   :  { %8509 = vrcp.f32 %v4556_v57  ;;  %v4670_v41 = vadd.f32 %v4666_v48, %v4605_v38  ;;  %v8506_v34 = vpop.eup %8505  ;;  %v4677_v25 = vsub.f32 1.0, %v8504_v21  ;;  %v4685_v58 = vmul.f32 %v8504_v21, %v10093_v4 }
0x1800   :  { %8511 = vtanh.f32 %v4669_v15  ;;  %v4680_v50 = vsub.f32 1.0, %v8506_v34  ;;  %v4688_v6 = vmul.f32 %v8506_v34, %v10097_v5  ;;  %v5086_v17 = vshrl.u32 %v5085_v18, 7 }
0x1801   :  { %8513 = vtanh.f32 %v4672_v11  ;;  %v5089_v1 = vand.u32 127, %v5085_v18  ;;  %v9000_v15 = vmov 0.0   ;;  %v10254_v11 = vld [vmem:[#allocation19] ss:$0 sm:$0xff] }
0x1802   :  { %8515 = vtanh.f32 %v4670_v41  ;;  %v5087_v19 = vadd.s32 8, %v5086_v17  ;;  %v5090_v26 = vmul.u32 2, %v5086_v17 }
0x1804   :  { %v5091_v35 = vmul.u32 2, %v5087_v19  ;;  %vm5092_vm5 = vcmp.eq.s32.totalorder %v5089_v1, %v5090_v26 }
0x1805   :  { %v10244_v39 = vsel %vm5092_vm5, 1.0, %v9000_v15 }
0x1806   :  { %vm10246_vm6 = vcmp.eq.s32.totalorder %v5089_v1, %v5091_v35  ;;  %7752 = vmatprep.mubr.msk.f32.mxu1 %vm5098_vm4, %v10244_v39 }
0x1808   :  { %v8508_v29 = vpop.eup %8507 }
0x1809   :  { %v8510_v30 = vpop.eup %8509  ;;  %v4683_v44 = vmul.f32 %v8508_v29, %v4679_v28 }
0x180a   :  { %v8512_v13 = vpop.eup %8511  ;;  %v4678_v53 = vsub.f32 1.0, %v8510_v30  ;;  %v4686_v31 = vmul.f32 %v8510_v30, %v10099_v36 }
0x180b   :  { %v4691_v42 = vadd.f32 %v4687_v40, %v4683_v44  ;;  %v4681_v27 = vmul.f32 %v8512_v13, %v4677_v25  ;;  %v8514_v45 = vpop.eup %8513 }
0x180c   :  { %v4684_v62 = vmul.f32 %v8514_v45, %v4680_v50  ;;  %v8516_v16 = vpop.eup %8515 }
0x180d   :  { %v4689_v22 = vadd.f32 %v4685_v58, %v4681_v27  ;;  %v4682_v2 = vmul.f32 %v8516_v16, %v4678_v53 }
0x180e   :  { %v4692_v43 = vadd.f32 %v4688_v6, %v4684_v62 }
0x180f   :  { %v4690_v59 = vadd.f32 %v4686_v31, %v4682_v2 }
0x1810   :  { %v10184_v37 = vpack.c.bf16 %v4692_v43, %v4691_v42 }
0x1811   :  { %v10186_v49 = vpack.c.bf16 %v4690_v59, %v4689_v22 }
0x1812   :  { %v4704_v4 = vshll.u32 %v10184_v37, 16  ;;  %v4708_v8 = vshrl.u32 %v10184_v37, 16  ;;  %v10212_v7 = vrot.slane %v10184_v37, 1 }
0x1813   :  { %v4699_v63 = vshll.u32 %v10186_v49, 16  ;;  %v4697_v51 = vshrl.u32 %v10186_v49, 16  ;;  %v4846_v3 = vrot.slane %v10186_v49, 1 }
0x1814   :  { %v4706_v32 = vrot.slane %v4704_v4, 1  ;;  %v4924_v23 = vrot.slane %v4708_v8, 1  ;;  %v4925_v14 = vrot.slane %v4704_v4, 2 }
0x1815   :  { %v4701_v5 = vrot.slane %v4699_v63, 1  ;;  %v4921_v60 = vrot.slane %v4697_v51, 1  ;;  %v4922_v24 = vrot.slane %v4699_v63, 2 }
0x1816   :  { %v10195_v33 = vor.u32 %v4708_v8, %v4706_v32  ;;  %v10228_v55 = vor.u32 %v4925_v14, %v4924_v23 }
0x1817   :  { %v4702_v54 = vor.u32 %v4701_v5, %v4697_v51  ;;  %v4923_v47 = vor.u32 %v4922_v24, %v4921_v60 }
0x1819   :  { %v10193_v36 = vsel %vm4695_vm1, %v4702_v54, %v4706_v32  ;;  %v10237_v57 = vsel %vm4920_vm3, %v4923_v47, %v10228_v55 }
0x181a   :  { %7716 = vmatprep.mubr.msk.bf16.mxu0 %vm470_vm0, %v10193_v36 }
0x181b   :  { %7717 = vmatmul.mubr.msk.bf16.vlgmr.msra.gmra.mrb[96].mxu0 %vm470_vm0, %v10195_v33 }
0x181c   :  { %7724 = vmatprep.mubr.msk.bf16.mxu0 %vm470_vm0, %v10186_v49  ;;  %7721 = vmatpush3.bf16.msra.mxu0 %v10153_v46  ;;  %v10221_v46 = vsel %vm4845_vm2, %v4846_v3, %v10212_v7 }
0x181d   :  { %7722 = vmatprep.subr.bf16.mxu0 %v8170_v12 }
0x1820   :  { %7723 = vmatpush3.bf16.msra.mxu0 %v8170_v12 }
0x1821   :  { %7728 = vmatprep.subr.bf16.mxu0 %v8171_v10 }
0x1827   :  { %7725 = vmatmul.mubr.msk.bf16.vlgmr.msra.gmra.mrb[96].mxu0 %vm470_vm0, %v10184_v37 }
0x1828   :  { %7732 = vmatprep.mubr.msk.bf16.mxu0 %vm470_vm0, %v10221_v46  ;;  %7729 = vmatpush3.bf16.msra.mxu0 %v8171_v10 }
0x1829   :  { %7730 = vmatprep.subr.bf16.mxu0 %v8172_v9 }
0x182c   :  { %7731 = vmatpush3.bf16.msra.mxu0 %v8172_v9 }
0x182d   :  { %7736 = vmatprep.subr.bf16.mxu0 %v8173_v61 }
0x1833   :  { %7733 = vmatmul.mubr.msk.bf16.vlgmr.msra.gmra.mrb[96].mxu0 %vm470_vm0, %v10212_v7 }
0x1834   :  { %7740 = vmatprep.mubr.msk.bf16.mxu0 %vm470_vm0, %v10237_v57  ;;  %7737 = vmatpush3.bf16.msra.mxu0 %v8173_v61 }
0x1835   :  { %7738 = vmatprep.subr.bf16.mxu0 %v8174_v56 }
0x1838   :  { %7739 = vmatpush3.bf16.msra.mxu0 %v8174_v56 }
0x183f   :  { %7741 = vmatmul.mubr.msk.bf16.vlgmr.msra.gmra.mrb[96].mxu0 %vm470_vm0, %v10228_v55 }
0x1840   :  { %7842 = vmatprep.mubr.msk.f32.mxu0 %vm5098_vm4, %v10244_v39 }
0x1912   :  { %v7742_v38 = vpop.f32.mrb[96].mxu0 }
0x1913   :  { %v5007_v48 = vadd.f32 %v7742_v38, %v6790_v0  ;;  %v4980_v41 = vpop.f32.mrb[97].mxu0 }
0x1914   :  { %v5005_v21 = vadd.f32 %v6790_v0, %v4980_v41  ;;  %v7743_v34 = vpop.f32.mrb[98].mxu0 }
0x1915   :  { %v5017_v28 = vmul.f32 %v10254_v11, %v5007_v48  ;;  %v5008_v29 = vadd.f32 %v7743_v34, %v6790_v0  ;;  %v4983_v30 = vpop.f32.mrb[99].mxu0 }
0x1916   :  { %v5015_v40 = vmul.f32 %v10254_v11, %v5005_v21  ;;  %v5006_v25 = vadd.f32 %v6790_v0, %v4983_v30  ;;  %v8176_v30 = vld [vmem:[#allocation16 + $0x18] sm:$0xff]  }
0x1917   :  { %v5027_v44 = vadd.f32 %v10256_v20, %v5017_v28  ;;  %v5018_v13 = vmul.f32 %v10254_v11, %v5008_v29  ;;  %v10286_v28 = vsel %vm10246_vm6, 1.0, %v9000_v15  ;;  %v8175_v29 = vld [vmem:[#allocation16 + $0x10] sm:$0xff]  }
0x1918   :  { %v5025_v58 = vadd.f32 %v10256_v20, %v5015_v40  ;;  %v5016_v50 = vmul.f32 %v10254_v11, %v5006_v25 }
0x1919   :  { %v5031_v42 = vmax.f32 %v5027_v44, 0.0  ;;  %v5028_v27 = vadd.f32 %v10256_v20, %v5018_v13 }
0x191a   :  { %v5029_v45 = vmax.f32 %v5025_v58, 0.0  ;;  %v5026_v6 = vadd.f32 %v10256_v20, %v5016_v50  ;;  %v8177_v50 = vld [vmem:[#allocation16] sm:$0xff]  }
0x191b   :  { %v5041_v53 = vrot.slane %v5031_v42, 1  ;;  %v5032_v22 = vmax.f32 %v5028_v27, 0.0  ;;  %v5057_v62 = vrot.slane %v5031_v42, 2  ;;  %v5073_v43 = vrot.slane %v5031_v42, 3  ;;  %v8178_v27 = vld [vmem:[#allocation16 + $0x8] sm:$0xff]  }
0x191c   :  { %v5038_v16 = vrot.slane %v5029_v45, 1  ;;  %v5030_v31 = vmax.f32 %v5026_v6, 0.0  ;;  %v5054_v2 = vrot.slane %v5029_v45, 2  ;;  %v5070_v32 = vrot.slane %v5029_v45, 3 }
0x191d   :  { %v5043_v59 = vrot.slane %v5032_v22, 1  ;;  %v5059_v4 = vrot.slane %v5032_v22, 2  ;;  %v5075_v63 = vrot.slane %v5032_v22, 3 }
0x191e   :  { %v5039_v51 = vrot.slane %v5030_v31, 1  ;;  %v5055_v5 = vrot.slane %v5030_v31, 2  ;;  %v5071_v54 = vrot.slane %v5030_v31, 3 }
0x191f   :  { %v5052_v8 = vmax.f32 %v5032_v22, %v5043_v59  ;;  %v5044_v12 = vsel %vm4845_vm2, %v5041_v53, %v5043_v59  ;;  %v5060_v10 = vsel %vm5053_vm7, %v5057_v62, %v5059_v4  ;;  %v5076_v3 = vsel %vm5069_vm8, %v5073_v43, %v5075_v63 }
0x1920   :  { %v5040_v9 = vsel %vm4845_vm2, %v5038_v16, %v5039_v51  ;;  %v5042_v61 = vsel %vm4845_vm2, %v5039_v51, %v5041_v53  ;;  %v5056_v60 = vsel %vm5053_vm7, %v5054_v2, %v5055_v5  ;;  %v5058_v24 = vsel %vm5053_vm7, %v5055_v5, %v5057_v62  ;;  %v6804_v16 = vld [vmem:[#allocation17] ss:$0 sm:$0xff] }
0x1921   :  { %v5049_v23 = vmax.f32 %v5029_v45, %v5040_v9  ;;  %v5050_v14 = vmax.f32 %v5030_v31, %v5042_v61  ;;  %v5072_v47 = vsel %vm5069_vm8, %v5070_v32, %v5071_v54  ;;  %v5074_v56 = vsel %vm5069_vm8, %v5071_v54, %v5073_v43 }
0x1922   :  { %v5051_v18 = vmax.f32 %v5031_v42, %v5044_v12  ;;  %v5068_v17 = vmax.f32 %v5052_v8, %v5059_v4  ;;  %v9003_v45 = vmov 0.0|0.0  }
0x1923   :  { %v5065_v19 = vmax.f32 %v5049_v23, %v5056_v60  ;;  %v5066_v1 = vmax.f32 %v5050_v14, %v5058_v24 }
0x1924   :  { %v5067_v26 = vmax.f32 %v5051_v18, %v5060_v10  ;;  %v5084_v35 = vmax.f32 %v5068_v17, %v5075_v63 }
0x1925   :  { %v5081_v0 = vmax.f32 %v5065_v19, %v5072_v47  ;;  %v5082_v38 = vmax.f32 %v5066_v1, %v5074_v56  ;;  %v8179_v19 = vld [vmem:[#allocation23] sm:$0xff]  }
0x1926   :  { %v5083_v48 = vmax.f32 %v5067_v26, %v5076_v3 }
0x1927   :  { %v7898_v41 = vpack.c.bf16 %v5082_v38, %v5081_v0  ;;  %v313_v0 = vld [vmem:[%s10545_s4 + $0x18] sm:$0xff]  ;;  %v8180_v38 = vld [vmem:[#allocation22] sm:$0xff]  }
0x1928   :  { %v7902_v21 = vpack.c.bf16 %v5084_v35, %v5083_v48  ;;  %v312_v35 = vld [vmem:[%s10545_s4 + $0x10] sm:$0xff] }
0x1929   :  { %7899 = vmatprep.subr.bf16.mxu1 %v7898_v41  ;;  %v5410_v48 = vpack.c.bf16 %v313_v0, %v312_v35 }
0x192a   :  { %7901 = vmatpush3.bf16.msra.mxu1 %v7898_v41  ;;  %v8181_v41 = vld [vmem:[#allocation22 + $0x8] sm:$0xff]  }
0x192b   :  { %7904 = vmatprep.subr.msk.bf16.mxu1 %vm10275_vm11, %v7902_v21 }
0x192e   :  { %7907 = vmatpush3.bf16.msk.msra.mxu1 %vm10275_vm11, %v7902_v21  ;;  %v8182_v21 = vld [vmem:[#allocation22 + $0x10] sm:$0xff]  }
0x192f   :  { %7755 = vmatprep.subr.bf16.mxu1 %v9000_v15 }
0x1931   :  { %7753 = vmatmul.mubr.msk.f32.vlgmr.msra.gmra.mrb[96].mxu1 %vm5098_vm4, %v10286_v28 }
0x1932   :  { %7756 = vmatpush3.bf16.msra.mxu1 %v8175_v29  ;;  %7759 = vmatprep.mubr.msk.bf16.mxu1 %vm9002_vm12, %v9000_v15  ;;  %v8183_v29 = vld [vmem:[#allocation22 + $0x18] sm:$0xff]  }
0x1933   :  { %7757 = vmatprep.subr.bf16.mxu1 %v9000_v15 }
0x1936   :  { %7758 = vmatpush3.bf16.msra.mxu1 %v8176_v30 }
0x1937   :  { %7763 = vmatprep.subr.bf16.mxu1 %v9000_v15 }
0x1a04   :  { %v7754_v52 = vpop.f32.mrb[96].mxu1 }
0x1a05   :  { %v5175_v40 = vpop.f32.mrb[97].mxu1 }
0x1a06   :  { %v5184_v25 = vpack.c.bf16 %v7754_v52, %v5175_v40  ;;  %v8184_v52 = vld [vmem:[#allocation23 + $0x8] sm:$0xff]  }
0x1a08   :  { %v5188_v44 = vshll.u32 %v5184_v25, 16  ;;  %v5186_v13 = vshrl.u32 %v5184_v25, 16 }
0x1a0a   :  { %v5190_v58 = vrot.slane %v5188_v44, 1 }
0x1a0c   :  { %v5191_v42 = vor.u32 %v5190_v58, %v5186_v13 }
0x1a0e   :  { %7760 = vmatmul.mubr.msk.bf16.vlgmr.msra.gmra.mrb[100].mxu1 %vm470_vm0, %v5191_v42  ;;  %v8186_v42 = vld [vmem:[#allocation22 + $0x28] sm:$0xff]  }
0x1a0f   :  { %7764 = vmatpush3.bf16.msra.mxu1 %v8177_v50  ;;  %7767 = vmatprep.mubr.msk.bf16.mxu1 %vm9002_vm12, %v9000_v15  ;;  %v8185_v50 = vld [vmem:[#allocation22 + $0x20] sm:$0xff]  }
0x1a10   :  { %7765 = vmatprep.subr.bf16.mxu1 %v9000_v15 }
0x1a13   :  { %7766 = vmatpush3.bf16.msra.mxu1 %v8178_v27  ;;  %v8187_v27 = vld [vmem:[#allocation23 + $0x10] sm:$0xff]  }
0x1a14   :  { %7908 = vmatprep.subr.bf16.mxu1 %v9003_v45 }
0x1a16   :  { %7768 = vmatmul.mubr.msk.bf16.vlgmr.msra.gmra.mrb[104].mxu1 %vm470_vm0, %v5184_v25  ;;  %v5605_v25 = vshll.u32 %v5410_v48, 16 }
0x1a17   :  { %7775 = vmatprep.mubr.msk.f32.mxu1 %vm9002_vm12, %v9000_v15 }
0x1a18   :  { %v5607_v13 = vrot.slane %v5605_v25, 1 }
0x1ae1   :  { %v5241_v6 = vpop.f32.mrb[100].mxu1 }
0x1ae2   :  { %v7761_v53 = vpop.f32.mrb[101].mxu1 }
0x1ae3   :  { %v5244_v22 = vpop.f32.mrb[102].mxu1 }
0x1ae4   :  { %v7762_v62 = vpop.f32.mrb[103].mxu1 }
0x1ae5   :  { %v8189_v62 = vld [vmem:[#allocation22 + $0x38] sm:$0xff]  }
0x1ae9   :  { %v5296_v31 = vpop.f32.mrb[104].mxu1 }
0x1aea   :  { %v5297_v43 = vadd.f32 %v5296_v31, %v5241_v6  ;;  %v7769_v2 = vpop.f32.mrb[105].mxu1 }
0x1aeb   :  { %v5299_v59 = vpop.f32.mrb[106].mxu1  ;;  %v5881_v2 = vrot.slane %v5605_v25, 2 }
0x1aec   :  { %v5309_v4 = vadd.f32 %v6804_v16, %v5297_v43  ;;  %v5300_v63 = vadd.f32 %v5299_v59, %v5244_v22  ;;  %v7770_v51 = vpop.f32.mrb[107].mxu1  ;;  %v8188_v22 = vld [vmem:[#allocation22 + $0x30] sm:$0xff]  }
0x1aed   :  { %v6835_v51 = vld [vmem:[#allocation25] ss:$0 sm:$0xff] }
0x1aee   :  { %v5311_v5 = vmul.f32 %v10254_v11, %v5309_v4  ;;  %v5310_v32 = vadd.f32 %v6804_v16, %v5300_v63 }
0x1af0   :  { %v5313_v54 = vadd.f32 %v10256_v20, %v5311_v5  ;;  %v5312_v8 = vmul.f32 %v10254_v11, %v5310_v32  ;;  %v310_v11 = vld [vmem:[%s10545_s4] sm:$0xff] }
0x1af1   :  { %v10363_v5 = vld [vmem:[%s10489_s19] ss:$0 sm:$0xff] }
0x1af2   :  { %v5315_v12 = vmax.f32 %v5313_v54, 0.0  ;;  %v5314_v10 = vadd.f32 %v10256_v20, %v5312_v8  ;;  %v311_v20 = vld [vmem:[%s10545_s4 + $0x8] sm:$0xff]  ;;  %s9004_s4 = smov [#allocation29]  }
0x1af3   :  { %v10317_v26 = vpack.c.bf16 %v311_v20, %v310_v11  ;;  %s6529_s25 = sshll.u32 %s9004_s4, 4  ;;  %s6530_s25 = int_to_ptr.vmem [resolvable:$true] %s6529_s25 }
0x1af4   :  { %v5316_v3 = vmax.f32 %v5314_v10, 0.0  ;;  %v5319_v9 = vrot.slane %v5315_v12, 1  ;;  %v5326_v61 = vrot.slane %v5315_v12, 2  ;;  %s8935_s5 = scalar_lea.vmem %s6530_s25, 16  ;;  %s8939_s15 = scalar_lea.vmem %s6530_s25, 32 }
0x1af5   :  { %v5601_v30 = vshll.u32 %v10317_v26, 16  ;;  %v5599_v40 = vshrl.u32 %v10317_v26, 16  ;;  %v5744_v6 = vrot.slane %v10317_v26, 1  ;;  %p8936_p10 = scmp.ne.s32.totalorder %s6530_s25, %s8935_s5  ;;  %p8940_p11 = scmp.lt.s32.totalorder %s6530_s25, %s6530_s25 }
0x1af6   :  { %v5320_v60 = vrot.slane %v5316_v3, 1  ;;  %v5327_v24 = vrot.slane %v5316_v3, 2  ;;  %p8941_p12 = scmp.lt.s32.totalorder %s8939_s15, %s8935_s5 }
0x1af7   :  { %v5877_v16 = vrot.slane %v5599_v40, 1  ;;  %v5878_v31 = vrot.slane %v5601_v30, 2 }
0x1af8   :  { %v5321_v23 = vsel %vm4845_vm2, %v5319_v9, %v5320_v60  ;;  %v5325_v14 = vmax.f32 %v5316_v3, %v5320_v60  ;;  %v5328_v47 = vsel %vm5053_vm7, %v5326_v61, %v5327_v24  ;;  %p8942_p13 = por %p8941_p12, %p8940_p11 }
0x1af9   :  { %v5324_v56 = vmax.f32 %v5315_v12, %v5321_v23 }
0x1afa   :  { %v5332_v18 = vmax.f32 %v5325_v14, %v5327_v24  ;;  %p8943_p0 = pnand %p8942_p13, %p8936_p10 }
0x1afb   :  { %v5331_v17 = vmax.f32 %v5324_v56, %v5328_v47 }
0x1afd   :  { %v7909_v1 = vpack.c.bf16 %v5332_v18, %v5331_v17 }
0x1aff   :  { %7911 = vmatpush3.bf16.msk.msra.mxu1 %vm10275_vm11, %v7909_v1 }
0x1b00   :  { %7778 = vmatprep.subr.bf16.mxu1 %v8179_v19 }
0x1b02   :  { %7776 = vmatmul.mubr.msk.f32.vlgmr.msra.gmra.mrb[98].mxu1 %vm5333_vm13, %v10244_v39 }
0x1b03   :  { %7779 = vmatpush3.bf16.msra.mxu1 %v8179_v19  ;;  %7780 = vmatprep.mubr.msk.bf16.mxu1 %vm5417_vm14, %v10317_v26 }
0x1b04   :  { %7784 = vmatprep.subr.bf16.mxu1 %v8180_v38 }
0x1b06   :  { %7781 = vmatmul.mubr.msk.bf16.vlgmr.msra.gmra.mrb[108].mxu1 %vm5417_vm14, %v5410_v48 }
0x1b07   :  { %7788 = vmatprep.mubr.msk.bf16.mxu1 %vm470_vm0, %v10186_v49  ;;  %7785 = vmatpush3.bf16.msra.mxu1 %v8180_v38  ;;  %v5603_v49 = vrot.slane %v5601_v30, 1 }
0x1b08   :  { %7786 = vmatprep.subr.bf16.mxu1 %v8181_v41 }
0x1b09   :  { %v5604_v44 = vor.u32 %v5603_v49, %v5599_v40 }
0x1b0b   :  { %7787 = vmatpush3.bf16.msra.mxu1 %v8181_v41  ;;  %v5608_v58 = vsel %vm4695_vm1, %v5604_v44, %v5607_v13 }
0x1b0c   :  { %7792 = vmatprep.subr.bf16.mxu1 %v8182_v21 }
0x1b12   :  { %7789 = vmatmul.mubr.msk.bf16.vlgmr.msra.gmra.mrb[108].mxu1 %vm470_vm0, %v10184_v37  ;;  %v5609_v37 = vshrl.u32 %v5410_v48, 16 }
0x1b13   :  { %7796 = vmatprep.mubr.msk.bf16.mxu1 %vm470_vm0, %v10193_v36  ;;  %7793 = vmatpush3.bf16.msra.mxu1 %v8182_v21 }
0x1b14   :  { %7794 = vmatprep.subr.bf16.mxu1 %v8183_v29  ;;  %v5611_v36 = vor.u32 %v5609_v37, %v5607_v13  ;;  %v5880_v43 = vrot.slane %v5609_v37, 1 }
0x1b16   :  { %v5882_v59 = vor.u32 %v5881_v2, %v5880_v43 }
0x1b17   :  { %7795 = vmatpush3.bf16.msra.mxu1 %v8183_v29 }
0x1b18   :  { %7800 = vmatprep.subr.bf16.mxu1 %v8184_v52 }
0x1b1e   :  { %7797 = vmatmul.mubr.msk.bf16.vlgmr.msra.gmra.mrb[108].mxu1 %vm470_vm0, %v10195_v33  ;;  %v5745_v33 = vrot.slane %v5410_v48, 1 }
0x1b1f   :  { %7801 = vmatpush3.bf16.msra.mxu1 %v8184_v52  ;;  %7802 = vmatprep.mubr.msk.bf16.mxu1 %vm5417_vm14, %v5608_v58 }
0x1b20   :  { %7806 = vmatprep.subr.bf16.mxu1 %v8185_v50  ;;  %v5746_v53 = vsel %vm4845_vm2, %v5744_v6, %v5745_v33 }
0x1b2a   :  { %7803 = vmatmul.mubr.msk.bf16.vlgmr.msra.gmra.mrb[108].mxu1 %vm5417_vm14, %v5611_v36 }
0x1b2b   :  { %7810 = vmatprep.mubr.msk.bf16.mxu1 %vm470_vm0, %v10221_v46  ;;  %7807 = vmatpush3.bf16.msra.mxu1 %v8185_v50  ;;  %v8190_v46 = vld [vmem:[#allocation23 + $0x18] sm:$0xff]  }
0x1b2c   :  { %7808 = vmatprep.subr.bf16.mxu1 %v8186_v42 }
0x1b2f   :  { %7809 = vmatpush3.bf16.msra.mxu1 %v8186_v42 }
0x1b30   :  { %7814 = vmatprep.subr.bf16.mxu1 %v8187_v27 }
0x1b36   :  { %7811 = vmatmul.mubr.msk.bf16.vlgmr.msra.gmra.mrb[108].mxu1 %vm470_vm0, %v10212_v7  ;;  %v5879_v7 = vor.u32 %v5878_v31, %v5877_v16 }
0x1b37   :  { %7815 = vmatpush3.bf16.msra.mxu1 %v8187_v27  ;;  %7816 = vmatprep.mubr.msk.bf16.mxu1 %vm5417_vm14, %v5746_v53 }
0x1b38   :  { %7820 = vmatprep.subr.bf16.mxu1 %v8188_v22  ;;  %v5883_v4 = vsel %vm4920_vm3, %v5879_v7, %v5882_v59 }
0x1b42   :  { %7817 = vmatmul.mubr.msk.bf16.vlgmr.msra.gmra.mrb[108].mxu1 %vm5417_vm14, %v5745_v33 }
0x1b43   :  { %7824 = vmatprep.mubr.msk.bf16.mxu1 %vm470_vm0, %v10237_v57  ;;  %7821 = vmatpush3.bf16.msra.mxu1 %v8188_v22 }
0x1b44   :  { %7822 = vmatprep.subr.bf16.mxu1 %v8189_v62 }
0x1b47   :  { %7823 = vmatpush3.bf16.msra.mxu1 %v8189_v62 }
0x1b48   :  { %7828 = vmatprep.subr.bf16.mxu1 %v8190_v46 }
0x1b4e   :  { %7825 = vmatmul.mubr.msk.bf16.vlgmr.msra.gmra.mrb[108].mxu1 %vm470_vm0, %v10228_v55  ;;  %v10368_v55 = vld [vmem:[%s10490_s20] ss:$0 sm:$0xff] }
0x1b4f   :  { %7829 = vmatpush3.bf16.msra.mxu1 %v8190_v46  ;;  %7830 = vmatprep.mubr.msk.bf16.mxu1 %vm5417_vm14, %v5883_v4 }
0x1b5a   :  { %7831 = vmatmul.mubr.msk.bf16.vlgmr.msra.gmra.mrb[108].mxu1 %vm5417_vm14, %v5882_v59 }
0x1bd5   :  { %v10358_v57 = vpop.f32.mrb[98].mxu1 }
0x1bd6   :  { %v7777_v63 = vpop.f32.mrb[99].mxu1 }
0x1c2d   :  { %v7832_v32 = vpop.f32.mrb[108].mxu1 }
0x1c2e   :  { %v5957_v54 = vadd.f32 %v7832_v32, %v6835_v51  ;;  %v5930_v8 = vpop.f32.mrb[109].mxu1  ;;  %v8192_v32 = vld [vmem:[%s10487_s17 + $0x20] sm:$0xff]  }
0x1c2f   :  { %v5955_v12 = vadd.f32 %v6835_v51, %v5930_v8  ;;  %v7833_v10 = vpop.f32.mrb[110].mxu1 }
0x1c30   :  { %v5967_v3 = vmul.f32 %v10363_v5, %v5957_v54  ;;  %v5958_v9 = vadd.f32 %v7833_v10, %v6835_v51  ;;  %v5933_v61 = vpop.f32.mrb[111].mxu1  ;;  %v8193_v54 = vld [vmem:[%s10487_s17 + $0x28] sm:$0xff]  }
0x1c31   :  { %v5965_v60 = vmul.f32 %v10363_v5, %v5955_v12  ;;  %v5956_v24 = vadd.f32 %v6835_v51, %v5933_v61  ;;  %v8191_v51 = vld [vmem:[%s10487_s17 + $0x18] sm:$0xff]   ;;  %v8194_v61 = vld [vmem:[%s10487_s17] sm:$0xff]  }
0x1c32   :  { %v5977_v23 = vadd.f32 %v10368_v55, %v5967_v3  ;;  %v5968_v14 = vmul.f32 %v10363_v5, %v5958_v9 }
0x1c33   :  { %v5975_v47 = vadd.f32 %v10368_v55, %v5965_v60  ;;  %v5966_v56 = vmul.f32 %v10363_v5, %v5956_v24  ;;  %v8195_v24 = vld [vmem:[%s10487_s17 + $0x8] sm:$0xff]  }
0x1c34   :  { %v5981_v18 = vmax.f32 %v5977_v23, 0.0  ;;  %v5978_v17 = vadd.f32 %v10368_v55, %v5968_v14  ;;  %v8196_v23 = vld [vmem:[%s10487_s17 + $0x10] sm:$0xff]  }
0x1c35   :  { %v5979_v19 = vmax.f32 %v5975_v47, 0.0  ;;  %v5976_v11 = vadd.f32 %v10368_v55, %v5966_v56 }
0x1c36   :  { %v5990_v20 = vrot.slane %v5981_v18, 1  ;;  %v5982_v1 = vmax.f32 %v5978_v17, 0.0  ;;  %v6005_v26 = vrot.slane %v5981_v18, 2  ;;  %v6020_v38 = vrot.slane %v5981_v18, 3  ;;  %v6849_v17 = vld [vmem:[%s10488_s18] ss:$0 sm:$0xff] }
0x1c37   :  { %v5987_v35 = vrot.slane %v5979_v19, 1  ;;  %v5980_v0 = vmax.f32 %v5976_v11, 0.0  ;;  %v6002_v48 = vrot.slane %v5979_v19, 2  ;;  %v6017_v40 = vrot.slane %v5979_v19, 3 }
0x1c38   :  { %v5992_v41 = vrot.slane %v5982_v1, 1  ;;  %v6007_v21 = vrot.slane %v5982_v1, 2  ;;  %v6022_v29 = vrot.slane %v5982_v1, 3 }
0x1c39   :  { %v5988_v30 = vrot.slane %v5980_v0, 1  ;;  %v6003_v52 = vrot.slane %v5980_v0, 2  ;;  %v6018_v49 = vrot.slane %v5980_v0, 3 }
0x1c3a   :  { %v6001_v25 = vmax.f32 %v5982_v1, %v5992_v41  ;;  %v5993_v44 = vsel %vm4845_vm2, %v5990_v20, %v5992_v41  ;;  %v6008_v13 = vsel %vm5053_vm7, %v6005_v26, %v6007_v21  ;;  %v6023_v58 = vsel %vm5069_vm8, %v6020_v38, %v6022_v29 }
0x1c3b   :  { %v5989_v50 = vsel %vm4845_vm2, %v5987_v35, %v5988_v30  ;;  %v5991_v37 = vsel %vm4845_vm2, %v5988_v30, %v5990_v20  ;;  %v6004_v36 = vsel %vm5053_vm7, %v6002_v48, %v6003_v52  ;;  %v6006_v42 = vsel %vm5053_vm7, %v6003_v52, %v6005_v26 }
0x1c3c   :  { %v5998_v27 = vmax.f32 %v5979_v19, %v5989_v50  ;;  %v5999_v6 = vmax.f32 %v5980_v0, %v5991_v37  ;;  %v6019_v33 = vsel %vm5069_vm8, %v6017_v40, %v6018_v49  ;;  %v6021_v53 = vsel %vm5069_vm8, %v6018_v49, %v6020_v38 }
0x1c3d   :  { %v6000_v22 = vmax.f32 %v5981_v18, %v5993_v44  ;;  %v6016_v62 = vmax.f32 %v6001_v25, %v6007_v21 }
0x1c3e   :  { %v6013_v46 = vmax.f32 %v5998_v27, %v6004_v36  ;;  %v6014_v16 = vmax.f32 %v5999_v6, %v6006_v42  ;;  %v444_v27 = vld [vmem:[#allocation26] sm:$0xff]  ;;  %v445_v6 = vld [vmem:[#allocation26 + $0x8] sm:$0xff] }
0x1c3f   :  { %v6015_v31 = vmax.f32 %v6000_v22, %v6008_v13  ;;  %v6031_v43 = vmax.f32 %v6016_v62, %v6022_v29  ;;  %v449_v62 = vld [vmem:[#allocation28] sm:$0xff] }
0x1c40   :  { %v6028_v2 = vmax.f32 %v6013_v46, %v6019_v33  ;;  %v6029_v7 = vmax.f32 %v6014_v16, %v6021_v53  ;;  %v447_v53 = vld [vmem:[#allocation26 + $0x18] sm:$0xff]  ;;  %v450_v46 = vld [vmem:[#allocation28 + $0x8] sm:$0xff]  ;;  %v451_v16 = vld [vmem:[#allocation28 + $0x10] sm:$0xff] }
0x1c41   :  { %v6030_v59 = vmax.f32 %v6015_v31, %v6023_v58  ;;  %v7933_v34 = vpack.c.bf16 %v450_v46, %v449_v62  ;;  %v452_v31 = vld [vmem:[#allocation28 + $0x18] sm:$0xff] }
0x1c42   :  { %v7912_v4 = vpack.c.bf16 %v6029_v7, %v6028_v2  ;;  %v454_v2 = vld [vmem:[#allocation28 + $0x28] sm:$0xff] }
0x1c43   :  { %v7916_v63 = vpack.c.bf16 %v6031_v43, %v6030_v59  ;;  %v453_v43 = vld [vmem:[#allocation28 + $0x20] sm:$0xff] }
0x1c44   :  { %7913 = vmatprep.subr.bf16.mxu0 %v7912_v4  ;;  %v7939_v7 = vpack.c.bf16 %v454_v2, %v453_v43 }
0x1c45   :  { %7915 = vmatpush3.bf16.msra.mxu0 %v7912_v4 }
0x1c46   :  { %7918 = vmatprep.subr.msk.bf16.mxu0 %vm10275_vm11, %v7916_v63 }
0x1c49   :  { %7921 = vmatpush3.bf16.msk.msra.mxu0 %vm10275_vm11, %v7916_v63 }
0x1c4a   :  { %7845 = vmatprep.subr.bf16.mxu0 %v9000_v15 }
0x1c4c   :  { %7843 = vmatmul.mubr.msk.f32.vlgmr.msra.gmra.mrb[100].mxu0 %vm5098_vm4, %v10286_v28 }
0x1c4d   :  { %7846 = vmatpush3.bf16.msra.mxu0 %v8191_v51  ;;  %7851 = vmatprep.mubr.msk.bf16.mxu0 %vm9002_vm12, %v9000_v15  ;;  %v6852_v51 = vld [vmem:[%s10546_s29] ss:$0 sm:$0xff] }
0x1c4e   :  { %7847 = vmatprep.subr.bf16.mxu0 %v9000_v15 }
0x1c51   :  { %7848 = vmatpush3.bf16.msra.mxu0 %v8192_v32 }
0x1c52   :  { %7849 = vmatprep.subr.bf16.mxu0 %v9000_v15 }
0x1c55   :  { %7850 = vmatpush3.bf16.msra.mxu0 %v8193_v54 }
0x1c56   :  { %7855 = vmatprep.subr.bf16.mxu0 %v9000_v15 }
0x1d1f   :  { %v7844_v28 = vpop.f32.mrb[100].mxu0 }
0x1d20   :  { %v6101_v8 = vpop.f32.mrb[101].mxu0 }
0x1d21   :  { %v6110_v12 = vpack.c.bf16 %v7844_v28, %v6101_v8 }
0x1d23   :  { %v6114_v10 = vshll.u32 %v6110_v12, 16  ;;  %v6112_v3 = vshrl.u32 %v6110_v12, 16 }
0x1d25   :  { %v6116_v9 = vrot.slane %v6114_v10, 1 }
0x1d27   :  { %v6117_v60 = vor.u32 %v6116_v9, %v6112_v3 }
0x1d29   :  { %7852 = vmatmul.mubr.msk.bf16.vlgmr.msra.gmra.mrb[104].mxu0 %vm6136_vm15, %v6117_v60 }
0x1d2a   :  { %7856 = vmatpush3.bf16.msra.mxu0 %v8194_v61  ;;  %7861 = vmatprep.mubr.msk.bf16.mxu0 %vm9002_vm12, %v9000_v15 }
0x1d2b   :  { %7857 = vmatprep.subr.bf16.mxu0 %v9000_v15 }
0x1d2e   :  { %7858 = vmatpush3.bf16.msra.mxu0 %v8195_v24 }
0x1d2f   :  { %7859 = vmatprep.subr.bf16.mxu0 %v9000_v15 }
0x1d32   :  { %7860 = vmatpush3.bf16.msra.mxu0 %v8196_v23 }
0x1d33   :  { %7922 = vmatprep.subr.bf16.mxu0 %v9003_v45 }
0x1d35   :  { %7862 = vmatmul.mubr.msk.bf16.vlgmr.msra.gmra.mrb[108].mxu0 %vm6136_vm15, %v6110_v12 }
0x1d36   :  { %7869 = vmatprep.mubr.msk.f32.mxu0 %vm9002_vm12, %v9000_v15 }
0x1dfc   :  { %v6174_v14 = vpop.f32.mrb[104].mxu0 }
0x1dfd   :  { %v7853_v47 = vpop.f32.mrb[105].mxu0 }
0x1dfe   :  { %v6177_v56 = vpop.f32.mrb[106].mxu0 }
0x1dff   :  { %v7854_v18 = vpop.f32.mrb[107].mxu0 }
0x1e08   :  { %v6235_v19 = vpop.f32.mrb[108].mxu0 }
0x1e09   :  { %v6236_v11 = vadd.f32 %v6235_v19, %v6174_v14  ;;  %v7863_v20 = vpop.f32.mrb[109].mxu0 }
0x1e0a   :  { %v6238_v1 = vpop.f32.mrb[110].mxu0 }
0x1e0b   :  { %v6248_v26 = vadd.f32 %v6849_v17, %v6236_v11  ;;  %v6239_v35 = vadd.f32 %v6238_v1, %v6177_v56  ;;  %v7864_v0 = vpop.f32.mrb[111].mxu0 }
0x1e0d   :  { %v6250_v38 = vmul.f32 %v10363_v5, %v6248_v26  ;;  %v6249_v48 = vadd.f32 %v6849_v17, %v6239_v35 }
0x1e0f   :  { %v6252_v41 = vadd.f32 %v10368_v55, %v6250_v38  ;;  %v6251_v21 = vmul.f32 %v10363_v5, %v6249_v48  ;;  %v7927_v5 = vpack.c.bf16 %v445_v6, %v444_v27 }
0x1e11   :  { %v6254_v29 = vmax.f32 %v6252_v41, 0.0  ;;  %v6253_v30 = vadd.f32 %v10368_v55, %v6251_v21  ;;  %v446_v55 = vld [vmem:[#allocation26 + $0x10] sm:$0xff] }
0x1e12   :  { %v7930_v22 = vpack.c.bf16 %v447_v53, %v446_v55 }
0x1e13   :  { %v6255_v52 = vmax.f32 %v6253_v30, 0.0  ;;  %v6258_v40 = vrot.slane %v6254_v29, 1  ;;  %v6265_v49 = vrot.slane %v6254_v29, 2 }
0x1e15   :  { %v6259_v25 = vrot.slane %v6255_v52, 1  ;;  %v6266_v44 = vrot.slane %v6255_v52, 2 }
0x1e17   :  { %v6260_v13 = vsel %vm4845_vm2, %v6258_v40, %v6259_v25  ;;  %v6264_v58 = vmax.f32 %v6255_v52, %v6259_v25  ;;  %v6267_v50 = vsel %vm5053_vm7, %v6265_v49, %v6266_v44 }
0x1e18   :  { %v6263_v37 = vmax.f32 %v6254_v29, %v6260_v13 }
0x1e19   :  { %v6271_v36 = vmax.f32 %v6264_v58, %v6266_v44 }
0x1e1a   :  { %v6270_v42 = vmax.f32 %v6263_v37, %v6267_v50 }
0x1e1c   :  { %v7923_v33 = vpack.c.bf16 %v6271_v36, %v6270_v42 }
0x1e1e   :  { %7925 = vmatpush3.bf16.msk.msra.mxu0 %vm10275_vm11, %v7923_v33 }
0x1e1f   :  { %7926 = vmatprep.subr.bf16.mxu0 %v9003_v45 }
0x1e21   :  { %7870 = vmatmul.mubr.msk.f32.vlgmr.msra.gmra.mrb[102].mxu0 %vm5333_vm13, %v10244_v39  ;;  %v7936_v39 = vpack.c.bf16 %v452_v31, %v451_v16 }
0x1e22   :  { %7928 = vmatpush3.bf16.msra.mxu0 %v7927_v5  ;;  %7880 = vmatprep.mubr.msk.f32.mxu0 %vm9002_vm12, %v9000_v15 }
0x1e23   :  { %7929 = vmatprep.subr.bf16.mxu0 %v9003_v45 }
0x1e26   :  { %7931 = vmatpush3.bf16.msra.mxu0 %v7930_v22 }
0x1e27   :  { %7932 = vmatprep.subr.bf16.mxu0 %v9003_v45 }
0x1e29   :  { %7881 = vmatmul.mubr.msk.f32.vlgmr.msra.gmra.mrb[112].mxu0 %vm470_vm0, %v10358_v57 }
0x1e2a   :  { %7934 = vmatpush3.bf16.msra.mxu0 %v7933_v34  ;;  %7895 = vmatprep.mubr.msk.f32.mxu0 %vm9002_vm12, %v9000_v15  ;;  %v6854_v15 = vld [vmem:[%s10547_s8] ss:$0 sm:$0xff] }
0x1e2b   :  { %7935 = vmatprep.subr.bf16.mxu0 %v9003_v45 }
0x1e2e   :  { %7937 = vmatpush3.bf16.msra.mxu0 %v7936_v39 }
0x1e2f   :  { %7938 = vmatprep.subr.bf16.mxu0 %v9003_v45 }
0x1e32   :  { %7940 = vmatpush3.bf16.msra.mxu0 %v7939_v7 }
0x1ef4   :  { %v6341_v59 = vpop.f32.mrb[102].mxu0 }
0x1ef5   :  { %7896 = vmatmul.mubr.msk.f32.vlgmr.msra.gmra.mrb[114].mxu0 %vm6136_vm15, %v6341_v59  ;;  %v7871_v4 = vpop.f32.mrb[103].mxu0 }
0x1efc   :  { %v6420_v63 = vpop.f32.mrb[112].mxu0 }
0x1efd   :  { %v7882_v57 = vpop.f32.mrb[113].mxu0  ;;  %v6421_v54 = vadd.f32 %v6852_v51, %v6420_v63 }
0x1fc8   :  { %v6499_v32 = vpop.f32.mrb[114].mxu0 }
0x1fc9   :  { %v6500_v28 = vadd.f32 %v6854_v15, %v6499_v32  ;;  %v7897_v8 = vpop.f32.mrb[115].mxu0 }
0x1fcb   :  { %v6503_v45 = vmul.f32 %v6500_v28, %v6421_v54 }
0x1fcd   :  { %v6504_v12 = vsel %vm5069_vm8, %v6503_v45, 0.0 }
0x1fce   :  { %v6505_v10 = vrot.slane %v6504_v12, 4 }
0x1fd0   :  { %v6506_v3 = vadd.f32 %v6505_v10, %v6504_v12 }
0x1fd2   :  { %v6507_v9 = vrot.slane %v6506_v3, 2 }
0x1fd4   :  { %v6508_v61 = vadd.f32 %v6507_v9, %v6506_v3 }
0x1fd6   :  { %v6509_v60 = vrot.slane %v6508_v61, 1 }
0x1fd8   :  { %v6510_v24 = vadd.f32 %v6509_v60, %v6508_v61 }
0x1fda   :  { %v6512_v23 = vmul.f32 0.2, %v6510_v24 }
0x1fdc   :  { %6513 = vmax.xlane.f32.xlu0 %v6512_v23 }
0x2069   :  { %v6514_v14 = vpop.xlane.xlu0 %6513 }
0x206a   :  { %v6515_v47 = vsub.f32 %v6512_v23, %v6514_v14 }
0x206c   :  { %v6516_v56 = vmul.f32 1.442695, %v6515_v47 }
0x206e   :  { %8517 = vpow2.f32 %v6516_v56 }
0x2078   :  { %v8518_v18 = vpop.eup %8517 }
0x2079   :  { %6518 = vadd.xlane.f32.xlu0 %v8518_v18 }
0x2106   :  { %v6519_v17 = vpop.xlane.xlu0 %6518 }
0x2107   :  { %8519 = vrcp.f32 %v6519_v17 }
0x2111   :  { %v8520_v19 = vpop.eup %8519 }
0x2112   :  { %v6521_v11 = vmul.f32 %v8520_v19, %v8518_v18 }
0x2114   :  { %6522 = vst [vmem:[#allocation29] sm:$0x1] %v6521_v11 }
0x2115   :  { %8946 = shalt.err (!%p8943_p0)
}
0x2116   :  { %s10548_s16 = sld [smem:[#allocation52_spill]] }
0x211c   :  { %s8947_s2 = scalar_lea.hbm %s10548_s16, 16 }
0x211d   :  { %p8948_p1 = scmp.ne.s32.totalorder %s10548_s16, %s8947_s2  ;;  %p8951_p2 = scmp.lt.u32.totalorder %s8947_s2, %s10548_s16 }
0x211f   :  { %p8953_p3 = pnand %p8951_p2, %p8948_p1 }
0x2121   :  { %8956 = shalt.err (!%p8953_p3)
}
0x2122   :  { %6532 = dma.vmem_to_hbm [thread:$0]  %s6530_s25, 16, %s10548_s16, [#allocation4]  }
0x2123   :  { %8975 = dma.done.wait [#allocation4], 16  }
0x2124   :  { %8976 = vsyncadd [#allocation4], 4294967280 }
0x2125   :  { %6536 = vsyncpa [#allocation3], 1 }
0x2126   :  { %6537 = vsyncpa [#allocation6], 1 }
0x2127   :  { %6538 = vsyncpa [#allocation9], 1 }
0x2128   :  { %6539 = vsyncpa [#allocation12], 1 }
0x2129   :  { %6540 = vsyncpa [#allocation15], 1 }
0x212a   :  { %6541 = vsyncpa [#allocation18], 1 }
0x212b   :  { %6542 = vsyncpa [#allocation21], 1 }
0x212c   :  { %6543 = vsyncpa [#allocation24], 1 }
0x212d   :  { %6544 = vsyncpa [#allocation27], 1 }
0x212e   :  { %6545 = vsyncpa [#allocation4], 1 }

</bundles_post_ra>
